<compile_context>
chip_gen: v7x
topology: tpu7x:2x2x1
jax: 0.10.0
libtpu: 0.0.40
codegen_flags: <defaults>
</compile_context>

<pallas_src>
import jax
import jax.numpy as jnp
import numpy as np
from jax.experimental import pallas as pl
from jax.experimental.pallas import tpu as pltpu


def _fusion_classifier_kernel(
    text_ref, img_ref, aud_ref,          # modality features [TB, S_m, D_m] (bf16 / f32)
    tmask_ref, imask_ref, amask_ref,     # masks [TB, S_m] (f32, 0/1)
    wt_ref, wi_ref, wa_ref,              # per-modality projections [D_m, H]
    wg_ref,                              # context gate [3H, H]
    wc_ref,                              # classifier  [H, H + Lpad]  (= wc1 || wc2)
    vec_ref,                             # packed [8, H] rows: bt,bi,ba,st,si,sa,bg,bc1
    bc2_ref,                             # classifier output bias [1, Lpad]
    out_ref,                             # logits [TB, Lpad]
):
    f32 = jnp.float32
    tb = out_ref.shape[0]
    H = wc_ref.shape[0]

    # Packed bias / score vectors (static sublane slices).
    bt, bi, ba = vec_ref[0:1, :], vec_ref[1:2, :], vec_ref[2:3, :]
    st, si, sa = vec_ref[3:4, :], vec_ref[4:5, :], vec_ref[5:6, :]
    bg, bc1 = vec_ref[6:7, :], vec_ref[7:8, :]

    # --- masked mean pooling on RAW features (pool-before-project) ------------------
    # The mask is {0,1} so the multiply is exact in the feature dtype; only the
    # reduction accumulates in f32, so no full-size f32 feature copy is kept live.
    def masked_mean(x_ref, m_ref):
        m = m_ref[...].astype(f32)                                   # [TB, S]
        xm = x_ref[...] * m[..., None].astype(x_ref.dtype)           # [TB, S, D]
        s = jnp.sum(xm.astype(f32), axis=1)                          # [TB, D]
        cnt = jnp.sum(m, axis=1, keepdims=True)                      # [TB, 1]
        return s / jnp.maximum(cnt, 1.0), cnt

    pooled_t_raw, cnt_t = masked_mean(text_ref, tmask_ref)           # [TB, D_t]
    pooled_i_raw, cnt_i = masked_mean(img_ref, imask_ref)            # [TB, D_i]
    pooled_a_raw, cnt_a = masked_mean(aud_ref, amask_ref)            # [TB, D_a]

    # CLS path: only token 0 of the text sequence feeds the classifier.
    cls_t_raw = text_ref[:, 0, :].astype(f32)                        # [TB, D_t]

    # --- projections (MXU); the two matmuls sharing wt are fused along M ------------
    t_rows = jnp.concatenate([pooled_t_raw, cls_t_raw], axis=0)      # [2*TB, D_t]
    t_proj = jnp.dot(t_rows, wt_ref[...], preferred_element_type=f32) + bt
    pooled_t = t_proj[:tb]                                           # [TB, H]
    proj_t_cls = t_proj[tb:]                                         # [TB, H]
    pooled_i = jnp.dot(pooled_i_raw, wi_ref[...], preferred_element_type=f32) + bi
    pooled_a = jnp.dot(pooled_a_raw, wa_ref[...], preferred_element_type=f32) + ba

    # Fully-masked modality -> pooled summary is 0 (matches project-then-pool).
    pooled_t = jnp.where(cnt_t > 0.0, pooled_t, 0.0)
    pooled_i = jnp.where(cnt_i > 0.0, pooled_i, 0.0)
    pooled_a = jnp.where(cnt_a > 0.0, pooled_a, 0.0)

    # --- adaptive attention (dynamic weighting): VPU multiply + lane reduce ----------
    sc_t = jnp.sum(pooled_t * st, axis=-1, keepdims=True)            # [TB, 1]
    sc_i = jnp.sum(pooled_i * si, axis=-1, keepdims=True)
    sc_a = jnp.sum(pooled_a * sa, axis=-1, keepdims=True)
    mx = jnp.maximum(jnp.maximum(sc_t, sc_i), sc_a)
    e_t = jnp.exp(sc_t - mx)
    e_i = jnp.exp(sc_i - mx)
    e_a = jnp.exp(sc_a - mx)
    inv = pl.reciprocal(e_t + e_i + e_a, approx=True)                # EUP slot
    w_t, w_i, w_a = e_t * inv, e_i * inv, e_a * inv

    # --- context gating: one K=3H matmul on the concatenated pooled summaries --------
    pooled_cat = jnp.concatenate([pooled_t, pooled_i, pooled_a], axis=-1)  # [TB, 3H]
    gate = jax.nn.sigmoid(
        jnp.dot(pooled_cat, wg_ref[...], preferred_element_type=f32) + bg)

    # --- CLS-only fusion (text present -> pooled output is token 0) ------------------
    cls = (w_t * proj_t_cls + w_i * pooled_i + w_a * pooled_a) * gate       # [TB, H]

    # --- classifier: Linear -> ReLU -> (Dropout=identity) -> Linear ------------------
    h = jnp.maximum(
        jnp.dot(cls, wc_ref[:, :H], preferred_element_type=f32) + bc1, 0.0)
    logits = jnp.dot(h, wc_ref[:, H:], preferred_element_type=f32) + bc2_ref[...]
    out_ref[...] = logits.astype(out_ref.dtype)


def multimodal_transformer_forward(feats, masks, params, num_labels, *, tb=None):
    """Fusion + classifier head as a batch-gridded Pallas kernel."""
    B = feats['text'].shape[0]
    lpad = params['wc2'].shape[1]

    # Batch tile: run the whole batch in one grid step for small/medium B (per-step
    # overhead + DMA-descriptor issue dominate otherwise); cap the tile at 256 rows so
    # double-buffered bf16 features stay far below every generation's VMEM (incl. v7x).
    if tb is None:
        tb = B if B <= 256 else 256
    assert B % tb == 0, "batch must be divisible by the batch tile"
    grid = B // tb

    # Pack the eight [1,H] bias/score vectors and the two classifier weights to cut the
    # number of input buffers (DMA descriptors per grid step) from 21 down to 13.
    vecs = jnp.concatenate([params['bt'], params['bi'], params['ba'],
                            params['st'], params['si'], params['sa'],
                            params['bg'], params['bc1']], axis=0)        # [8, H]
    wc = jnp.concatenate([params['wc1'], params['wc2']], axis=1)         # [H, H+Lpad]

    args = [
        feats['text'], feats['image'], feats['audio'],
        masks['text'], masks['image'], masks['audio'],
        params['wt'], params['wi'], params['wa'],
        params['wg'], wc, vecs, params['bc2'],
    ]

    def feat_spec(x):
        s, d = x.shape[1], x.shape[2]
        return pl.BlockSpec((tb, s, d), lambda i: (i, 0, 0))

    def mask_spec(m):
        s = m.shape[1]
        return pl.BlockSpec((tb, s), lambda i: (i, 0))

    def weight_spec(w):
        # Constant block index -> weights stay resident across grid steps (no re-DMA).
        # TODO(synk): pipeline_mode=pl.Buffered(1) would halve resident-weight VMEM; left
        #             at default buffering since the packed weights are < 1 MiB here.
        return pl.BlockSpec(w.shape, lambda i: (0,) * w.ndim)

    in_specs = ([feat_spec(a) for a in args[:3]]
                + [mask_spec(a) for a in args[3:6]]
                + [weight_spec(a) for a in args[6:]])

    # Single-step launches stay on one core ("arbitrary"); only shard the batch grid
    # across TensorCores once per-core work amortizes the duplicated weight DMA.
    semantics = ("parallel",) if grid >= 4 else ("arbitrary",)

    padded_logits = pl.pallas_call(
        _fusion_classifier_kernel,
        out_shape=jax.ShapeDtypeStruct((B, lpad), jnp.float32),
        grid_spec=pltpu.PrefetchScalarGridSpec(
            num_scalar_prefetch=0,
            grid=(grid,),
            in_specs=in_specs,
            out_specs=pl.BlockSpec((tb, lpad), lambda i: (i, 0)),
        ),
        # vmem_limit_bytes intentionally left at the default: the per-step working set
        # (double-buffered bf16 feature tiles + resident weights) is only a few MiB.
        compiler_params=pltpu.CompilerParams(dimension_semantics=semantics),
    )(*args)
    return padded_logits[:, :num_labels]


def _reference_forward(feats, masks, params):
    """Pure-JAX reference in module order (project-then-pool, full fused sequence)."""
    f32 = jnp.float32

    def proj(x, w, b):
        return jnp.einsum('bsd,dh->bsh', x.astype(f32), w) + b[None]

    pt = proj(feats['text'], params['wt'], params['bt'])
    pi = proj(feats['image'], params['wi'], params['bi'])
    pa = proj(feats['audio'], params['wa'], params['ba'])

    def mmean(p, m):
        m = m.astype(f32)
        return jnp.sum(p * m[..., None], axis=1) / jnp.maximum(
            jnp.sum(m, axis=1, keepdims=True), 1.0)

    qt = mmean(pt, masks['text'])
    qi = mmean(pi, masks['image'])
    qa = mmean(pa, masks['audio'])

    sc = jnp.stack([jnp.sum(qt * params['st'], axis=-1),
                    jnp.sum(qi * params['si'], axis=-1),
                    jnp.sum(qa * params['sa'], axis=-1)], axis=-1)
    w = jax.nn.softmax(sc, axis=-1)
    gate = jax.nn.sigmoid(
        jnp.concatenate([qt, qi, qa], axis=-1) @ params['wg'] + params['bg'])
    fused = (w[:, 0][:, None, None] * pt
             + w[:, 1][:, None, None] * qi[:, None, :]
             + w[:, 2][:, None, None] * qa[:, None, :]) * gate[:, None, :]
    pooled = fused[:, 0, :]
    h = jnp.maximum(pooled @ params['wc1'] + params['bc1'], 0.0)
    return h @ params['wc2'] + params['bc2']


def init_params(key, d_text, d_img, d_aud, hidden, num_labels, label_pad):
    ks = jax.random.split(key, 14)
    n = lambda k, s: jax.random.normal(k, s, jnp.float32) * 0.02
    wc2 = jnp.zeros((hidden, label_pad), jnp.float32)
    wc2 = wc2.at[:, :num_labels].set(n(ks[8], (hidden, num_labels)))
    return dict(
        wt=n(ks[0], (d_text, hidden)), bt=n(ks[9], (1, hidden)),
        wi=n(ks[1], (d_img, hidden)),  bi=n(ks[10], (1, hidden)),
        wa=n(ks[2], (d_aud, hidden)),  ba=n(ks[11], (1, hidden)),
        st=n(ks[3], (1, hidden)), si=n(ks[4], (1, hidden)), sa=n(ks[5], (1, hidden)),
        wg=n(ks[6], (3 * hidden, hidden)), bg=n(ks[12], (1, hidden)),
        wc1=n(ks[7], (hidden, hidden)), bc1=n(ks[13], (1, hidden)),
        wc2=wc2, bc2=jnp.zeros((1, label_pad), jnp.float32),
    )


if __name__ == "__main__":
    B = 16                              # small demo batch -> tb=B, grid=(1,), single core
    S_T, S_I, S_A = 16, 12, 24
    D_T, D_I, D_A = 256, 192, 128
    HIDDEN, NUM_LABELS, LABEL_PAD = 256, 2, 128   # hidden matches module default (256)

    key = jax.random.PRNGKey(0)
    k_t, k_i, k_a, k_p = jax.random.split(key, 4)

    # bf16 features halve the dominant (feature) DMA; all math accumulates in f32.
    # TODO(synk): on v5e with tiny batch tiles, f32 features would skip the VPU upconverts.
    feats = {
        'text':  jax.random.normal(k_t, (B, S_T, D_T), jnp.float32).astype(jnp.bfloat16),
        'image': jax.random.normal(k_i, (B, S_I, D_I), jnp.float32).astype(jnp.bfloat16),
        'audio': jax.random.normal(k_a, (B, S_A, D_A), jnp.float32).astype(jnp.bfloat16),
    }

    tmask = np.ones((B, S_T), np.float32)
    amask = np.ones((B, S_A), np.float32)
    for b in range(B):                              # ragged masks, >=1 valid token per row
        tmask[b, 6 + (b % 10):] = 0.0
        amask[b, 8 + ((b * 3) % 16):] = 0.0
    masks = {
        'text':  jnp.asarray(tmask),
        'image': jnp.ones((B, S_I), jnp.float32),
        'audio': jnp.asarray(amask),
    }

    params = init_params(k_p, D_T, D_I, D_A, HIDDEN, NUM_LABELS, LABEL_PAD)

    logits = multimodal_transformer_forward(feats, masks, params, NUM_LABELS)
    logits = jax.block_until_ready(logits)

    ref = _reference_forward(feats, masks, params)[:, :NUM_LABELS]
    np.testing.assert_allclose(np.asarray(logits), np.asarray(ref), rtol=2e-3, atol=2e-3)
    assert logits.shape == (B, NUM_LABELS)

    print("KERNEL_OK")
</pallas_src>

<mosaic_0001>
module attributes {stable_mosaic.version = 11 : i64} {
  func.func @_fusion_classifier_kernel(%arg0: i32, %arg1: memref<16x16x256xbf16, #tpu.memory_space<vmem>>, %arg2: memref<16x12x192xbf16, #tpu.memory_space<vmem>>, %arg3: memref<16x24x128xbf16, #tpu.memory_space<vmem>>, %arg4: memref<16x16xf32, #tpu.memory_space<vmem>>, %arg5: memref<16x12xf32, #tpu.memory_space<vmem>>, %arg6: memref<16x24xf32, #tpu.memory_space<vmem>>, %arg7: memref<256x256xf32, #tpu.memory_space<vmem>>, %arg8: memref<192x256xf32, #tpu.memory_space<vmem>>, %arg9: memref<128x256xf32, #tpu.memory_space<vmem>>, %arg10: memref<768x256xf32, #tpu.memory_space<vmem>>, %arg11: memref<256x384xf32, #tpu.memory_space<vmem>>, %arg12: memref<8x256xf32, #tpu.memory_space<vmem>>, %arg13: memref<1x128xf32, #tpu.memory_space<vmem>>, %arg14: memref<16x128xf32, #tpu.memory_space<vmem>>) attributes {dimension_semantics = [#tpu.dimension_semantics<arbitrary>], iteration_bounds = array<i64: 1>, scalar_prefetch = 0 : i64, scratch_operands = 0 : i64, tpu.core_type = #tpu.core_type<tc>, window_params = [{transform_indices = @transform_0, window_bounds = array<i64: 16, 16, 256>}, {transform_indices = @transform_1, window_bounds = array<i64: 16, 12, 192>}, {transform_indices = @transform_2, window_bounds = array<i64: 16, 24, 128>}, {transform_indices = @transform_3, window_bounds = array<i64: 16, 16>}, {transform_indices = @transform_4, window_bounds = array<i64: 16, 12>}, {transform_indices = @transform_5, window_bounds = array<i64: 16, 24>}, {pipeline_mode = #tpu.pipeline_mode<synchronous>, transform_indices = @transform_6, window_bounds = array<i64: 256, 256>}, {pipeline_mode = #tpu.pipeline_mode<synchronous>, transform_indices = @transform_7, window_bounds = array<i64: 192, 256>}, {pipeline_mode = #tpu.pipeline_mode<synchronous>, transform_indices = @transform_8, window_bounds = array<i64: 128, 256>}, {pipeline_mode = #tpu.pipeline_mode<synchronous>, transform_indices = @transform_9, window_bounds = array<i64: 768, 256>}, {pipeline_mode = #tpu.pipeline_mode<synchronous>, transform_indices = @transform_10, window_bounds = array<i64: 256, 384>}, {pipeline_mode = #tpu.pipeline_mode<synchronous>, transform_indices = @transform_11, window_bounds = array<i64: 8, 256>}, {pipeline_mode = #tpu.pipeline_mode<synchronous>, transform_indices = @transform_12, window_bounds = array<i64: 1, 128>}, {transform_indices = @transform_13, window_bounds = array<i64: 16, 128>}]} {
    %c0 = arith.constant 0 : index
    %c0_0 = arith.constant 0 : index
    %0 = vector.load %arg12[%c0, %c0_0] : memref<8x256xf32, #tpu.memory_space<vmem>>, vector<1x256xf32>
    %c1 = arith.constant 1 : index
    %c0_1 = arith.constant 0 : index
    %1 = vector.load %arg12[%c1, %c0_1] : memref<8x256xf32, #tpu.memory_space<vmem>>, vector<1x256xf32>
    %c2 = arith.constant 2 : index
    %c0_2 = arith.constant 0 : index
    %2 = vector.load %arg12[%c2, %c0_2] : memref<8x256xf32, #tpu.memory_space<vmem>>, vector<1x256xf32>
    %c3 = arith.constant 3 : index
    %c0_3 = arith.constant 0 : index
    %3 = vector.load %arg12[%c3, %c0_3] : memref<8x256xf32, #tpu.memory_space<vmem>>, vector<1x256xf32>
    %c4 = arith.constant 4 : index
    %c0_4 = arith.constant 0 : index
    %4 = vector.load %arg12[%c4, %c0_4] : memref<8x256xf32, #tpu.memory_space<vmem>>, vector<1x256xf32>
    %c5 = arith.constant 5 : index
    %c0_5 = arith.constant 0 : index
    %5 = vector.load %arg12[%c5, %c0_5] : memref<8x256xf32, #tpu.memory_space<vmem>>, vector<1x256xf32>
    %c6 = arith.constant 6 : index
    %c0_6 = arith.constant 0 : index
    %6 = vector.load %arg12[%c6, %c0_6] : memref<8x256xf32, #tpu.memory_space<vmem>>, vector<1x256xf32>
    %c7 = arith.constant 7 : index
    %c0_7 = arith.constant 0 : index
    %7 = vector.load %arg12[%c7, %c0_7] : memref<8x256xf32, #tpu.memory_space<vmem>>, vector<1x256xf32>
    %c0_8 = arith.constant 0 : index
    %c0_9 = arith.constant 0 : index
    %8 = vector.load %arg4[%c0_8, %c0_9] : memref<16x16xf32, #tpu.memory_space<vmem>>, vector<16x16xf32>
    %c0_10 = arith.constant 0 : index
    %c0_11 = arith.constant 0 : index
    %c0_12 = arith.constant 0 : index
    %9 = vector.load %arg1[%c0_10, %c0_11, %c0_12] : memref<16x16x256xbf16, #tpu.memory_space<vmem>>, vector<16x16x256xbf16>
    %10 = vector.shape_cast %8 : vector<16x16xf32> to vector<16x16x1xf32>
    %11 = arith.truncf %10 : vector<16x16x1xf32> to vector<16x16x1xbf16>
    %12 = vector.broadcast %11 : vector<16x16x1xbf16> to vector<16x16x256xbf16>
    %13 = arith.mulf %9, %12 : vector<16x16x256xbf16>
    %14 = arith.extf %13 : vector<16x16x256xbf16> to vector<16x16x256xf32>
    %cst = arith.constant dense<0.000000e+00> : vector<16x256xf32>
    %15 = vector.multi_reduction <add>, %14, %cst [1] : vector<16x16x256xf32> to vector<16x256xf32>
    %cst_13 = arith.constant dense<0.000000e+00> : vector<16xf32>
    %16 = vector.multi_reduction <add>, %8, %cst_13 [1] : vector<16x16xf32> to vector<16xf32>
    %17 = vector.shape_cast %16 : vector<16xf32> to vector<16x1xf32>
    %cst_14 = arith.constant 1.000000e+00 : f32
    %18 = vector.broadcast %cst_14 : f32 to vector<16x1xf32>
    %19 = arith.maximumf %17, %18 : vector<16x1xf32>
    %20 = vector.broadcast %19 : vector<16x1xf32> to vector<16x256xf32>
    %21 = arith.divf %15, %20 : vector<16x256xf32>
    %c0_15 = arith.constant 0 : index
    %c0_16 = arith.constant 0 : index
    %22 = vector.load %arg5[%c0_15, %c0_16] : memref<16x12xf32, #tpu.memory_space<vmem>>, vector<16x12xf32>
    %c0_17 = arith.constant 0 : index
    %c0_18 = arith.constant 0 : index
    %c0_19 = arith.constant 0 : index
    %23 = vector.load %arg2[%c0_17, %c0_18, %c0_19] : memref<16x12x192xbf16, #tpu.memory_space<vmem>>, vector<16x12x192xbf16>
    %24 = vector.shape_cast %22 : vector<16x12xf32> to vector<16x12x1xf32>
    %25 = arith.truncf %24 : vector<16x12x1xf32> to vector<16x12x1xbf16>
    %26 = vector.broadcast %25 : vector<16x12x1xbf16> to vector<16x12x192xbf16>
    %27 = arith.mulf %23, %26 : vector<16x12x192xbf16>
    %28 = arith.extf %27 : vector<16x12x192xbf16> to vector<16x12x192xf32>
    %cst_20 = arith.constant dense<0.000000e+00> : vector<16x192xf32>
    %29 = vector.multi_reduction <add>, %28, %cst_20 [1] : vector<16x12x192xf32> to vector<16x192xf32>
    %cst_21 = arith.constant dense<0.000000e+00> : vector<16xf32>
    %30 = vector.multi_reduction <add>, %22, %cst_21 [1] : vector<16x12xf32> to vector<16xf32>
    %31 = vector.shape_cast %30 : vector<16xf32> to vector<16x1xf32>
    %cst_22 = arith.constant 1.000000e+00 : f32
    %32 = vector.broadcast %cst_22 : f32 to vector<16x1xf32>
    %33 = arith.maximumf %31, %32 : vector<16x1xf32>
    %34 = vector.broadcast %33 : vector<16x1xf32> to vector<16x192xf32>
    %35 = arith.divf %29, %34 : vector<16x192xf32>
    %c0_23 = arith.constant 0 : index
    %c0_24 = arith.constant 0 : index
    %36 = vector.load %arg6[%c0_23, %c0_24] : memref<16x24xf32, #tpu.memory_space<vmem>>, vector<16x24xf32>
    %c0_25 = arith.constant 0 : index
    %c0_26 = arith.constant 0 : index
    %c0_27 = arith.constant 0 : index
    %37 = vector.load %arg3[%c0_25, %c0_26, %c0_27] : memref<16x24x128xbf16, #tpu.memory_space<vmem>>, vector<16x24x128xbf16>
    %38 = vector.shape_cast %36 : vector<16x24xf32> to vector<16x24x1xf32>
    %39 = arith.truncf %38 : vector<16x24x1xf32> to vector<16x24x1xbf16>
    %40 = vector.broadcast %39 : vector<16x24x1xbf16> to vector<16x24x128xbf16>
    %41 = arith.mulf %37, %40 : vector<16x24x128xbf16>
    %42 = arith.extf %41 : vector<16x24x128xbf16> to vector<16x24x128xf32>
    %cst_28 = arith.constant dense<0.000000e+00> : vector<16x128xf32>
    %43 = vector.multi_reduction <add>, %42, %cst_28 [1] : vector<16x24x128xf32> to vector<16x128xf32>
    %cst_29 = arith.constant dense<0.000000e+00> : vector<16xf32>
    %44 = vector.multi_reduction <add>, %36, %cst_29 [1] : vector<16x24xf32> to vector<16xf32>
    %45 = vector.shape_cast %44 : vector<16xf32> to vector<16x1xf32>
    %cst_30 = arith.constant 1.000000e+00 : f32
    %46 = vector.broadcast %cst_30 : f32 to vector<16x1xf32>
    %47 = arith.maximumf %45, %46 : vector<16x1xf32>
    %48 = vector.broadcast %47 : vector<16x1xf32> to vector<16x128xf32>
    %49 = arith.divf %43, %48 : vector<16x128xf32>
    %c0_31 = arith.constant 0 : index
    %c0_32 = arith.constant 0 : index
    %c0_33 = arith.constant 0 : index
    %50 = vector.load %arg1[%c0_31, %c0_32, %c0_33] : memref<16x16x256xbf16, #tpu.memory_space<vmem>>, vector<16x1x256xbf16>
    %51 = vector.shape_cast %50 : vector<16x1x256xbf16> to vector<16x256xbf16>
    %52 = arith.extf %51 : vector<16x256xbf16> to vector<16x256xf32>
    %53 = tpu.concatenate %21, %52 in 0 : vector<16x256xf32>, vector<16x256xf32> -> vector<32x256xf32>
    %c0_34 = arith.constant 0 : index
    %c0_35 = arith.constant 0 : index
    %54 = vector.load %arg7[%c0_34, %c0_35] : memref<256x256xf32, #tpu.memory_space<vmem>>, vector<256x256xf32>
    %cst_36 = arith.constant dense<0.000000e+00> : vector<32x256xf32>
    %55 = tpu.matmul %53, %54, %cst_36 {dimension_numbers = #tpu.dot_dimension_numbers<[1], [0], [0], [1], [0, 0, 1, 1], [], []>} : vector<32x256xf32>, vector<256x256xf32>, vector<32x256xf32> -> vector<32x256xf32>
    %56 = vector.broadcast %0 : vector<1x256xf32> to vector<32x256xf32>
    %57 = arith.addf %55, %56 : vector<32x256xf32>
    %58 = vector.extract_strided_slice %57 {offsets = [0, 0], sizes = [16, 256], strides = [1, 1]} : vector<32x256xf32> to vector<16x256xf32>
    %59 = vector.extract_strided_slice %57 {offsets = [16, 0], sizes = [16, 256], strides = [1, 1]} : vector<32x256xf32> to vector<16x256xf32>
    %c0_37 = arith.constant 0 : index
    %c0_38 = arith.constant 0 : index
    %60 = vector.load %arg8[%c0_37, %c0_38] : memref<192x256xf32, #tpu.memory_space<vmem>>, vector<192x256xf32>
    %cst_39 = arith.constant dense<0.000000e+00> : vector<16x256xf32>
    %61 = tpu.matmul %35, %60, %cst_39 {dimension_numbers = #tpu.dot_dimension_numbers<[1], [0], [0], [1], [0, 0, 1, 1], [], []>} : vector<16x192xf32>, vector<192x256xf32>, vector<16x256xf32> -> vector<16x256xf32>
    %62 = vector.broadcast %1 : vector<1x256xf32> to vector<16x256xf32>
    %63 = arith.addf %61, %62 : vector<16x256xf32>
    %c0_40 = arith.constant 0 : index
    %c0_41 = arith.constant 0 : index
    %64 = vector.load %arg9[%c0_40, %c0_41] : memref<128x256xf32, #tpu.memory_space<vmem>>, vector<128x256xf32>
    %cst_42 = arith.constant dense<0.000000e+00> : vector<16x256xf32>
    %65 = tpu.matmul %49, %64, %cst_42 {dimension_numbers = #tpu.dot_dimension_numbers<[1], [0], [0], [1], [0, 0, 1, 1], [], []>} : vector<16x128xf32>, vector<128x256xf32>, vector<16x256xf32> -> vector<16x256xf32>
    %66 = vector.broadcast %2 : vector<1x256xf32> to vector<16x256xf32>
    %67 = arith.addf %65, %66 : vector<16x256xf32>
    %cst_43 = arith.constant 0.000000e+00 : f32
    %68 = vector.broadcast %cst_43 : f32 to vector<16x1xf32>
    %69 = arith.cmpf ogt, %17, %68 : vector<16x1xf32>
    %cst_44 = arith.constant 0.000000e+00 : f32
    %70 = vector.shape_cast %69 : vector<16x1xi1> to vector<16x1xi1>
    %71 = vector.broadcast %70 : vector<16x1xi1> to vector<16x256xi1>
    %72 = vector.broadcast %cst_44 : f32 to vector<16x256xf32>
    %73 = arith.select %71, %58, %72 : vector<16x256xi1>, vector<16x256xf32>
    %cst_45 = arith.constant 0.000000e+00 : f32
    %74 = vector.broadcast %cst_45 : f32 to vector<16x1xf32>
    %75 = arith.cmpf ogt, %31, %74 : vector<16x1xf32>
    %cst_46 = arith.constant 0.000000e+00 : f32
    %76 = vector.shape_cast %75 : vector<16x1xi1> to vector<16x1xi1>
    %77 = vector.broadcast %76 : vector<16x1xi1> to vector<16x256xi1>
    %78 = vector.broadcast %cst_46 : f32 to vector<16x256xf32>
    %79 = arith.select %77, %63, %78 : vector<16x256xi1>, vector<16x256xf32>
    %cst_47 = arith.constant 0.000000e+00 : f32
    %80 = vector.broadcast %cst_47 : f32 to vector<16x1xf32>
    %81 = arith.cmpf ogt, %45, %80 : vector<16x1xf32>
    %cst_48 = arith.constant 0.000000e+00 : f32
    %82 = vector.shape_cast %81 : vector<16x1xi1> to vector<16x1xi1>
    %83 = vector.broadcast %82 : vector<16x1xi1> to vector<16x256xi1>
    %84 = vector.broadcast %cst_48 : f32 to vector<16x256xf32>
    %85 = arith.select %83, %67, %84 : vector<16x256xi1>, vector<16x256xf32>
    %86 = vector.broadcast %3 : vector<1x256xf32> to vector<16x256xf32>
    %87 = arith.mulf %73, %86 : vector<16x256xf32>
    %cst_49 = arith.constant dense<0.000000e+00> : vector<16xf32>
    %88 = vector.multi_reduction <add>, %87, %cst_49 [1] : vector<16x256xf32> to vector<16xf32>
    %89 = vector.shape_cast %88 : vector<16xf32> to vector<16x1xf32>
    %90 = vector.broadcast %4 : vector<1x256xf32> to vector<16x256xf32>
    %91 = arith.mulf %79, %90 : vector<16x256xf32>
    %cst_50 = arith.constant dense<0.000000e+00> : vector<16xf32>
    %92 = vector.multi_reduction <add>, %91, %cst_50 [1] : vector<16x256xf32> to vector<16xf32>
    %93 = vector.shape_cast %92 : vector<16xf32> to vector<16x1xf32>
    %94 = vector.broadcast %5 : vector<1x256xf32> to vector<16x256xf32>
    %95 = arith.mulf %85, %94 : vector<16x256xf32>
    %cst_51 = arith.constant dense<0.000000e+00> : vector<16xf32>
    %96 = vector.multi_reduction <add>, %95, %cst_51 [1] : vector<16x256xf32> to vector<16xf32>
    %97 = vector.shape_cast %96 : vector<16xf32> to vector<16x1xf32>
    %98 = arith.maximumf %89, %93 : vector<16x1xf32>
    %99 = arith.maximumf %98, %97 : vector<16x1xf32>
    %100 = arith.subf %89, %99 : vector<16x1xf32>
    %101 = math.exp %100 : vector<16x1xf32>
    %102 = arith.subf %93, %99 : vector<16x1xf32>
    %103 = math.exp %102 : vector<16x1xf32>
    %104 = arith.subf %97, %99 : vector<16x1xf32>
    %105 = math.exp %104 : vector<16x1xf32>
    %106 = arith.addf %101, %103 : vector<16x1xf32>
    %107 = arith.addf %106, %105 : vector<16x1xf32>
    %108 = tpu.reciprocal %107 {approx = true} : vector<16x1xf32> -> vector<16x1xf32>
    %109 = arith.mulf %101, %108 : vector<16x1xf32>
    %110 = arith.mulf %103, %108 : vector<16x1xf32>
    %111 = arith.mulf %105, %108 : vector<16x1xf32>
    %112 = tpu.concatenate %73, %79, %85 in 1 : vector<16x256xf32>, vector<16x256xf32>, vector<16x256xf32> -> vector<16x768xf32>
    %c0_52 = arith.constant 0 : index
    %c0_53 = arith.constant 0 : index
    %113 = vector.load %arg10[%c0_52, %c0_53] : memref<768x256xf32, #tpu.memory_space<vmem>>, vector<768x256xf32>
    %cst_54 = arith.constant dense<0.000000e+00> : vector<16x256xf32>
    %114 = tpu.matmul %112, %113, %cst_54 {dimension_numbers = #tpu.dot_dimension_numbers<[1], [0], [0], [1], [0, 0, 1, 1], [], []>} : vector<16x768xf32>, vector<768x256xf32>, vector<16x256xf32> -> vector<16x256xf32>
    %115 = vector.broadcast %6 : vector<1x256xf32> to vector<16x256xf32>
    %116 = arith.addf %114, %115 : vector<16x256xf32>
    %117 = arith.negf %116 : vector<16x256xf32>
    %118 = math.exp %117 : vector<16x256xf32>
    %cst_55 = arith.constant 1.000000e+00 : f32
    %119 = vector.broadcast %cst_55 : f32 to vector<16x256xf32>
    %120 = arith.addf %119, %118 : vector<16x256xf32>
    %121 = arith.divf %119, %120 : vector<16x256xf32>
    %122 = vector.broadcast %109 : vector<16x1xf32> to vector<16x256xf32>
    %123 = arith.mulf %122, %59 : vector<16x256xf32>
    %124 = vector.broadcast %110 : vector<16x1xf32> to vector<16x256xf32>
    %125 = arith.mulf %124, %79 : vector<16x256xf32>
    %126 = arith.addf %123, %125 : vector<16x256xf32>
    %127 = vector.broadcast %111 : vector<16x1xf32> to vector<16x256xf32>
    %128 = arith.mulf %127, %85 : vector<16x256xf32>
    %129 = arith.addf %126, %128 : vector<16x256xf32>
    %130 = arith.mulf %129, %121 : vector<16x256xf32>
    %c0_56 = arith.constant 0 : index
    %c0_57 = arith.constant 0 : index
    %131 = vector.load %arg11[%c0_56, %c0_57] : memref<256x384xf32, #tpu.memory_space<vmem>>, vector<256x256xf32>
    %cst_58 = arith.constant dense<0.000000e+00> : vector<16x256xf32>
    %132 = tpu.matmul %130, %131, %cst_58 {dimension_numbers = #tpu.dot_dimension_numbers<[1], [0], [0], [1], [0, 0, 1, 1], [], []>} : vector<16x256xf32>, vector<256x256xf32>, vector<16x256xf32> -> vector<16x256xf32>
    %133 = vector.broadcast %7 : vector<1x256xf32> to vector<16x256xf32>
    %134 = arith.addf %132, %133 : vector<16x256xf32>
    %cst_59 = arith.constant 0.000000e+00 : f32
    %135 = vector.broadcast %cst_59 : f32 to vector<16x256xf32>
    %136 = arith.maximumf %134, %135 : vector<16x256xf32>
    %c0_60 = arith.constant 0 : index
    %c256 = arith.constant 256 : index
    %137 = vector.load %arg11[%c0_60, %c256] : memref<256x384xf32, #tpu.memory_space<vmem>>, vector<256x128xf32>
    %cst_61 = arith.constant dense<0.000000e+00> : vector<16x128xf32>
    %138 = tpu.matmul %136, %137, %cst_61 {dimension_numbers = #tpu.dot_dimension_numbers<[1], [0], [0], [1], [0, 0, 1, 1], [], []>} : vector<16x256xf32>, vector<256x128xf32>, vector<16x128xf32> -> vector<16x128xf32>
    %c0_62 = arith.constant 0 : index
    %c0_63 = arith.constant 0 : index
    %139 = vector.load %arg13[%c0_62, %c0_63] : memref<1x128xf32, #tpu.memory_space<vmem>>, vector<1x128xf32>
    %140 = vector.broadcast %139 : vector<1x128xf32> to vector<16x128xf32>
    %141 = arith.addf %138, %140 : vector<16x128xf32>
    %c0_64 = arith.constant 0 : index
    %c0_65 = arith.constant 0 : index
    %142 = vector.load %arg14[%c0_64, %c0_65] : memref<16x128xf32, #tpu.memory_space<vmem>>, vector<16x128xf32>
    tpu.vector_store %arg14[%c0_64, %c0_65], %141 {strides = array<i32>} : memref<16x128xf32, #tpu.memory_space<vmem>>, vector<16x128xf32>,
    return
  }
  func.func @transform_0(%arg0: i32) -> (i32, i32, i32) {
    %c0_i32 = arith.constant 0 : i32
    %c0_i32_0 = arith.constant 0 : i32
    %c0_i32_1 = arith.constant 0 : i32
    return %arg0, %c0_i32, %c0_i32_0 : i32, i32, i32
  }
  func.func @transform_1(%arg0: i32) -> (i32, i32, i32) {
    %c0_i32 = arith.constant 0 : i32
    %c0_i32_0 = arith.constant 0 : i32
    %c0_i32_1 = arith.constant 0 : i32
    return %arg0, %c0_i32, %c0_i32_0 : i32, i32, i32
  }
  func.func @transform_2(%arg0: i32) -> (i32, i32, i32) {
    %c0_i32 = arith.constant 0 : i32
    %c0_i32_0 = arith.constant 0 : i32
    %c0_i32_1 = arith.constant 0 : i32
    return %arg0, %c0_i32, %c0_i32_0 : i32, i32, i32
  }
  func.func @transform_3(%arg0: i32) -> (i32, i32) {
    %c0_i32 = arith.constant 0 : i32
    %c0_i32_0 = arith.constant 0 : i32
    return %arg0, %c0_i32 : i32, i32
  }
  func.func @transform_4(%arg0: i32) -> (i32, i32) {
    %c0_i32 = arith.constant 0 : i32
    %c0_i32_0 = arith.constant 0 : i32
    return %arg0, %c0_i32 : i32, i32
  }
  func.func @transform_5(%arg0: i32) -> (i32, i32) {
    %c0_i32 = arith.constant 0 : i32
    %c0_i32_0 = arith.constant 0 : i32
    return %arg0, %c0_i32 : i32, i32
  }
  func.func @transform_6(%arg0: i32) -> (i32, i32) {
    %c0_i32 = arith.constant 0 : i32
    %c0_i32_0 = arith.constant 0 : i32
    %c0_i32_1 = arith.constant 0 : i32
    return %c0_i32, %c0_i32_0 : i32, i32
  }
  func.func @transform_7(%arg0: i32) -> (i32, i32) {
    %c0_i32 = arith.constant 0 : i32
    %c0_i32_0 = arith.constant 0 : i32
    %c0_i32_1 = arith.constant 0 : i32
    return %c0_i32, %c0_i32_0 : i32, i32
  }
  func.func @transform_8(%arg0: i32) -> (i32, i32) {
    %c0_i32 = arith.constant 0 : i32
    %c0_i32_0 = arith.constant 0 : i32
    %c0_i32_1 = arith.constant 0 : i32
    return %c0_i32, %c0_i32_0 : i32, i32
  }
  func.func @transform_9(%arg0: i32) -> (i32, i32) {
    %c0_i32 = arith.constant 0 : i32
    %c0_i32_0 = arith.constant 0 : i32
    %c0_i32_1 = arith.constant 0 : i32
    return %c0_i32, %c0_i32_0 : i32, i32
  }
  func.func @transform_10(%arg0: i32) -> (i32, i32) {
    %c0_i32 = arith.constant 0 : i32
    %c0_i32_0 = arith.constant 0 : i32
    %c0_i32_1 = arith.constant 0 : i32
    return %c0_i32, %c0_i32_0 : i32, i32
  }
  func.func @transform_11(%arg0: i32) -> (i32, i32) {
    %c0_i32 = arith.constant 0 : i32
    %c0_i32_0 = arith.constant 0 : i32
    %c0_i32_1 = arith.constant 0 : i32
    return %c0_i32, %c0_i32_0 : i32, i32
  }
  func.func @transform_12(%arg0: i32) -> (i32, i32) {
    %c0_i32 = arith.constant 0 : i32
    %c0_i32_0 = arith.constant 0 : i32
    %c0_i32_1 = arith.constant 0 : i32
    return %c0_i32, %c0_i32_0 : i32, i32
  }
  func.func @transform_13(%arg0: i32) -> (i32, i32) {
    %c0_i32 = arith.constant 0 : i32
    %c0_i32_0 = arith.constant 0 : i32
    return %arg0, %c0_i32 : i32, i32
  }
}

</mosaic_0001>

<bundles_post_ra>
// kernel: tpu_custom_call.1
= control target key start
LH: loop header
LB: loop body
LE: loop exit
PB: predicated region body
PF: predicated region fallthrough
CT: control target
= control target key end

     0   :  { %18 = vsyncpa [#allocation3], 0  ;;  %s7411_s0 = inlined_call_operand.hbm [shape: bf16[16,16,256], index: 0, kind: input, shape index: {}]   ;;  %s7412_s1 = inlined_call_operand.vmem [shape: bf16[16,12,192], index: 1, kind: input, shape index: {}]   ;;  %s7413_s2 = inlined_call_operand.hbm [shape: bf16[16,24,128], index: 2, kind: input, shape index: {}]   ;;  %s7414_s3 = inlined_call_operand.vmem [shape: f32[16,16], index: 3, kind: input, shape index: {}]   ;;  %s7415_s4 = inlined_call_operand.vmem [shape: f32[16,12], index: 4, kind: input, shape index: {}]   ;;  %s7416_s5 = inlined_call_operand.vmem [shape: f32[16,24], index: 5, kind: input, shape index: {}]   ;;  %s7417_s6 = inlined_call_operand.hbm [shape: f32[256,256], index: 6, kind: input, shape index: {}]   ;;  %s7418_s7 = inlined_call_operand.vmem [shape: f32[192,256], index: 7, kind: input, shape index: {}]   ;;  %s7419_s8 = inlined_call_operand.hbm [shape: f32[128,256], index: 8, kind: input, shape index: {}]   ;;  %s7420_s9 = inlined_call_operand.hbm [shape: f32[768,256], index: 9, kind: input, shape index: {}]   ;;  %s7421_s10 = inlined_call_operand.hbm [shape: f32[256,384], index: 10, kind: input, shape index: {}]   ;;  %s7422_s11 = inlined_call_operand.vmem [shape: f32[8,256], index: 11, kind: input, shape index: {}]   ;;  %s7423_s12 = inlined_call_operand.vmem [shape: f32[1,128], index: 12, kind: input, shape index: {}]   ;;  %s7424_s13 = inlined_call_operand.hbm [shape: f32[16,128], index: 13, kind: output, shape index: {}]  }
   0x1   :  { %19 = vsyncpa [#allocation6], 0 }
   0x2   :  { %20 = vsyncpa [#allocation9], 0 }
   0x3   :  { %21 = vsyncpa [#allocation12], 0 }
   0x4   :  { %22 = vsyncpa [#allocation4], 0  ;;  %s5563_s25 = smov [#allocation5]   ;;  %s5399_s29 = scalar_lea.hbm %s7413_s2, 3072 }
   0x5   :  { %s42_s26 = sshll.u32 %s5563_s25, 4  ;;  %p5400_p0 = scmp.ne.s32.totalorder %s7413_s2, %s5399_s29  ;;  %s43_s26 = int_to_ptr.vmem [resolvable:$true] %s42_s26 }
   0x6   :  { %p5403_p1 = scmp.lt.u32.totalorder %s5399_s29, %s7413_s2 }
   0x8   :  { %p5405_p2 = pnand %p5403_p1, %p5400_p0 }
   0xa   :  { %5408 = shalt.err (!%p5405_p2)
}
   0xb   :  { %s5409_s17 = scalar_lea.vmem %s43_s26, 3072  ;;  %p5414_p4 = scmp.lt.s32.totalorder %s43_s26, %s43_s26 }
   0xc   :  { %p5410_p3 = scmp.ne.s32.totalorder %s43_s26, %s5409_s17  ;;  %p5415_p5 = scmp.lt.s32.totalorder %s5409_s17, %s5409_s17 }
   0xe   :  { %p5416_p6 = por %p5415_p5, %p5414_p4 }
  0x10   :  { %p5417_p7 = pnand %p5416_p6, %p5410_p3 }
  0x12   :  { %5420 = shalt.err (!%p5417_p7)
}
  0x13   :  { %s5564_s18 = smov 64   ;;  %s5565_s19 = smov 4  }
  0x14   :  { %48 = dma.hbm_to_vmem [thread:$0]  %s7413_s2, 3072, %s43_s26, [#allocation6], %s5564_s18, %s5564_s18, %s5565_s19  }
  0x15   :  { %s5566_s22 = smov [#allocation8]   ;;  %s5567_s24 = smov [#allocation2]  }
  0x16   :  { %s74_s23 = sshll.u32 %s5566_s22, 4  ;;  %s28_s25 = sshll.u32 %s5567_s24, 4  ;;  %s75_s23 = int_to_ptr.vmem [resolvable:$true] %s74_s23  ;;  %s29_s25 = int_to_ptr.vmem [resolvable:$true] %s28_s25 }
  0x17   :  { %s5421_s29 = scalar_lea.hbm %s7419_s8, 4096 }
  0x18   :  { %p5422_p8 = scmp.ne.s32.totalorder %s7419_s8, %s5421_s29  ;;  %p5425_p9 = scmp.lt.u32.totalorder %s5421_s29, %s7419_s8 }
  0x1a   :  { %p5427_p10 = pnand %p5425_p9, %p5422_p8 }
  0x1c   :  { %5430 = shalt.err (!%p5427_p10)
}
  0x1d   :  { %s5431_s2 = scalar_lea.vmem %s75_s23, 4096  ;;  %p5436_p12 = scmp.lt.s32.totalorder %s75_s23, %s75_s23 }
  0x1e   :  { %p5432_p11 = scmp.ne.s32.totalorder %s75_s23, %s5431_s2  ;;  %p5437_p13 = scmp.lt.s32.totalorder %s5431_s2, %s5431_s2 }
  0x20   :  { %p5438_p0 = por %p5437_p13, %p5436_p12 }
  0x22   :  { %p5439_p1 = pnand %p5438_p0, %p5432_p11 }
  0x24   :  { %5442 = shalt.err (!%p5439_p1)
}
  0x25   :  { %s5568_s26 = smov 256   ;;  %s5569_s17 = smov 16  }
  0x26   :  { %80 = dma.hbm_to_vmem [thread:$0]  %s7419_s8, 4096, %s75_s23, [#allocation9], %s5568_s26, %s5568_s26, %s5569_s17  }
  0x27   :  { %s5443_s22 = scalar_lea.hbm %s7411_s0, 4096 }
  0x28   :  { %p5444_p2 = scmp.ne.s32.totalorder %s7411_s0, %s5443_s22  ;;  %p5447_p3 = scmp.lt.u32.totalorder %s5443_s22, %s7411_s0 }
  0x2a   :  { %p5449_p4 = pnand %p5447_p3, %p5444_p2 }
  0x2c   :  { %5452 = shalt.err (!%p5449_p4)
}
  0x2d   :  { %s5453_s30 = scalar_lea.vmem %s29_s25, 4096  ;;  %p5458_p6 = scmp.lt.s32.totalorder %s29_s25, %s29_s25 }
  0x2e   :  { %p5454_p5 = scmp.ne.s32.totalorder %s29_s25, %s5453_s30  ;;  %p5459_p7 = scmp.lt.s32.totalorder %s5453_s30, %s5453_s30 }
  0x30   :  { %p5460_p8 = por %p5459_p7, %p5458_p6 }
  0x32   :  { %p5461_p9 = pnand %p5460_p8, %p5454_p5 }
  0x34   :  { %5464 = shalt.err (!%p5461_p9)
}
  0x35   :  { %s5570_s8 = smov 128   ;;  %s5571_s23 = smov 8  }
  0x36   :  { %34 = dma.hbm_to_vmem [thread:$0]  %s7411_s0, 4096, %s29_s25, [#allocation3], %s5570_s8, %s5570_s8, %s5571_s23  }
  0x37   :  { %s5572_s16 = smov [#allocation7]   ;;  %s5573_s18 = smov [#allocation10]  }
  0x38   :  { %s60_s2 = sshll.u32 %s5572_s16, 4  ;;  %s86_s19 = sshll.u32 %s5573_s18, 4  ;;  %s61_s2 = int_to_ptr.vmem [resolvable:$true] %s60_s2  ;;  %s87_s19 = int_to_ptr.vmem [resolvable:$true] %s86_s19 }
  0x39   :  { %s5465_s22 = scalar_lea.hbm %s7417_s6, 8192 }
  0x3a   :  { %p5466_p10 = scmp.ne.s32.totalorder %s7417_s6, %s5465_s22  ;;  %p5469_p11 = scmp.lt.u32.totalorder %s5465_s22, %s7417_s6 }
  0x3c   :  { %p5471_p12 = pnand %p5469_p11, %p5466_p10 }
  0x3e   :  { %5474 = shalt.err (!%p5471_p12)
}
  0x3f   :  { %s5475_s0 = scalar_lea.vmem %s61_s2, 8192  ;;  %p5480_p0 = scmp.lt.s32.totalorder %s61_s2, %s61_s2 }
  0x40   :  { %p5476_p13 = scmp.ne.s32.totalorder %s61_s2, %s5475_s0  ;;  %p5481_p1 = scmp.lt.s32.totalorder %s5475_s0, %s5475_s0 }
  0x42   :  { %p5482_p2 = por %p5481_p1, %p5480_p0 }
  0x44   :  { %p5483_p3 = pnand %p5482_p2, %p5476_p13 }
  0x46   :  { %5486 = shalt.err (!%p5483_p3)
}
  0x47   :  { %66 = dma.hbm_to_vmem [thread:$0]  %s7417_s6, 8192, %s61_s2, [#allocation6], %s5568_s26, %s5568_s26, %s5569_s17  }
  0x48   :  { %s5487_s16 = scalar_lea.hbm %s7420_s9, 24576 }
  0x49   :  { %p5488_p4 = scmp.ne.s32.totalorder %s7420_s9, %s5487_s16  ;;  %p5491_p5 = scmp.lt.u32.totalorder %s5487_s16, %s7420_s9 }
  0x4b   :  { %p5493_p6 = pnand %p5491_p5, %p5488_p4 }
  0x4d   :  { %5496 = shalt.err (!%p5493_p6)
}
  0x4e   :  { %s5497_s24 = scalar_lea.vmem %s87_s19, 24576  ;;  %p5502_p8 = scmp.lt.s32.totalorder %s87_s19, %s87_s19 }
  0x4f   :  { %p5498_p7 = scmp.ne.s32.totalorder %s87_s19, %s5497_s24  ;;  %p5503_p9 = scmp.lt.s32.totalorder %s5497_s24, %s5497_s24 }
  0x51   :  { %p5504_p10 = por %p5503_p9, %p5502_p8 }
  0x53   :  { %p5505_p11 = pnand %p5504_p10, %p5498_p7 }
  0x55   :  { %5508 = shalt.err (!%p5505_p11)
}
  0x56   :  { %92 = dma.hbm_to_vmem [thread:$0]  %s7420_s9, 24576, %s87_s19, [#allocation9], %s5568_s26, %s5568_s26, %s5569_s17  }
  0x57   :  { %s5574_s27 = smov [#allocation11]   ;;  %s5509_s25 = scalar_lea.hbm %s7421_s10, 12288 }
  0x58   :  { %s98_s28 = sshll.u32 %s5574_s27, 4  ;;  %p5510_p12 = scmp.ne.s32.totalorder %s7421_s10, %s5509_s25  ;;  %s99_s28 = int_to_ptr.vmem [resolvable:$true] %s98_s28 }
  0x59   :  { %p5513_p13 = scmp.lt.u32.totalorder %s5509_s25, %s7421_s10 }
  0x5b   :  { %p5515_p0 = pnand %p5513_p13, %p5510_p12 }
  0x5d   :  { %5518 = shalt.err (!%p5515_p0)
}
  0x5e   :  { %s5519_s18 = scalar_lea.vmem %s99_s28, 12288  ;;  %p5524_p2 = scmp.lt.s32.totalorder %s99_s28, %s99_s28 }
  0x5f   :  { %p5520_p1 = scmp.ne.s32.totalorder %s99_s28, %s5519_s18  ;;  %p5525_p3 = scmp.lt.s32.totalorder %s5519_s18, %s5519_s18 }
  0x61   :  { %p5526_p4 = por %p5525_p3, %p5524_p2 }
  0x63   :  { %p5527_p5 = pnand %p5526_p4, %p5520_p1 }
  0x65   :  { %5530 = shalt.err (!%p5527_p5)
}
  0x66   :  { %s5575_s9 = smov 384   ;;  %s5576_s26 = smov 24  }
  0x67   :  { %104 = dma.hbm_to_vmem [thread:$0]  %s7421_s10, 12288, %s99_s28, [#allocation12], %s5575_s9, %s5575_s9, %s5576_s26  }
  0x68   :  { %5553 = dma.done.wait [#allocation3], 4096  }
  0x69   :  { %5554 = vsyncadd [#allocation3], 4294963200 }
  0x6a   :  { %5555 = dma.done.wait [#allocation6], 11264  }
  0x6b   :  { %5556 = vsyncadd [#allocation6], 4294956032 }
  0x6c   :  { %5557 = dma.done.wait [#allocation9], 28672  }
  0x6d   :  { %5558 = vsyncadd [#allocation9], 4294938624 }
  0x6e   :  { %5559 = dma.done.wait [#allocation12], 12288  }
  0x6f   :  { %5560 = vsyncadd [#allocation12], 4294955008  ;;  %v176_v0 = vlaneseq  ;;  %vm960_vm0 = vcmask 130048   ;;  %v5746_v4 = vld [vmem:[%s7414_s3] sm:$0xff]  ;;  %v3282_v7 = vld [vmem:[#allocation7 + $0x8] sm:$0xff]  ;;  %vm1918_vm1 = vcmask 97280  }
  0x70   :  { %v961_v5 = vsel %vm960_vm0, %v5746_v4, 0.0  ;;  %v3284_v9 = vld [vmem:[#allocation7 + $0x18] sm:$0xff]  ;;  %v3281_v10 = vld [vmem:[#allocation7] sm:$0xff]  ;;  %v3283_v11 = vld [vmem:[#allocation7 + $0x10] sm:$0xff]  ;;  %vm2969_vm2 = vcmask 195584   ;;  %vm3123_vm3 = vcmask 1041409  }
  0x71   :  { %v5735_v1 = vshrl.u32 %v176_v0, 7  ;;  %962 = vadd.xlane.f32.xlu0 %v961_v5  ;;  %v3286_v12 = vld [vmem:[#allocation7 + $0x28] sm:$0xff]  ;;  %v3288_v13 = vld [vmem:[#allocation7 + $0x38] sm:$0xff]  ;;  %v4806_v14 = vpack.c.bf16 %v3284_v9, %v3282_v7  ;;  %v4808_v15 = vpack.c.bf16 %v3283_v11, %v3281_v10  ;;  %v3285_v16 = vld [vmem:[#allocation7 + $0x20] sm:$0xff]  ;;  %vm3126_vm4 = vcmask 1042434  }
  0x72   :  { %v3287_v17 = vld [vmem:[#allocation7 + $0x30] sm:$0xff]  ;;  %v4810_v19 = vpack.c.bf16 %v3288_v13, %v3286_v12  ;;  %v3290_v20 = vld [vmem:[#allocation7 + $0x48] sm:$0xff]  ;;  %v3292_v21 = vld [vmem:[#allocation7 + $0x58] sm:$0xff]  ;;  %vm3129_vm5 = vcmask 1043459   ;;  %vm3132_vm6 = vcmask 1044484   ;;  %vm3135_vm7 = vcmask 1045509  }
  0x73   :  { %v5738_v2 = vsub.s32 1, %v5735_v1  ;;  %v5741_v3 = vsub.s32 2, %v5735_v1  ;;  %v5755_v18 = vsub.s32 0, %v5735_v1  ;;  %4807 = vmatprep.subr.bf16.mxu1 %v4806_v14  ;;  %v4812_v22 = vpack.c.bf16 %v3287_v17, %v3285_v16  ;;  %v3289_v24 = vld [vmem:[#allocation7 + $0x40] sm:$0xff]  ;;  %v3291_v25 = vld [vmem:[#allocation7 + $0x50] sm:$0xff]  ;;  %v3294_v27 = vld [vmem:[#allocation7 + $0x68] sm:$0xff] }
  0x74   :  { %4809 = vmatpush1.bf16.msra.mxu1 %v4808_v15  ;;  %v4814_v23 = vpack.c.bf16 %v3292_v21, %v3290_v20  ;;  %v3296_v28 = vld [vmem:[#allocation7 + $0x78] sm:$0xff]  ;;  %v4816_v29 = vpack.c.bf16 %v3291_v25, %v3289_v24  ;;  %v3293_v31 = vld [vmem:[#allocation7 + $0x60] sm:$0xff]  ;;  %v3295_v32 = vld [vmem:[#allocation7 + $0x70] sm:$0xff]  ;;  %v5760_v33 = vsub.s32 3, %v5735_v1  ;;  %v5765_v43 = vsub.s32 4, %v5735_v1 }
  0x75   :  { %v190_v6 = vrot.slane %v5746_v4, %v5738_v2  ;;  %v201_v8 = vrot.slane %v5746_v4, %v5741_v3  ;;  %7448 = vst [vmem:[#allocation19_spill] sm:$0xff] %v5755_v18  ;;  %4811 = vmatprep.subr.bf16.mxu1 %v4810_v19  ;;  %v179_v26 = vrot.slane %v5746_v4, %v5755_v18  ;;  %v3298_v34 = vld [vmem:[#allocation7 + $0x88] sm:$0xff]  ;;  %v3300_v35 = vld [vmem:[#allocation7 + $0x98] sm:$0xff]  ;;  %v3297_v38 = vld [vmem:[#allocation7 + $0x80] sm:$0xff]  ;;  %v5770_v51 = vsub.s32 5, %v5735_v1 }
  0x76   :  { %v4818_v30 = vpack.c.bf16 %v3296_v28, %v3294_v27  ;;  %7449 = vst [vmem:[#allocation20_spill] sm:$0xff] %v5760_v33  ;;  %v4820_v36 = vpack.c.bf16 %v3295_v32, %v3293_v31  ;;  %v4822_v37 = vpack.c.bf16 %v3300_v35, %v3298_v34  ;;  %v3299_v39 = vld [vmem:[#allocation7 + $0x90] sm:$0xff]  ;;  %v212_v40 = vrot.slane %v5746_v4, %v5760_v33  ;;  %v3302_v41 = vld [vmem:[#allocation7 + $0xa8] sm:$0xff]  ;;  %v3304_v42 = vld [vmem:[#allocation7 + $0xb8] sm:$0xff] }
  0x77   :  { %196 = vbcast.lane.b32.xlu1 %v190_v6, 264  ;;  %7450 = vst [vmem:[#allocation21_spill] sm:$0xff] %v5765_v43  ;;  %v4824_v44 = vpack.c.bf16 %v3299_v39, %v3297_v38  ;;  %v4826_v45 = vpack.c.bf16 %v3304_v42, %v3302_v41  ;;  %v3301_v46 = vld [vmem:[#allocation7 + $0xa0] sm:$0xff]  ;;  %v3303_v47 = vld [vmem:[#allocation7 + $0xb0] sm:$0xff]  ;;  %v3306_v48 = vld [vmem:[#allocation7 + $0xc8] sm:$0xff]  ;;  %v223_v50 = vrot.slane %v5746_v4, %v5765_v43  ;;  %v5775_v57 = vsub.s32 6, %v5735_v1 }
  0x78   :  { %4813 = vmatpush1.bf16.msra.mxu1 %v4812_v22  ;;  %v3308_v49 = vld [vmem:[#allocation7 + $0xd8] sm:$0xff]  ;;  %7451 = vst [vmem:[#allocation22_spill] sm:$0xff] %v5770_v51  ;;  %v4828_v52 = vpack.c.bf16 %v3303_v47, %v3301_v46  ;;  %v3305_v54 = vld [vmem:[#allocation7 + $0xc0] sm:$0xff]  ;;  %v3307_v55 = vld [vmem:[#allocation7 + $0xd0] sm:$0xff]  ;;  %v234_v56 = vrot.slane %v5746_v4, %v5770_v51  ;;  %v5780_v5 = vsub.s32 7, %v5735_v1  ;;  %vm3138_vm8 = vcmask 1046534  }
  0x79   :  { %4815 = vmatprep.subr.bf16.mxu1 %v4814_v23  ;;  %v4830_v53 = vpack.c.bf16 %v3308_v49, %v3306_v48  ;;  %v4832_v58 = vpack.c.bf16 %v3307_v55, %v3305_v54  ;;  %v3310_v59 = vld [vmem:[#allocation7 + $0xe8] sm:$0xff]  ;;  %v3312_v60 = vld [vmem:[#allocation7 + $0xf8] sm:$0xff]  ;;  %v3309_v61 = vld [vmem:[#allocation7 + $0xe0] sm:$0xff]  ;;  %v245_v0 = vrot.slane %v5746_v4, %v5775_v57  ;;  %vm3141_vm9 = vcmask 1047559  }
  0x7a   :  { %v3311_v62 = vld [vmem:[#allocation7 + $0xf0] sm:$0xff]  ;;  %v4834_v63 = vpack.c.bf16 %v3312_v60, %v3310_v59  ;;  %7452 = vst [vmem:[#allocation23_spill] sm:$0xff] %v5780_v5  ;;  %v3314_v7 = vld [vmem:[#allocation7 + $0x108] sm:$0xff]  ;;  %v3313_v10 = vld [vmem:[#allocation7 + $0x100] sm:$0xff]  ;;  %v256_v12 = vrot.slane %v5746_v4, %v5780_v5  ;;  %vm1652_vm10 = vcmask 523264   ;;  %vm1643_vm11 = vcmask 1043456  }
  0x7b   :  { %203 = vbcast.lane.b32.xlu1 %v201_v8, 256  ;;  %v3315_v11 = vld [vmem:[#allocation7 + $0x110] sm:$0xff]  ;;  %v5787_v14 = vld [vmem:[%s7414_s3 + $0x8] sm:$0xff]  ;;  %v3320_v17 = vld [vmem:[#allocation7 + $0x138] sm:$0xff]  ;;  %vm1654_vm12 = vcmask 519168  }
  0x7c   :  { %4817 = vmatpush1.bf16.msra.mxu1 %v4816_v29  ;;  %v4840_v13 = vpack.c.bf16 %v3315_v11, %v3313_v10  ;;  %v278_v15 = vrot.slane %v5787_v14, %v5738_v2  ;;  %v3318_v16 = vld [vmem:[#allocation7 + $0x128] sm:$0xff]  ;;  %v3317_v20 = vld [vmem:[#allocation7 + $0x120] sm:$0xff]  ;;  %v3319_v4 = vld [vmem:[#allocation7 + $0x130] sm:$0xff]  ;;  %v289_v28 = vrot.slane %v5787_v14, %v5741_v3  ;;  %v267_v42 = vrot.slane %v5787_v14, %v5755_v18 }
  0x7d   :  { %4819 = vmatprep.subr.bf16.mxu1 %v4818_v30  ;;  %v4842_v19 = vpack.c.bf16 %v3320_v17, %v3318_v16  ;;  %v4844_v21 = vpack.c.bf16 %v3319_v4, %v3317_v20  ;;  %v3322_v22 = vld [vmem:[#allocation7 + $0x148] sm:$0xff]  ;;  %v3324_v23 = vld [vmem:[#allocation7 + $0x158] sm:$0xff]  ;;  %v3321_v25 = vld [vmem:[#allocation7 + $0x140] sm:$0xff]  ;;  %v964_v59 = vsel %vm960_vm0, %v5787_v14, 0.0  ;;  %v344_v10 = vrot.slane %v5787_v14, %v5780_v5 }
  0x7e   :  { %v4846_v24 = vpack.c.bf16 %v3324_v23, %v3322_v22  ;;  %v3326_v29 = vld [vmem:[#allocation7 + $0x168] sm:$0xff]  ;;  %v3328_v30 = vld [vmem:[#allocation7 + $0x178] sm:$0xff]  ;;  %v3325_v32 = vld [vmem:[#allocation7 + $0x160] sm:$0xff]  ;;  %v5578_v17 = vmov 1985246804  }
  0x7f   :  { %207 = vbcast.lane.b32.xlu1 %v201_v8, 264  ;;  %v3316_v8 = vld [vmem:[#allocation7 + $0x118] sm:$0xff]  ;;  %v4850_v31 = vpack.c.bf16 %v3328_v30, %v3326_v29  ;;  %v3327_v34 = vld [vmem:[#allocation7 + $0x170] sm:$0xff]  ;;  %v3329_v39 = vld [vmem:[#allocation7 + $0x180] sm:$0xff] }
  0x80   :  { %4821 = vmatpush1.bf16.msra.mxu1 %v4820_v36  ;;  %v4838_v9 = vpack.c.bf16 %v3316_v8, %v3314_v7  ;;  %v4852_v35 = vpack.c.bf16 %v3327_v34, %v3325_v32  ;;  %v3330_v36 = vld [vmem:[#allocation7 + $0x188] sm:$0xff]  ;;  %v3333_v46 = vld [vmem:[#allocation7 + $0x1a0] sm:$0xff]  ;;  %v3335_v47 = vld [vmem:[#allocation7 + $0x1b0] sm:$0xff]  ;;  %v311_v7 = vrot.slane %v5787_v14, %v5765_v43  ;;  %v322_v8 = vrot.slane %v5787_v14, %v5770_v51 }
  0x81   :  { %4823 = vmatprep.subr.bf16.mxu1 %v4822_v37  ;;  %v3332_v37 = vld [vmem:[#allocation7 + $0x198] sm:$0xff]  ;;  %v4860_v49 = vpack.c.bf16 %v3335_v47, %v3333_v46  ;;  %v3337_v54 = vld [vmem:[#allocation7 + $0x1c0] sm:$0xff]  ;;  %v3339_v55 = vld [vmem:[#allocation7 + $0x1d0] sm:$0xff] }
  0x82   :  { %v4854_v38 = vpack.c.bf16 %v3332_v37, %v3330_v36  ;;  %v3342_v60 = vld [vmem:[#allocation7 + $0x1e8] sm:$0xff]  ;;  %v5810_v11 = vld [vmem:[%s7415_s4] sm:$0xff] }
  0x83   :  { %181 = vbcast.lane.b32.xlu1 %v179_v26, 256  ;;  %v1086_v20 = vrot.slane %v5810_v11, %v5755_v18  ;;  %v1919_v23 = vsel %vm1918_vm1, %v5810_v11, 0.0  ;;  %v149_v29 = vld [vmem:[#allocation2 + $0x28] sm:$0xff]  ;;  %v5830_v30 = vrot.slane %v5810_v11, %v5760_v33  ;;  %v144_v46 = vld [vmem:[#allocation2] sm:$0xff] }
  0x84   :  { %4825 = vmatpush1.bf16.msra.mxu1 %v4824_v44  ;;  %v3334_v44 = vld [vmem:[#allocation7 + $0x1a8] sm:$0xff] }
  0x85   :  { %4827 = vmatprep.subr.bf16.mxu1 %v4826_v45  ;;  %v3336_v45 = vld [vmem:[#allocation7 + $0x1b8] sm:$0xff]  ;;  %v145_v47 = vld [vmem:[#allocation2 + $0x8] sm:$0xff] }
  0x86   :  { %v4858_v48 = vpack.c.bf16 %v3336_v45, %v3334_v44 }
  0x87   :  { %185 = vbcast.lane.b32.xlu1 %v179_v26, 264  ;;  %192 = vbcast.lane.b32.xlu0 %v190_v6, 256  ;;  %v4836_v6 = vpack.c.bf16 %v3311_v62, %v3309_v61  ;;  %v3323_v26 = vld [vmem:[#allocation7 + $0x150] sm:$0xff]  ;;  %v3344_v61 = vld [vmem:[#allocation7 + $0x1f8] sm:$0xff]  ;;  %v3341_v62 = vld [vmem:[#allocation7 + $0x1e0] sm:$0xff] }
  0x88   :  { %4829 = vmatpush1.bf16.msra.mxu1 %v4828_v52  ;;  %v4848_v27 = vpack.c.bf16 %v3323_v26, %v3321_v25  ;;  %v3340_v52 = vld [vmem:[#allocation7 + $0x1d8] sm:$0xff] }
  0x89   :  { %4831 = vmatprep.subr.bf16.mxu1 %v4830_v53 }
  0x8b   :  { %214 = vbcast.lane.b32.xlu1 %v212_v40, 256  ;;  %225 = vbcast.lane.b32.xlu0 %v223_v50, 256 }
  0x8c   :  { %4833 = vmatpush1.bf16.msra.mxu1 %v4832_v58  ;;  %v300_v58 = vrot.slane %v5787_v14, %v5760_v33 }
  0x8d   :  { %4835 = vmatprep.subr.bf16.mxu1 %v4834_v63  ;;  %v3343_v63 = vld [vmem:[#allocation7 + $0x1f0] sm:$0xff] }
  0x8f   :  { %218 = vbcast.lane.b32.xlu1 %v212_v40, 264  ;;  %236 = vbcast.lane.b32.xlu0 %v234_v56, 256  ;;  %v3331_v40 = vld [vmem:[#allocation7 + $0x190] sm:$0xff] }
  0x90   :  { %4837 = vmatpush1.bf16.msra.mxu1 %v4836_v6  ;;  %v4856_v41 = vpack.c.bf16 %v3331_v40, %v3329_v39  ;;  %v4868_v6 = vpack.c.bf16 %v3343_v63, %v3341_v62 }
  0x91   :  { %4839 = vmatprep.subr.bf16.mxu1 %v4838_v9  ;;  %v333_v9 = vrot.slane %v5787_v14, %v5775_v57  ;;  %v392_v14 = vunpack.c.l.s4 %v5578_v17 }
  0x93   :  { %229 = vbcast.lane.b32.xlu1 %v223_v50, 264  ;;  %247 = vbcast.lane.b32.xlu0 %v245_v0, 256  ;;  %v3338_v50 = vld [vmem:[#allocation7 + $0x1c8] sm:$0xff] }
  0x94   :  { %4841 = vmatpush1.bf16.msra.mxu1 %v4840_v13  ;;  %v4862_v53 = vpack.c.bf16 %v3340_v52, %v3338_v50  ;;  %v1108_v13 = vrot.slane %v5810_v11, %v5741_v3 }
  0x95   :  { %4843 = vmatprep.subr.bf16.mxu1 %v4842_v19 }
  0x97   :  { %240 = vbcast.lane.b32.xlu1 %v234_v56, 264  ;;  %258 = vbcast.lane.b32.xlu0 %v256_v12, 256  ;;  %v4864_v56 = vpack.c.bf16 %v3339_v55, %v3337_v54 }
  0x98   :  { %4845 = vmatpush1.bf16.msra.mxu1 %v4844_v21  ;;  %v393_v21 = vunpack.c.0.s8 %v392_v14 }
  0x99   :  { %4847 = vmatprep.subr.bf16.mxu1 %v4846_v24 }
  0x9a   :  { %v5826_v25 = vsub.s32 %v393_v21, %v5735_v1 }
  0x9b   :  { %251 = vbcast.lane.b32.xlu1 %v245_v0, 264  ;;  %v4866_v0 = vpack.c.bf16 %v3344_v61, %v3342_v60 }
  0x9c   :  { %4849 = vmatpush1.bf16.msra.mxu1 %v4848_v27 }
  0x9d   :  { %4851 = vmatprep.subr.bf16.mxu1 %v4850_v31 }
  0x9f   :  { %262 = vbcast.lane.b32.xlu1 %v256_v12, 264  ;;  %v1097_v12 = vrot.slane %v5810_v11, %v5738_v2 }
  0xa0   :  { %4853 = vmatpush1.bf16.msra.mxu1 %v4852_v35 }
  0xa1   :  { %4855 = vmatprep.subr.bf16.mxu1 %v4854_v38 }
  0xa3   :  { %280 = vbcast.lane.b32.xlu1 %v278_v15, 256 }
  0xa4   :  { %4857 = vmatpush1.bf16.msra.mxu1 %v4856_v41 }
  0xa5   :  { %4859 = vmatprep.subr.bf16.mxu1 %v4858_v48 }
  0xa7   :  { %284 = vbcast.lane.b32.xlu1 %v278_v15, 264  ;;  %v5577_v15 = vmov 839922192  }
  0xa8   :  { %4861 = vmatpush1.bf16.msra.mxu1 %v4860_v49  ;;  %v385_v16 = vunpack.c.l.s4 %v5577_v15  ;;  %v5855_v15 = vrot.slane %v5810_v11, %v5780_v5 }
  0xa9   :  { %4863 = vmatprep.subr.bf16.mxu1 %v4862_v53 }
  0xaa   :  { %v386_v4 = vunpack.c.0.s8 %v385_v16 }
  0xab   :  { %291 = vbcast.lane.b32.xlu1 %v289_v28, 256 }
  0xac   :  { %4865 = vmatpush1.bf16.msra.mxu1 %v4864_v56  ;;  %v5823_v24 = vsub.s32 %v386_v4, %v5735_v1  ;;  %v1130_v1 = vrot.slane %v5810_v11, %v5765_v43  ;;  %v151_v4 = vld [vmem:[#allocation2 + $0x38] sm:$0xff] }
  0xad   :  { %4867 = vmatprep.subr.bf16.mxu1 %v4866_v0  ;;  %v5844_v0 = vld [vmem:[%s7415_s4 + $0x8] sm:$0xff] }
  0xaf   :  { %295 = vbcast.lane.b32.xlu1 %v289_v28, 264  ;;  %v148_v28 = vld [vmem:[#allocation2 + $0x20] sm:$0xff] }
  0xb0   :  { %4869 = vmatpush1.bf16.msra.mxu1 %v4868_v6 }
  0xb3   :  { %269 = vbcast.lane.b32.xlu1 %v267_v42, 256 }
  0xb6   :  { %965 = vadd.xlane.f32.xlu0 %v964_v59  ;;  %v1141_v59 = vrot.slane %v5810_v11, %v5770_v51 }
  0xb7   :  { %273 = vbcast.lane.b32.xlu1 %v267_v42, 264 }
  0xbb   :  { %302 = vbcast.lane.b32.xlu1 %v300_v58, 256 }
  0xbf   :  { %306 = vbcast.lane.b32.xlu1 %v300_v58, 264 }
  0xc3   :  { %317 = vbcast.lane.b32.xlu1 %v311_v7, 264 }
  0xc7   :  { %324 = vbcast.lane.b32.xlu1 %v322_v8, 256 }
  0xcb   :  { %328 = vbcast.lane.b32.xlu1 %v322_v8, 264 }
  0xcc   :  { %313 = vbcast.lane.b32.xlu0 %v311_v7, 256 }
  0xcf   :  { %335 = vbcast.lane.b32.xlu1 %v333_v9, 256 }
  0xd3   :  { %339 = vbcast.lane.b32.xlu1 %v333_v9, 264  ;;  %v5849_v9 = vld [vmem:[%s7416_s5] sm:$0xff] }
  0xd7   :  { %346 = vbcast.lane.b32.xlu1 %v344_v10, 256 }
  0xdb   :  { %350 = vbcast.lane.b32.xlu1 %v344_v10, 264 }
  0xdf   :  { %1099 = vbcast.lane.b32.xlu1 %v1097_v12, 256 }
  0xe3   :  { %1103 = vbcast.lane.b32.xlu1 %v1097_v12, 264 }
  0xe7   :  { %1110 = vbcast.lane.b32.xlu1 %v1108_v13, 256 }
  0xe9   :  { %v5816_v19 = vpop.permute.xlu1 %196 }
  0xeb   :  { %1114 = vbcast.lane.b32.xlu1 %v1108_v13, 264  ;;  %1920 = vadd.xlane.f32.xlu0 %v1919_v23  ;;  %v1152_v13 = vrot.slane %v5810_v11, %v5775_v57  ;;  %v5867_v11 = vsel %vm2969_vm2, %v5849_v9, 0.0 }
  0xed   :  { %v204_v22 = vpop.permute.xlu1 %203 }
  0xef   :  { %1088 = vbcast.lane.b32.xlu1 %v1086_v20, 256 }
  0xf1   :  { %v208_v26 = vpop.permute.xlu1 %207 }
  0xf2   :  { %v354_v27 = vpack.c.bf16 %v208_v26, %v204_v22  ;;  %v5861_v22 = vsel %vm1918_vm1, %v5844_v0, 0.0 }
  0xf3   :  { %1092 = vbcast.lane.b32.xlu1 %v1086_v20, 264  ;;  %v150_v20 = vld [vmem:[#allocation2 + $0x30] sm:$0xff] }
  0xf4   :  { %v418_v31 = vrot.slane %v354_v27, %v5823_v24  ;;  %v425_v32 = vrot.slane %v354_v27, %v5826_v25  ;;  %v5871_v27 = vrot.slane %v5844_v0, %v5738_v2 }
  0xf5   :  { %v182_v34 = vpop.permute.xlu1 %181 }
  0xf6   :  { %v644_v35 = vmul.bf16 %v418_v31, %v148_v28  ;;  %v645_v36 = vmul.bf16 %v425_v32, %v149_v29  ;;  %v5875_v32 = vrot.slane %v5844_v0, %v5741_v3 }
  0xf7   :  { %1125 = vbcast.lane.b32.xlu1 %v5830_v30, 264 }
  0xf8   :  { %v680_v37 = vunpack.c.l.bf16 %v644_v35  ;;  %v681_v38 = vunpack.c.h.bf16 %v644_v35  ;;  %v682_v39 = vunpack.c.l.bf16 %v645_v36  ;;  %v683_v40 = vunpack.c.h.bf16 %v645_v36 }
  0xf9   :  { %v186_v41 = vpop.permute.xlu1 %185 }
  0xfa   :  { %v764_v42 = vadd.f32 %v682_v39, %v680_v37  ;;  %v771_v44 = vadd.f32 %v683_v40, %v681_v38  ;;  %v352_v45 = vpack.c.bf16 %v186_v41, %v182_v34  ;;  %v5879_v34 = vrot.slane %v5844_v0, %v5755_v18 }
  0xfb   :  { %1132 = vbcast.lane.b32.xlu1 %v1130_v1, 256  ;;  %v5884_v37 = vrot.slane %v5844_v0, %v5760_v33 }
  0xfc   :  { %v765_v48 = vrot.slane %v764_v42, 4  ;;  %v772_v49 = vrot.slane %v771_v44, 4  ;;  %v390_v50 = vrot.slane %v352_v45, %v5823_v24  ;;  %v397_v52 = vrot.slane %v352_v45, %v5826_v25 }
  0xfd   :  { %v215_v53 = vpop.permute.xlu1 %214 }
  0xfe   :  { %v766_v54 = vadd.f32 %v765_v48, %v764_v42  ;;  %v773_v55 = vadd.f32 %v772_v49, %v771_v44  ;;  %v640_v56 = vmul.bf16 %v390_v50, %v144_v46  ;;  %v641_v58 = vmul.bf16 %v397_v52, %v145_v47  ;;  %v5857_v21 = vpop.xlane.xlu0 %962 }
  0xff   :  { %1136 = vbcast.lane.b32.xlu1 %v1130_v1, 264  ;;  %7453 = vst [vmem:[#allocation24_spill] sm:$0xff] %v5857_v21  ;;  %v5887_v41 = vmax.f32 %v5857_v21, 1.0  ;;  %v5893_v52 = vrot.slane %v5844_v0, %v5765_v43  ;;  %v160_v43 = vld [vmem:[#allocation2 + $0x80] sm:$0xff] }
 0x100   :  { %v767_v60 = vrot.slane %v766_v54, 2  ;;  %v774_v61 = vrot.slane %v773_v55, 2  ;;  %v672_v62 = vunpack.c.l.bf16 %v640_v56  ;;  %v673_v63 = vunpack.c.h.bf16 %v640_v56  ;;  %v146_v56 = vld [vmem:[#allocation2 + $0x10] sm:$0xff] }
 0x101   :  { %v674_v6 = vunpack.c.l.bf16 %v641_v58  ;;  %v675_v7 = vunpack.c.h.bf16 %v641_v58  ;;  %v219_v8 = vpop.permute.xlu1 %218  ;;  %1121 = vbcast.lane.b32.xlu0 %v5830_v30, 256  ;;  %v971_v49 = vrot.slane %v5887_v41, 1  ;;  %v147_v58 = vld [vmem:[#allocation2 + $0x18] sm:$0xff] }
 0x102   :  { %v768_v10 = vadd.f32 %v767_v60, %v766_v54  ;;  %v355_v12 = vpack.c.bf16 %v219_v8, %v215_v53  ;;  %v775_v16 = vadd.f32 %v774_v61, %v773_v55  ;;  %v193_v42 = vpop.permute.xlu0 %192 }
 0x103   :  { %v736_v17 = vadd.f32 %v674_v6, %v672_v62  ;;  %v743_v14 = vadd.f32 %v675_v7, %v673_v63  ;;  %1143 = vbcast.lane.b32.xlu1 %v1141_v59, 256  ;;  %v353_v30 = vpack.c.bf16 %v5816_v19, %v193_v42  ;;  %5268 = vrcp.f32 %v971_v49 }
 0x104   :  { %v432_v23 = vrot.slane %v355_v12, %v5823_v24  ;;  %v439_v26 = vrot.slane %v355_v12, %v5826_v25  ;;  %v769_v35 = vrot.slane %v768_v10, 1  ;;  %v776_v38 = vrot.slane %v775_v16, 1 }
 0x105   :  { %v737_v28 = vrot.slane %v736_v17, 4  ;;  %v744_v29 = vrot.slane %v743_v14, 4  ;;  %v230_v31 = vpop.permute.xlu1 %229  ;;  %1154 = vbcast.lane.b32.xlu0 %v1152_v13, 256  ;;  %v404_v19 = vrot.slane %v353_v30, %v5823_v24  ;;  %v411_v62 = vrot.slane %v353_v30, %v5826_v25 }
 0x106   :  { %v646_v36 = vmul.bf16 %v432_v23, %v150_v20  ;;  %v647_v1 = vmul.bf16 %v439_v26, %v151_v4  ;;  %v5899_v60 = vadd.f32 %v769_v35, %v768_v10  ;;  %v5901_v61 = vadd.f32 %v776_v38, %v775_v16  ;;  %v226_v63 = vpop.permute.xlu0 %225  ;;  %v152_v23 = vld [vmem:[#allocation2 + $0x40] sm:$0xff]  ;;  %v153_v26 = vld [vmem:[#allocation2 + $0x48] sm:$0xff] }
 0x107   :  { %v738_v39 = vadd.f32 %v737_v28, %v736_v17  ;;  %v745_v40 = vadd.f32 %v744_v29, %v743_v14  ;;  %1147 = vbcast.lane.b32.xlu1 %v1141_v59, 264  ;;  %v5897_v59 = vrot.slane %v5844_v0, %v5770_v51  ;;  %v356_v12 = vpack.c.bf16 %v230_v31, %v226_v63 }
 0x108   :  { %v684_v44 = vunpack.c.l.bf16 %v646_v36  ;;  %v685_v45 = vunpack.c.h.bf16 %v646_v36  ;;  %v686_v46 = vunpack.c.l.bf16 %v647_v1  ;;  %v687_v47 = vunpack.c.h.bf16 %v647_v1 }
 0x109   :  { %v739_v48 = vrot.slane %v738_v39, 2  ;;  %v241_v50 = vpop.permute.xlu1 %240  ;;  %v746_v53 = vrot.slane %v745_v40, 2  ;;  %v642_v17 = vmul.bf16 %v404_v19, %v146_v56  ;;  %v643_v14 = vmul.bf16 %v411_v62, %v147_v58  ;;  %1165 = vbcast.lane.b32.xlu0 %v5855_v15, 256 }
 0x10a   :  { %v778_v54 = vadd.f32 %v686_v46, %v684_v44  ;;  %v785_v55 = vadd.f32 %v687_v47, %v685_v45  ;;  %v446_v28 = vrot.slane %v356_v12, %v5823_v24  ;;  %v453_v29 = vrot.slane %v356_v12, %v5826_v25  ;;  %v237_v31 = vpop.permute.xlu0 %236  ;;  %v155_v12 = vld [vmem:[#allocation2 + $0x58] sm:$0xff] }
 0x10b   :  { %1158 = vbcast.lane.b32.xlu1 %v1152_v13, 264  ;;  %v740_v6 = vadd.f32 %v739_v48, %v738_v39  ;;  %v5906_v10 = vadd.f32 %v746_v53, %v745_v40  ;;  %v676_v13 = vunpack.c.l.bf16 %v642_v17  ;;  %v677_v35 = vunpack.c.h.bf16 %v642_v17 }
 0x10c   :  { %v779_v7 = vrot.slane %v778_v54, 4  ;;  %v786_v8 = vrot.slane %v785_v55, 4  ;;  %v678_v40 = vunpack.c.l.bf16 %v643_v14  ;;  %v679_v42 = vunpack.c.h.bf16 %v643_v14 }
 0x10d   :  { %v252_v20 = vpop.permute.xlu1 %251  ;;  %v741_v38 = vrot.slane %v740_v6, 1  ;;  %v648_v44 = vmul.bf16 %v446_v28, %v152_v23  ;;  %v649_v45 = vmul.bf16 %v453_v29, %v153_v26  ;;  %v357_v46 = vpack.c.bf16 %v241_v50, %v237_v31  ;;  %v154_v50 = vld [vmem:[#allocation2 + $0x50] sm:$0xff] }
 0x10e   :  { %v780_v16 = vadd.f32 %v779_v7, %v778_v54  ;;  %v787_v39 = vadd.f32 %v786_v8, %v785_v55  ;;  %v748_v49 = vrot.slane %v5906_v10, 1  ;;  %v750_v53 = vadd.f32 %v678_v40, %v676_v13  ;;  %v248_v62 = vpop.permute.xlu0 %247 }
 0x10f   :  { %1169 = vbcast.lane.b32.xlu1 %v5855_v15, 264  ;;  %v757_v15 = vadd.f32 %v679_v42, %v677_v35  ;;  %v688_v54 = vunpack.c.l.bf16 %v648_v44  ;;  %v689_v56 = vunpack.c.h.bf16 %v648_v44  ;;  %v690_v58 = vunpack.c.l.bf16 %v649_v45 }
 0x110   :  { %v781_v30 = vrot.slane %v780_v16, 2  ;;  %v691_v19 = vunpack.c.h.bf16 %v649_v45  ;;  %v5918_v55 = vadd.f32 %v741_v38, %v740_v6  ;;  %v788_v63 = vrot.slane %v787_v39, 2  ;;  %v5269_v6 = vpop.eup %5268 }
 0x111   :  { %v5914_v47 = vpop.permute.xlu1 %262  ;;  %v751_v7 = vrot.slane %v750_v53, 4  ;;  %v758_v8 = vrot.slane %v757_v15, 4  ;;  %v792_v17 = vadd.f32 %v690_v58, %v688_v54  ;;  %v460_v23 = vrot.slane %v357_v46, %v5823_v24  ;;  %v156_v54 = vld [vmem:[#allocation2 + $0x60] sm:$0xff] }
 0x112   :  { %v799_v14 = vadd.f32 %v691_v19, %v689_v56  ;;  %v467_v26 = vrot.slane %v357_v46, %v5826_v25  ;;  %v5924_v29 = vadd.f32 %v781_v30, %v780_v16  ;;  %v358_v31 = vpack.c.bf16 %v252_v20, %v248_v62  ;;  %v157_v56 = vld [vmem:[#allocation2 + $0x68] sm:$0xff] }
 0x113   :  { %v752_v13 = vadd.f32 %v751_v7, %v750_v53  ;;  %v759_v35 = vadd.f32 %v758_v8, %v757_v15  ;;  %v793_v38 = vrot.slane %v792_v17, 4  ;;  %v650_v42 = vmul.bf16 %v460_v23, %v154_v50 }
 0x114   :  { %v800_v40 = vrot.slane %v799_v14, 4  ;;  %v651_v44 = vmul.bf16 %v467_v26, %v155_v12  ;;  %v474_v58 = vrot.slane %v358_v31, %v5823_v24  ;;  %v481_v46 = vrot.slane %v358_v31, %v5826_v25 }
 0x115   :  { %v5922_v28 = vpop.permute.xlu1 %280  ;;  %v753_v45 = vrot.slane %v752_v13, 2  ;;  %v760_v48 = vrot.slane %v759_v35, 2  ;;  %v794_v19 = vadd.f32 %v793_v38, %v792_v17  ;;  %v692_v16 = vunpack.c.l.bf16 %v650_v42 }
 0x116   :  { %v801_v1 = vadd.f32 %v800_v40, %v799_v14  ;;  %v693_v30 = vunpack.c.h.bf16 %v650_v42  ;;  %v694_v62 = vunpack.c.l.bf16 %v651_v44  ;;  %v695_v7 = vunpack.c.h.bf16 %v651_v44 }
 0x117   :  { %v754_v15 = vadd.f32 %v753_v45, %v752_v13  ;;  %v761_v20 = vadd.f32 %v760_v48, %v759_v35  ;;  %v795_v8 = vrot.slane %v794_v19, 2  ;;  %v652_v12 = vmul.bf16 %v474_v58, %v156_v54  ;;  %v259_v35 = vpop.permute.xlu0 %258 }
 0x118   :  { %v802_v50 = vrot.slane %v801_v1, 2  ;;  %v653_v23 = vmul.bf16 %v481_v46, %v157_v56  ;;  %v806_v4 = vadd.f32 %v694_v62, %v692_v16  ;;  %v813_v21 = vadd.f32 %v695_v7, %v693_v30  ;;  %v158_v7 = vld [vmem:[#allocation2 + $0x70] sm:$0xff] }
 0x119   :  { %v285_v53 = vpop.permute.xlu1 %284  ;;  %v755_v26 = vrot.slane %v754_v15, 1  ;;  %v762_v36 = vrot.slane %v761_v20, 1  ;;  %v5928_v51 = vadd.f32 %v788_v63, %v787_v39  ;;  %v796_v31 = vadd.f32 %v795_v8, %v794_v19  ;;  %v159_v8 = vld [vmem:[#allocation2 + $0x78] sm:$0xff] }
 0x11a   :  { %v696_v17 = vunpack.c.l.bf16 %v652_v12  ;;  %v697_v14 = vunpack.c.h.bf16 %v652_v12  ;;  %v807_v13 = vrot.slane %v806_v4, 4  ;;  %v814_v48 = vrot.slane %v813_v21, 4 }
 0x11b   :  { %v756_v40 = vadd.f32 %v755_v26, %v754_v15  ;;  %v763_v42 = vadd.f32 %v762_v36, %v761_v20  ;;  %v5931_v44 = vadd.f32 %v748_v49, %v5906_v10  ;;  %v698_v45 = vunpack.c.l.bf16 %v653_v23 }
 0x11c   :  { %v699_v54 = vunpack.c.h.bf16 %v653_v23  ;;  %v783_v58 = vrot.slane %v5924_v29, 1  ;;  %v5935_v39 = vadd.f32 %v802_v50, %v801_v1  ;;  %v808_v63 = vadd.f32 %v807_v13, %v806_v4  ;;  %v163_v13 = vld [vmem:[#allocation2 + $0x98] sm:$0xff] }
 0x11d   :  { %v292_v38 = vpop.permute.xlu1 %291  ;;  %v815_v46 = vadd.f32 %v814_v48, %v813_v21  ;;  %v820_v16 = vadd.f32 %v698_v45, %v696_v17  ;;  %v359_v30 = vpack.c.bf16 %v5914_v47, %v259_v35  ;;  %v5939_v20 = vmul.f32 %v5269_v6, %v756_v40 }
 0x11e   :  { %v827_v36 = vadd.f32 %v699_v54, %v697_v14  ;;  %v5941_v10 = vmul.f32 %v5269_v6, %v763_v42  ;;  %v797_v49 = vrot.slane %v796_v31, 1  ;;  %v809_v62 = vrot.slane %v808_v63, 2  ;;  %v162_v42 = vld [vmem:[#allocation2 + $0x90] sm:$0xff] }
 0x11f   :  { %v816_v12 = vrot.slane %v815_v46, 2  ;;  %v821_v1 = vrot.slane %v820_v16, 4  ;;  %v488_v4 = vrot.slane %v359_v30, %v5823_v24  ;;  %v495_v21 = vrot.slane %v359_v30, %v5826_v25 }
 0x120   :  { %v5946_v50 = vadd.f32 %v783_v58, %v5924_v29  ;;  %v361_v23 = vpack.c.bf16 %v285_v53, %v5922_v28  ;;  %v5950_v6 = vadd.f32 %v809_v62, %v808_v63  ;;  %v828_v17 = vrot.slane %v827_v36, 4  ;;  %v164_v29 = vld [vmem:[#allocation2 + $0xa0] sm:$0xff] }
 0x121   :  { %v296_v15 = vpop.permute.xlu1 %295  ;;  %v654_v14 = vmul.bf16 %v488_v4, %v158_v7  ;;  %v655_v40 = vmul.bf16 %v495_v21, %v159_v8  ;;  %v822_v35 = vadd.f32 %v821_v1, %v820_v16  ;;  %v5957_v53 = vadd.f32 %v797_v49, %v796_v31  ;;  %v165_v16 = vld [vmem:[#allocation2 + $0xa8] sm:$0xff] }
 0x122   :  { %v362_v26 = vpack.c.bf16 %v296_v15, %v292_v38  ;;  %v516_v45 = vrot.slane %v361_v23, %v5823_v24  ;;  %v523_v54 = vrot.slane %v361_v23, %v5826_v25  ;;  %v5959_v38 = vadd.f32 %v816_v12, %v815_v46 }
 0x123   :  { %v700_v63 = vunpack.c.l.bf16 %v654_v14  ;;  %v702_v15 = vunpack.c.l.bf16 %v655_v40  ;;  %v5962_v1 = vadd.f32 %v828_v17, %v827_v36  ;;  %v823_v30 = vrot.slane %v822_v35, 2 }
 0x124   :  { %v530_v58 = vrot.slane %v362_v26, %v5823_v24  ;;  %v658_v62 = vmul.bf16 %v516_v45, %v162_v42  ;;  %v659_v7 = vmul.bf16 %v523_v54, %v163_v13  ;;  %v537_v4 = vrot.slane %v362_v26, %v5826_v25  ;;  %v161_v26 = vld [vmem:[#allocation2 + $0x88] sm:$0xff] }
 0x125   :  { %v270_v48 = vpop.permute.xlu1 %269  ;;  %v701_v56 = vunpack.c.h.bf16 %v654_v14  ;;  %v703_v19 = vunpack.c.h.bf16 %v655_v40  ;;  %v834_v42 = vadd.f32 %v702_v15, %v700_v63  ;;  %v5966_v14 = vadd.f32 %v823_v30, %v822_v35 }
 0x126   :  { %v660_v21 = vmul.bf16 %v530_v58, %v164_v29  ;;  %v708_v28 = vunpack.c.l.bf16 %v658_v62  ;;  %v709_v31 = vunpack.c.h.bf16 %v658_v62  ;;  %v710_v49 = vunpack.c.l.bf16 %v659_v7 }
 0x127   :  { %v711_v46 = vunpack.c.h.bf16 %v659_v7  ;;  %v661_v12 = vmul.bf16 %v537_v4, %v165_v16  ;;  %v835_v7 = vrot.slane %v834_v42, 4  ;;  %v841_v16 = vadd.f32 %v703_v19, %v701_v56 }
 0x128   :  { %v712_v47 = vunpack.c.l.bf16 %v660_v21  ;;  %v713_v13 = vunpack.c.h.bf16 %v660_v21  ;;  %v862_v54 = vadd.f32 %v710_v49, %v708_v28  ;;  %1923 = vadd.xlane.f32.xlu0 %v5861_v22  ;;  %5270 = vrcp.f32 %v5887_v41 }
 0x129   :  { %v274_v23 = vpop.permute.xlu1 %273  ;;  %v869_v8 = vadd.f32 %v711_v46, %v709_v31  ;;  %v714_v36 = vunpack.c.l.bf16 %v661_v12  ;;  %v715_v17 = vunpack.c.h.bf16 %v661_v12 }
 0x12a   :  { %v360_v45 = vpack.c.bf16 %v274_v23, %v270_v48  ;;  %v863_v63 = vrot.slane %v862_v54, 4 }
 0x12b   :  { %v870_v15 = vrot.slane %v869_v8, 4  ;;  %v876_v48 = vadd.f32 %v714_v36, %v712_v47  ;;  %v883_v28 = vadd.f32 %v715_v17, %v713_v13  ;;  %v842_v47 = vrot.slane %v841_v16, 4  ;;  %v166_v17 = vld [vmem:[#allocation2 + $0xb0] sm:$0xff] }
 0x12c   :  { %v502_v62 = vrot.slane %v360_v45, %v5823_v24  ;;  %v509_v40 = vrot.slane %v360_v45, %v5826_v25  ;;  %v864_v23 = vadd.f32 %v863_v63, %v862_v54 }
 0x12d   :  { %v303_v29 = vpop.permute.xlu1 %302  ;;  %v871_v31 = vadd.f32 %v870_v15, %v869_v8  ;;  %v877_v22 = vrot.slane %v876_v48, 4  ;;  %v884_v49 = vrot.slane %v883_v28, 4 }
 0x12e   :  { %v656_v4 = vmul.bf16 %v502_v62, %v160_v43  ;;  %v657_v21 = vmul.bf16 %v509_v40, %v161_v26  ;;  %v865_v33 = vrot.slane %v864_v23, 2  ;;  %v167_v26 = vld [vmem:[#allocation2 + $0xb8] sm:$0xff] }
 0x12f   :  { %v872_v18 = vrot.slane %v871_v31, 2  ;;  %v878_v45 = vadd.f32 %v877_v22, %v876_v48  ;;  %v885_v5 = vadd.f32 %v884_v49, %v883_v28  ;;  %v836_v28 = vadd.f32 %v835_v7, %v834_v42 }
 0x130   :  { %v704_v30 = vunpack.c.l.bf16 %v656_v4  ;;  %v705_v46 = vunpack.c.h.bf16 %v656_v4  ;;  %v706_v12 = vunpack.c.l.bf16 %v657_v21  ;;  %v707_v58 = vunpack.c.h.bf16 %v657_v21 }
 0x131   :  { %v307_v35 = vpop.permute.xlu1 %306  ;;  %v866_v19 = vadd.f32 %v865_v33, %v864_v23  ;;  %v873_v54 = vadd.f32 %v872_v18, %v871_v31  ;;  %v879_v8 = vrot.slane %v878_v45, 2  ;;  %v886_v36 = vrot.slane %v885_v5, 2 }
 0x132   :  { %v848_v13 = vadd.f32 %v706_v12, %v704_v30  ;;  %v855_v56 = vadd.f32 %v707_v58, %v705_v46  ;;  %v363_v43 = vpack.c.bf16 %v307_v35, %v303_v29  ;;  %v7454_v29 = vrot.slane %v5928_v51, 1 }
 0x133   :  { %2971 = vadd.xlane.f32.xlu1 %v5867_v11  ;;  %v867_v11 = vrot.slane %v866_v19, 1  ;;  %v880_v4 = vadd.f32 %v879_v8, %v878_v45  ;;  %v843_v31 = vadd.f32 %v842_v47, %v841_v16  ;;  %v874_v22 = vrot.slane %v873_v54, 1 }
 0x134   :  { %v849_v40 = vrot.slane %v848_v13, 4  ;;  %v856_v63 = vrot.slane %v855_v56, 4  ;;  %v544_v15 = vrot.slane %v363_v43, %v5823_v24  ;;  %v551_v48 = vrot.slane %v363_v43, %v5826_v25 }
 0x135   :  { %v5972_v62 = vpop.permute.xlu1 %317  ;;  %v5979_v33 = vadd.f32 %v7454_v29, %v5928_v51  ;;  %v881_v49 = vrot.slane %v880_v4, 1  ;;  %v887_v35 = vadd.f32 %v886_v36, %v885_v5  ;;  %v837_v7 = vrot.slane %v836_v28, 2 }
 0x136   :  { %v850_v18 = vadd.f32 %v849_v40, %v848_v13  ;;  %v857_v58 = vadd.f32 %v856_v63, %v855_v56  ;;  %v662_v21 = vmul.bf16 %v544_v15, %v166_v17  ;;  %v663_v23 = vmul.bf16 %v551_v48, %v167_v26 }
 0x137   :  { %v7455_v51 = vrot.slane %v5935_v39, 1  ;;  %v5986_v13 = vadd.f32 %v867_v11, %v866_v19  ;;  %v818_v47 = vrot.slane %v5959_v38, 1  ;;  %v7456_v17 = vrot.slane %v5962_v1, 2 }
 0x138   :  { %v851_v46 = vrot.slane %v850_v18, 2  ;;  %v858_v12 = vrot.slane %v857_v58, 2  ;;  %v716_v43 = vunpack.c.l.bf16 %v662_v21  ;;  %v717_v42 = vunpack.c.h.bf16 %v662_v21 }
 0x139   :  { %v325_v30 = vpop.permute.xlu1 %324  ;;  %v718_v45 = vunpack.c.l.bf16 %v663_v23  ;;  %v719_v8 = vunpack.c.h.bf16 %v663_v23  ;;  %v5984_v29 = vadd.f32 %v7455_v51, %v5935_v39  ;;  %v831_v26 = vadd.f32 %v7456_v17, %v5962_v1 }
 0x13a   :  { %v852_v56 = vadd.f32 %v851_v46, %v850_v18  ;;  %v859_v16 = vadd.f32 %v858_v12, %v857_v58  ;;  %v844_v40 = vrot.slane %v843_v31, 2  ;;  %v5992_v15 = vadd.f32 %v874_v22, %v873_v54 }
 0x13b   :  { %v890_v5 = vadd.f32 %v718_v45, %v716_v43  ;;  %v897_v36 = vadd.f32 %v719_v8, %v717_v42  ;;  %v5994_v48 = vadd.f32 %v881_v49, %v880_v4  ;;  %v888_v39 = vrot.slane %v887_v35, 1 }
 0x13c   :  { %v845_v18 = vadd.f32 %v844_v40, %v843_v31  ;;  %v7457_v58 = vrot.slane %v5887_v41, 2  ;;  %v853_v21 = vrot.slane %v852_v56, 1  ;;  %v860_v23 = vrot.slane %v859_v16, 1 }
 0x13d   :  { %v329_v63 = vpop.permute.xlu1 %328  ;;  %v891_v19 = vrot.slane %v890_v5, 4  ;;  %v898_v11 = vrot.slane %v897_v36, 4  ;;  %v977_v46 = vrot.slane %v5887_v41, 7  ;;  %v7458_v1 = vrot.slane %v5887_v41, 3 }
 0x13e   :  { %5272 = vrcp.f32 %v7457_v58  ;;  %v832_v22 = vrot.slane %v831_v26, 1  ;;  %v7459_v49 = vrot.slane %v5887_v41, 4  ;;  %v6004_v43 = vadd.f32 %v888_v39, %v887_v35  ;;  %1187 = vbcast.lane.b32.xlu0 %v5871_v27, 256 }
 0x13f   :  { %5274 = vrcp.f32 %v7458_v1  ;;  %v892_v54 = vadd.f32 %v891_v19, %v890_v5  ;;  %v899_v4 = vadd.f32 %v898_v11, %v897_v36  ;;  %v846_v31 = vrot.slane %v845_v18, 1 }
 0x140   :  { %5276 = vrcp.f32 %v7459_v49  ;;  %v7460_v42 = vrot.slane %v5887_v41, 5  ;;  %v838_v45 = vadd.f32 %v837_v7, %v836_v28  ;;  %v7461_v17 = vrot.slane %v5887_v41, 6  ;;  %v3446_v28 = vld [vmem:[%s7418_s7 + $0x8] sm:$0xff]  ;;  %v3448_v41 = vld [vmem:[%s7418_s7 + $0x18] sm:$0xff] }
 0x141   :  { %v336_v12 = vpop.permute.xlu1 %335  ;;  %v893_v8 = vrot.slane %v892_v54, 2  ;;  %v900_v51 = vrot.slane %v899_v4, 2  ;;  %v825_v5 = vrot.slane %v5966_v14, 1  ;;  %v819_v36 = vadd.f32 %v818_v47, %v5959_v38  ;;  %v170_v47 = vld [vmem:[#allocation2 + $0xd0] sm:$0xff] }
 0x142   :  { %5278 = vrcp.f32 %v7460_v42  ;;  %v839_v35 = vrot.slane %v838_v45, 1  ;;  %v365_v40 = vpack.c.bf16 %v329_v63, %v325_v30  ;;  %v6020_v7 = vadd.f32 %v853_v21, %v852_v56  ;;  %1198 = vbcast.lane.b32.xlu0 %v5875_v32, 256  ;;  %v5271_v21 = vpop.eup %5270 }
 0x143   :  { %5280 = vrcp.f32 %v7461_v17  ;;  %v6022_v39 = vadd.f32 %v860_v23, %v859_v16  ;;  %v833_v19 = vadd.f32 %v832_v22, %v831_v26  ;;  %v7462_v38 = vrot.slane %v5950_v6, 1 }
 0x144   :  { %5282 = vrcp.f32 %v977_v46  ;;  %1191 = vbcast.lane.b32.xlu1 %v5871_v27, 264  ;;  %v171_v27 = vld [vmem:[#allocation2 + $0xd8] sm:$0xff]  ;;  %v847_v11 = vadd.f32 %v846_v31, %v845_v18  ;;  %v572_v58 = vrot.slane %v365_v40, %v5823_v24  ;;  %v579_v46 = vrot.slane %v365_v40, %v5826_v25 }
 0x145   :  { %v812_v30 = vadd.f32 %v7462_v38, %v5950_v6  ;;  %v340_v63 = vpop.permute.xlu1 %339  ;;  %v6031_v56 = vadd.f32 %v893_v8, %v892_v54  ;;  %v6033_v16 = vadd.f32 %v900_v51, %v899_v4  ;;  %v826_v26 = vadd.f32 %v825_v5, %v5966_v14 }
 0x146   :  { %v6029_v1 = vpack.c.bf16 %v340_v63, %v336_v12  ;;  %v4870_v6 = vpack.c.bf16 %v3448_v41, %v3446_v28  ;;  %v840_v18 = vadd.f32 %v839_v35, %v838_v45  ;;  %v6037_v23 = vmul.bf16 %v572_v58, %v170_v47  ;;  %1176 = vbcast.lane.b32.xlu0 %v5879_v34, 256 }
 0x147   :  { %v6039_v22 = vmul.bf16 %v579_v46, %v171_v27  ;;  %v6044_v54 = vrot.slane %v5849_v9, %v5738_v2  ;;  %v1003_v49 = vmul.f32 %v5271_v21, %v5931_v44  ;;  %v1002_v14 = vmul.f32 %v5271_v21, %v5918_v55 }
 0x148   :  { %1202 = vbcast.lane.b32.xlu1 %v5875_v32, 264  ;;  %v5273_v4 = vpop.eup %5272  ;;  %v586_v12 = vrot.slane %v6029_v1, %v5823_v24  ;;  %v593_v31 = vrot.slane %v6029_v1, %v5826_v25  ;;  %4871 = vmatprep.subr.bf16.mxu1 %v4870_v6  ;;  %v724_v8 = vunpack.c.l.bf16 %v6037_v23  ;;  %v725_v44 = vunpack.c.h.bf16 %v6037_v23 }
 0x149   :  { %v6052_v42 = vpop.permute.xlu1 %346  ;;  %v5275_v45 = vpop.eup %5274  ;;  %v1009_v32 = vmul.f32 %v5273_v4, %v5901_v61  ;;  %v1008_v9 = vmul.f32 %v5273_v4, %v5899_v60  ;;  %v7463_v17 = vrot.slane %v5941_v10, 7  ;;  %v7464_v40 = vrot.slane %v5939_v20, 7 }
 0x14a   :  { %v5277_v51 = vpop.eup %5276  ;;  %v1012_v55 = vmul.f32 %v5275_v45, %v5979_v33  ;;  %v1011_v35 = vmul.f32 %v5275_v45, %v5946_v50  ;;  %v6071_v4 = vpop.xlane.xlu0 %965  ;;  %1209 = vbcast.lane.b32.xlu0 %v5884_v37, 256 }
 0x14b   :  { %v3144_v5 = vsel %vm3123_vm3, %v7463_v17, %v1003_v49  ;;  %v3124_v28 = vsel %vm3123_vm3, %v7464_v40, %v1002_v14  ;;  %v1015_v61 = vmul.f32 %v5277_v51, %v5984_v29  ;;  %v3145_v41 = vrot.slane %v1009_v32, 6  ;;  %7465 = vst [vmem:[#allocation25_spill] sm:$0xff] %v6071_v4  ;;  %v2008_v40 = vld [vmem:[%s7416_s5 + $0x8] sm:$0xff] }
 0x14c   :  { %v5279_v60 = vpop.eup %5278  ;;  %v1014_v38 = vmul.f32 %v5277_v51, %v5957_v53  ;;  %v3125_v47 = vrot.slane %v1008_v9, 6  ;;  %1180 = vbcast.lane.b32.xlu1 %v5879_v34, 264  ;;  %v3147_v27 = vrot.slane %v1012_v55, 5  ;;  %v3128_v50 = vrot.slane %v1011_v35, 5  ;;  %v172_v9 = vld [vmem:[#allocation2 + $0xe0] sm:$0xff]  ;;  %v173_v51 = vld [vmem:[#allocation2 + $0xe8] sm:$0xff] }
 0x14d   :  { %v5281_v10 = vpop.eup %5280  ;;  %v1018_v33 = vmul.f32 %v5279_v60, %v819_v36  ;;  %v1017_v63 = vmul.f32 %v5279_v60, %v812_v30  ;;  %v351_v58 = vpop.permute.xlu1 %350  ;;  %v3146_v6 = vsel %vm3126_vm4, %v3145_v41, %v3144_v5  ;;  %v3149_v21 = vrot.slane %v1015_v61, 4 }
 0x14e   :  { %v5283_v20 = vpop.eup %5282  ;;  %v1021_v46 = vmul.f32 %v5281_v10, %v833_v19  ;;  %v1020_v23 = vmul.f32 %v5281_v10, %v826_v26  ;;  %v3148_v53 = vsel %vm3129_vm5, %v3147_v27, %v3146_v6  ;;  %v3127_v30 = vsel %vm3126_vm4, %v3125_v47, %v3124_v28  ;;  %1220 = vbcast.lane.b32.xlu0 %v5893_v52, 256  ;;  %v314_v10 = vpop.permute.xlu0 %313 }
 0x14f   :  { %v1024_v29 = vmul.f32 %v5283_v20, %v847_v11  ;;  %v3151_v49 = vrot.slane %v1018_v33, 3  ;;  %v1023_v14 = vmul.f32 %v5283_v20, %v840_v18  ;;  %v3150_v34 = vsel %vm3132_vm6, %v3149_v21, %v3148_v53  ;;  %v168_v53 = vld [vmem:[#allocation2 + $0xc0] sm:$0xff] }
 0x150   :  { %v3153_v36 = vrot.slane %v1021_v46, 2  ;;  %v3131_v45 = vrot.slane %v1014_v38, 4  ;;  %1213 = vbcast.lane.b32.xlu1 %v5884_v37, 264  ;;  %v3130_v32 = vsel %vm3129_vm5, %v3128_v50, %v3127_v30  ;;  %v3134_v11 = vrot.slane %v1017_v63, 3  ;;  %v174_v30 = vld [vmem:[#allocation2 + $0xf0] sm:$0xff] }
 0x151   :  { %v3152_v19 = vsel %vm3135_vm7, %v3151_v49, %v3150_v34  ;;  %v3155_v26 = vrot.slane %v1024_v29, 1  ;;  %v1100_v55 = vpop.permute.xlu1 %1099  ;;  %v3137_v5 = vrot.slane %v1020_v23, 2  ;;  %v3140_v35 = vrot.slane %v1023_v14, 1  ;;  %v169_v49 = vld [vmem:[#allocation2 + $0xc8] sm:$0xff] }
 0x152   :  { %v3154_v18 = vsel %vm3138_vm8, %v3153_v36, %v3152_v19  ;;  %v3133_v17 = vsel %vm3132_vm6, %v3131_v45, %v3130_v32  ;;  %v726_v60 = vunpack.c.l.bf16 %v6039_v22  ;;  %v727_v61 = vunpack.c.h.bf16 %v6039_v22  ;;  %v175_v45 = vld [vmem:[#allocation2 + $0xf8] sm:$0xff] }
 0x153   :  { %v3156_v37 = vsel %vm3141_vm9, %v3155_v26, %v3154_v18  ;;  %v3136_v28 = vsel %vm3135_vm7, %v3134_v11, %v3133_v17  ;;  %v668_v38 = vmul.bf16 %v586_v12, %v172_v9  ;;  %v669_v47 = vmul.bf16 %v593_v31, %v173_v51 }
 0x154   :  { %3420 = vmatprep.mubr.f32.mxu1 %v3156_v37  ;;  %v3139_v41 = vsel %vm3138_vm8, %v3137_v5, %v3136_v28  ;;  %1224 = vbcast.lane.b32.xlu1 %v5893_v52, 264  ;;  %v918_v27 = vadd.f32 %v726_v60, %v724_v8  ;;  %v925_v63 = vadd.f32 %v727_v61, %v725_v44  ;;  %v6097_v22 = vsel %vm2969_vm2, %v2008_v40, 0.0 }
 0x155   :  { %v3142_v33 = vsel %vm3141_vm9, %v3140_v35, %v3139_v41  ;;  %v1104_v50 = vpop.permute.xlu1 %1103  ;;  %v728_v20 = vunpack.c.l.bf16 %v668_v38  ;;  %v729_v46 = vunpack.c.h.bf16 %v668_v38  ;;  %v730_v6 = vunpack.c.l.bf16 %v669_v47 }
 0x156   :  { %3421 = vmatmul.mubr.f32.vlgmr.msra.gmra.mrb[0].mxu1 %v3142_v33  ;;  %v731_v21 = vunpack.c.h.bf16 %v669_v47  ;;  %v919_v23 = vrot.slane %v918_v27, 4  ;;  %v926_v1 = vrot.slane %v925_v63, 4  ;;  %v364_v12 = vpack.c.bf16 %v5972_v62, %v314_v10 }
 0x157   :  { %v367_v31 = vpack.c.bf16 %v351_v58, %v6052_v42  ;;  %v895_v52 = vrot.slane %v6031_v56, 1  ;;  %v902_v8 = vrot.slane %v6033_v16, 1  ;;  %v932_v44 = vadd.f32 %v730_v6, %v728_v20 }
 0x158   :  { %v939_v29 = vadd.f32 %v731_v21, %v729_v46  ;;  %1231 = vbcast.lane.b32.xlu1 %v5897_v59, 256  ;;  %v920_v14 = vadd.f32 %v919_v23, %v918_v27  ;;  %v558_v34 = vrot.slane %v364_v12, %v5823_v24  ;;  %v565_v36 = vrot.slane %v364_v12, %v5826_v25 }
 0x159   :  { %v1111_v62 = vpop.permute.xlu1 %1110  ;;  %v6108_v42 = vrot.slane %v5844_v0, %v5775_v57  ;;  %v927_v58 = vadd.f32 %v926_v1, %v925_v63  ;;  %v6111_v19 = vmax.f32 %v6071_v4, 1.0  ;;  %v600_v26 = vrot.slane %v367_v31, %v5823_v24 }
 0x15a   :  { %v607_v32 = vrot.slane %v367_v31, %v5826_v25  ;;  %v933_v11 = vrot.slane %v932_v44, 4  ;;  %v940_v9 = vrot.slane %v939_v29, 4  ;;  %v664_v51 = vmul.bf16 %v558_v34, %v168_v53 }
 0x15b   :  { %v665_v18 = vmul.bf16 %v565_v36, %v169_v49  ;;  %v6116_v17 = vadd.f32 %v895_v52, %v6031_v56  ;;  %v670_v5 = vmul.bf16 %v600_v26, %v174_v30  ;;  %v1260_v0 = vpack.c.bf16 %v1104_v50, %v1100_v55  ;;  %v1055_v49 = vld [vmem:[%s7412_s1 + $0x20] sm:$0xff]  ;;  %v1056_v26 = vld [vmem:[%s7412_s1 + $0x28] sm:$0x33] }
 0x15c   :  { %v671_v35 = vmul.bf16 %v607_v32, %v175_v45  ;;  %1235 = vbcast.lane.b32.xlu1 %v5897_v59, 264  ;;  %v6120_v40 = vadd.f32 %v902_v8, %v6033_v16  ;;  %v921_v37 = vrot.slane %v920_v14, 2  ;;  %v720_v28 = vunpack.c.l.bf16 %v664_v51  ;;  %v1053_v59 = vld [vmem:[%s7412_s1 + $0x10] sm:$0xff]  ;;  %v1054_v16 = vld [vmem:[%s7412_s1 + $0x18] sm:$0x33] }
 0x15d   :  { %v721_v60 = vunpack.c.h.bf16 %v664_v51  ;;  %v1115_v61 = vpop.permute.xlu1 %1114  ;;  %v928_v41 = vrot.slane %v927_v58, 2  ;;  %v722_v38 = vunpack.c.l.bf16 %v665_v18  ;;  %v723_v47 = vunpack.c.h.bf16 %v665_v18 }
 0x15e   :  { %v978_v56 = vrot.slane %v6111_v19, 1  ;;  %v6123_v10 = vadd.f32 %v933_v11, %v932_v44  ;;  %v6125_v33 = vadd.f32 %v940_v9, %v939_v29  ;;  %v733_v27 = vunpack.c.h.bf16 %v670_v5 }
 0x15f   :  { %v735_v55 = vunpack.c.h.bf16 %v671_v35  ;;  %v904_v63 = vadd.f32 %v722_v38, %v720_v28  ;;  %v911_v50 = vadd.f32 %v723_v47, %v721_v60  ;;  %v1311_v20 = vrot.slane %v1260_v0, %v5823_v24 }
 0x160   :  { %v1318_v46 = vrot.slane %v1260_v0, %v5826_v25  ;;  %2077 = vbcast.lane.b32.xlu1 %v6044_v54, 256  ;;  %v6136_v6 = vadd.f32 %v921_v37, %v920_v14  ;;  %v732_v21 = vunpack.c.l.bf16 %v670_v5  ;;  %v734_v23 = vunpack.c.l.bf16 %v671_v35 }
 0x161   :  { %v1261_v1 = vpack.c.bf16 %v1115_v61, %v1111_v62  ;;  %v1089_v12 = vpop.permute.xlu1 %1088  ;;  %v905_v31 = vrot.slane %v904_v63, 4  ;;  %v912_v52 = vrot.slane %v911_v50, 4  ;;  %v1549_v8 = vmul.bf16 %v1311_v20, %v1053_v59 }
 0x162   :  { %v1550_v44 = vmul.bf16 %v1318_v46, %v1054_v16  ;;  %v6138_v29 = vadd.f32 %v928_v41, %v927_v58  ;;  %v935_v53 = vrot.slane %v6123_v10, 2  ;;  %v953_v30 = vadd.f32 %v735_v55, %v733_v27 }
 0x163   :  { %v1325_v34 = vrot.slane %v1261_v1, %v5823_v24  ;;  %v1332_v14 = vrot.slane %v1261_v1, %v5826_v25  ;;  %v906_v36 = vadd.f32 %v905_v31, %v904_v63  ;;  %v1583_v45 = vunpack.c.l.bf16 %v1549_v8  ;;  %v1051_v1 = vld [vmem:[%s7412_s1] sm:$0xff] }
 0x164   :  { %v1584_v62 = vunpack.c.h.bf16 %v1549_v8  ;;  %2081 = vbcast.lane.b32.xlu1 %v6044_v54, 264  ;;  %v942_v58 = vrot.slane %v6125_v33, 2  ;;  %v6151_v32 = vadd.f32 %v734_v23, %v732_v21  ;;  %v1585_v11 = vunpack.c.l.bf16 %v1550_v44 }
 0x165   :  { %v1586_v9 = vunpack.c.h.bf16 %v1550_v44  ;;  %v1093_v51 = vpop.permute.xlu1 %1092  ;;  %v907_v18 = vrot.slane %v906_v36, 2  ;;  %v913_v5 = vadd.f32 %v912_v52, %v911_v50  ;;  %v1551_v0 = vmul.bf16 %v1325_v34, %v1055_v49 }
 0x166   :  { %v1671_v35 = vsel %vm1652_vm10, %v1584_v62, 0.0  ;;  %v1663_v37 = vsel %vm1643_vm11, %v1585_v11, 0.0  ;;  %v1552_v60 = vmul.bf16 %v1332_v14, %v1056_v26  ;;  %v1259_v61 = vpack.c.bf16 %v1093_v51, %v1089_v12 }
 0x167   :  { %v1672_v28 = vsel %vm1654_vm12, %v1586_v9, 0.0  ;;  %v954_v41 = vrot.slane %v953_v30, 4  ;;  %v1664_v38 = vadd.f32 %v1663_v37, %v1583_v45  ;;  %v930_v27 = vrot.slane %v6138_v29, 1 }
 0x168   :  { %v1673_v47 = vadd.f32 %v1672_v28, %v1671_v35  ;;  %1242 = vbcast.lane.b32.xlu1 %v6108_v42, 256  ;;  %v1587_v55 = vunpack.c.l.bf16 %v1551_v0  ;;  %v1588_v59 = vunpack.c.h.bf16 %v1551_v0  ;;  %v1589_v16 = vunpack.c.l.bf16 %v1552_v60 }
 0x169   :  { %v1590_v63 = vunpack.c.h.bf16 %v1552_v60  ;;  %v6158_v50 = vpop.permute.xlu1 %1125  ;;  %v908_v20 = vadd.f32 %v907_v18, %v906_v36  ;;  %v914_v46 = vrot.slane %v913_v5, 2  ;;  %v1665_v21 = vrot.slane %v1664_v38, 4  ;;  %v1052_v36 = vld [vmem:[%s7412_s1 + $0x8] sm:$0x33] }
 0x16a   :  { %v1674_v23 = vrot.slane %v1673_v47, 4  ;;  %v1680_v12 = vsel %vm1643_vm11, %v1589_v16, 0.0  ;;  %v1688_v31 = vsel %vm1652_vm10, %v1588_v59, 0.0  ;;  %v1297_v8 = vrot.slane %v1259_v61, %v5823_v24 }
 0x16b   :  { %v1689_v52 = vsel %vm1654_vm12, %v1590_v63, 0.0  ;;  %v947_v44 = vrot.slane %v6151_v32, 4  ;;  %v955_v49 = vadd.f32 %v954_v41, %v953_v30  ;;  %v1666_v34 = vadd.f32 %v1665_v21, %v1664_v38 }
 0x16c   :  { %v1675_v14 = vadd.f32 %v1674_v23, %v1673_v47  ;;  %1246 = vbcast.lane.b32.xlu1 %v6108_v42, 264  ;;  %v1681_v45 = vadd.f32 %v1680_v12, %v1587_v55  ;;  %v1690_v62 = vadd.f32 %v1689_v52, %v1688_v31  ;;  %v1304_v26 = vrot.slane %v1259_v61, %v5826_v25 }
 0x16d   :  { %v1547_v11 = vmul.bf16 %v1297_v8, %v1051_v1  ;;  %v6173_v9 = vpop.permute.xlu1 %1132  ;;  %v915_v51 = vadd.f32 %v914_v46, %v913_v5  ;;  %v1667_v18 = vrot.slane %v1666_v34, 2  ;;  %v943_v30 = vadd.f32 %v942_v58, %v6125_v33  ;;  %2974 = vadd.xlane.f32.xlu0 %v6097_v22 }
 0x16e   :  { %v1676_v35 = vrot.slane %v1675_v14, 2  ;;  %v909_v0 = vrot.slane %v908_v20, 1  ;;  %v1682_v37 = vrot.slane %v1681_v45, 4  ;;  %v1691_v28 = vrot.slane %v1690_v62, 4 }
 0x16f   :  { %v1548_v60 = vmul.bf16 %v1304_v26, %v1052_v36  ;;  %v1668_v41 = vadd.f32 %v1667_v18, %v1666_v34  ;;  %v1579_v47 = vunpack.c.l.bf16 %v1547_v11  ;;  %v1580_v42 = vunpack.c.h.bf16 %v1547_v11 }
 0x170   :  { %v1677_v38 = vadd.f32 %v1676_v35, %v1675_v14  ;;  %v1683_v55 = vadd.f32 %v1682_v37, %v1681_v45  ;;  %v1692_v59 = vadd.f32 %v1691_v28, %v1690_v62  ;;  %v916_v63 = vrot.slane %v915_v51, 1 }
 0x171   :  { %v1581_v16 = vunpack.c.l.bf16 %v1548_v60  ;;  %v1582_v61 = vunpack.c.h.bf16 %v1548_v60  ;;  %v1669_v21 = vrot.slane %v1668_v41, 1  ;;  %v1653_v5 = vsel %vm1652_vm10, %v1580_v42, 0.0  ;;  %v1137_v23 = vpop.permute.xlu1 %1136 }
 0x172   :  { %v944_v46 = vrot.slane %v943_v30, 1  ;;  %v1684_v33 = vrot.slane %v1683_v55, 2  ;;  %v1693_v58 = vrot.slane %v1692_v59, 2  ;;  %v948_v31 = vadd.f32 %v947_v44, %v6151_v32 }
 0x173   :  { %v1644_v1 = vsel %vm1643_vm11, %v1581_v16, 0.0  ;;  %v1655_v12 = vsel %vm1654_vm12, %v1582_v61, 0.0  ;;  %v1678_v52 = vrot.slane %v1677_v38, 1  ;;  %v6181_v14 = vadd.f32 %v909_v0, %v908_v20  ;;  %v3447_v16 = vld [vmem:[%s7418_s7 + $0x10] sm:$0xff] }
 0x174   :  { %v1645_v8 = vadd.f32 %v1644_v1, %v1579_v47  ;;  %v1656_v34 = vadd.f32 %v1655_v12, %v1653_v5  ;;  %v1685_v36 = vadd.f32 %v1684_v33, %v1683_v55  ;;  %v6183_v45 = vadd.f32 %v1693_v58, %v1692_v59  ;;  %v3445_v59 = vld [vmem:[%s7418_s7] sm:$0xff]  ;;  %v3452_v12 = vld [vmem:[%s7418_s7 + $0x38] sm:$0xff] }
 0x175   :  { %v956_v62 = vrot.slane %v955_v49, 2  ;;  %v6185_v26 = vadd.f32 %v916_v63, %v915_v51  ;;  %v6190_v18 = vadd.f32 %v930_v27, %v6138_v29  ;;  %v6192_v35 = vadd.f32 %v1669_v21, %v1668_v41  ;;  %v1144_v60 = vpop.permute.xlu1 %1143  ;;  %v1059_v33 = vld [vmem:[%s7412_s1 + $0x40] sm:$0xff] }
 0x176   :  { %v1646_v22 = vrot.slane %v1645_v8, 4  ;;  %v1657_v11 = vrot.slane %v1656_v34, 4  ;;  %v6194_v32 = vadd.f32 %v944_v46, %v943_v30  ;;  %v979_v20 = vrot.slane %v6111_v19, 2 }
 0x177   :  { %v957_v44 = vadd.f32 %v956_v62, %v955_v49  ;;  %v6197_v0 = vadd.f32 %v1678_v52, %v1677_v38  ;;  %v980_v51 = vrot.slane %v6111_v19, 3  ;;  %v1686_v47 = vrot.slane %v1685_v36, 1 }
 0x178   :  { %v1647_v37 = vadd.f32 %v1646_v22, %v1645_v8  ;;  %v1658_v28 = vadd.f32 %v1657_v11, %v1656_v34  ;;  %v1695_v42 = vrot.slane %v6183_v45, 1  ;;  %v981_v29 = vrot.slane %v6111_v19, 4  ;;  %v3449_v8 = vld [vmem:[%s7418_s7 + $0x20] sm:$0xff]  ;;  %v3451_v34 = vld [vmem:[%s7418_s7 + $0x30] sm:$0xff] }
 0x179   :  { %5284 = vrcp.f32 %v6111_v19  ;;  %v982_v30 = vrot.slane %v6111_v19, 5  ;;  %v983_v49 = vrot.slane %v6111_v19, 6  ;;  %v958_v41 = vrot.slane %v957_v44, 1  ;;  %v1148_v1 = vpop.permute.xlu1 %1147 }
 0x17a   :  { %v1648_v27 = vrot.slane %v1647_v37, 2  ;;  %5286 = vrcp.f32 %v978_v56  ;;  %v936_v38 = vadd.f32 %v935_v53, %v6123_v10  ;;  %v949_v55 = vrot.slane %v948_v31, 2 }
 0x17b   :  { %5288 = vrcp.f32 %v979_v20  ;;  %v1659_v61 = vrot.slane %v1658_v28, 2  ;;  %v984_v63 = vrot.slane %v6111_v19, 7  ;;  %v923_v56 = vrot.slane %v6136_v6, 1  ;;  %v3450_v19 = vld [vmem:[%s7418_s7 + $0x28] sm:$0xff] }
 0x17c   :  { %5290 = vrcp.f32 %v980_v51  ;;  %v6218_v21 = vadd.f32 %v1648_v27, %v1647_v37  ;;  %v950_v5 = vadd.f32 %v949_v55, %v948_v31  ;;  %v1263_v10 = vpack.c.bf16 %v1137_v23, %v6173_v9  ;;  %v1060_v23 = vld [vmem:[%s7412_s1 + $0x48] sm:$0x33] }
 0x17d   :  { %5292 = vrcp.f32 %v981_v29  ;;  %v6221_v53 = vadd.f32 %v1686_v47, %v1685_v36  ;;  %v937_v46 = vrot.slane %v936_v38, 1  ;;  %v4872_v58 = vpack.c.bf16 %v3447_v16, %v3445_v59 }
 0x17e   :  { %5294 = vrcp.f32 %v982_v30  ;;  %v6232_v31 = vadd.f32 %v958_v41, %v957_v44  ;;  %v951_v9 = vrot.slane %v950_v5, 1  ;;  %v1353_v52 = vrot.slane %v1263_v10, %v5823_v24 }
 0x17f   :  { %5296 = vrcp.f32 %v983_v49  ;;  %v6244_v36 = vadd.f32 %v1659_v61, %v1658_v28  ;;  %v924_v62 = vadd.f32 %v923_v56, %v6136_v6  ;;  %v1360_v22 = vrot.slane %v1263_v10, %v5826_v25  ;;  %4873 = vmatpush1.bf16.msra.mxu1 %v4872_v58  ;;  %v1061_v28 = vld [vmem:[%s7412_s1 + $0x50] sm:$0xff] }
 0x180   :  { %5298 = vrcp.f32 %v984_v63  ;;  %v1650_v11 = vrot.slane %v6218_v21, 1  ;;  %v6249_v44 = vmul.bf16 %v1353_v52, %v1059_v33  ;;  %v6251_v20 = vpack.c.bf16 %v1148_v1, %v1144_v60 }
 0x181   :  { %v4874_v37 = vpack.c.bf16 %v3452_v12, %v3450_v19  ;;  %v938_v51 = vadd.f32 %v937_v46, %v936_v38  ;;  %v952_v47 = vadd.f32 %v951_v9, %v950_v5  ;;  %v1556_v29 = vmul.bf16 %v1360_v22, %v1060_v23 }
 0x182   :  { %v4876_v27 = vpack.c.bf16 %v3451_v34, %v3449_v8  ;;  %v1595_v6 = vunpack.c.l.bf16 %v6249_v44  ;;  %v1596_v49 = vunpack.c.h.bf16 %v6249_v44  ;;  %v1367_v41 = vrot.slane %v6251_v20, %v5823_v24 }
 0x183   :  { %v5285_v30 = vpop.eup %5284  ;;  %v1374_v60 = vrot.slane %v6251_v20, %v5826_v25  ;;  %4875 = vmatprep.subr.bf16.mxu1 %v4874_v37  ;;  %v1597_v16 = vunpack.c.l.bf16 %v1556_v29  ;;  %v1598_v61 = vunpack.c.h.bf16 %v1556_v29 }
 0x184   :  { %v5287_v38 = vpop.eup %5286  ;;  %v1027_v55 = vmul.f32 %v5285_v30, %v6022_v39  ;;  %v1026_v59 = vmul.f32 %v5285_v30, %v6020_v7  ;;  %4877 = vmatpush1.bf16.msra.mxu1 %v4876_v27  ;;  %v1722_v10 = vsel %vm1652_vm10, %v1596_v49, 0.0  ;;  %v6267_v46 = vmul.bf16 %v1367_v41, %v1061_v28  ;;  %v6279_v28 = vpop.xlane.xlu0 %1920 }
 0x185   :  { %v5289_v63 = vpop.eup %5288  ;;  %v1030_v56 = vmul.f32 %v5287_v38, %v5992_v15  ;;  %v1029_v5 = vmul.f32 %v5287_v38, %v5986_v13  ;;  %v1714_v39 = vsel %vm1643_vm11, %v1597_v16, 0.0  ;;  %v1723_v7 = vsel %vm1654_vm12, %v1598_v61, 0.0  ;;  %7466 = vst [vmem:[#allocation26_spill] sm:$0xff] %v6279_v28 }
 0x186   :  { %v5291_v33 = vpop.eup %5290  ;;  %v1033_v58 = vmul.f32 %v5289_v63, %v6004_v43  ;;  %v1032_v1 = vmul.f32 %v5289_v63, %v5994_v48  ;;  %v1600_v20 = vunpack.c.h.bf16 %v6267_v46 }
 0x187   :  { %v5293_v19 = vpop.eup %5292  ;;  %v1036_v12 = vmul.f32 %v5291_v33, %v6120_v40  ;;  %v3171_v9 = vrot.slane %v1030_v56, 7  ;;  %v1035_v15 = vmul.f32 %v5291_v33, %v6116_v17  ;;  %v3157_v13 = vrot.slane %v1029_v5, 7 }
 0x188   :  { %v5295_v23 = vpop.eup %5294  ;;  %v1039_v52 = vmul.f32 %v5293_v19, %v6185_v26  ;;  %v3173_v8 = vrot.slane %v1033_v58, 6  ;;  %v1038_v34 = vmul.f32 %v5293_v19, %v6181_v14  ;;  %v3159_v43 = vrot.slane %v1032_v1, 6 }
 0x189   :  { %v5297_v22 = vpop.eup %5296  ;;  %v1042_v48 = vmul.f32 %v5295_v23, %v6190_v18  ;;  %v3172_v44 = vsel %vm3123_vm3, %v3171_v9, %v1027_v55  ;;  %v3175_v37 = vrot.slane %v1036_v12, 5  ;;  %v1041_v29 = vmul.f32 %v5295_v23, %v924_v62  ;;  %v3454_v12 = vld [vmem:[%s7418_s7 + $0x48] sm:$0xff]  ;;  %v1122_v9 = vpop.permute.xlu0 %1121 }
 0x18a   :  { %v5299_v40 = vpop.eup %5298  ;;  %v1045_v17 = vmul.f32 %v5297_v22, %v6194_v32  ;;  %v3174_v27 = vsel %vm3126_vm4, %v3173_v8, %v3172_v44  ;;  %v3177_v30 = vrot.slane %v1039_v52, 4  ;;  %v1044_v26 = vmul.f32 %v5297_v22, %v938_v51  ;;  %v3456_v8 = vld [vmem:[%s7418_s7 + $0x58] sm:$0xff] }
 0x18b   :  { %v1048_v49 = vmul.f32 %v5299_v40, %v6232_v31  ;;  %v3176_v14 = vsel %vm3129_vm5, %v3175_v37, %v3174_v27  ;;  %v3179_v41 = vrot.slane %v1042_v48, 3  ;;  %v1047_v38 = vmul.f32 %v5299_v40, %v952_v47  ;;  %v1062_v31 = vld [vmem:[%s7412_s1 + $0x58] sm:$0x33]  ;;  %v3458_v37 = vld [vmem:[%s7418_s7 + $0x68] sm:$0xff] }
 0x18c   :  { %v3178_v18 = vsel %vm3132_vm6, %v3177_v30, %v3176_v14  ;;  %v3181_v55 = vrot.slane %v1045_v17, 2  ;;  %v3158_v62 = vsel %vm3123_vm3, %v3157_v13, %v1026_v59  ;;  %v3161_v16 = vrot.slane %v1035_v15, 5  ;;  %v3460_v27 = vld [vmem:[%s7418_s7 + $0x78] sm:$0xff]  ;;  %v3457_v30 = vld [vmem:[%s7418_s7 + $0x60] sm:$0xff] }
 0x18d   :  { %v3180_v61 = vsel %vm3135_vm7, %v3179_v41, %v3178_v18  ;;  %v3183_v63 = vrot.slane %v1048_v49, 1  ;;  %v3160_v32 = vsel %vm3126_vm4, %v3159_v43, %v3158_v62  ;;  %v3163_v56 = vrot.slane %v1038_v34, 4 }
 0x18e   :  { %v3182_v51 = vsel %vm3138_vm8, %v3181_v55, %v3180_v61  ;;  %v3162_v47 = vsel %vm3129_vm5, %v3161_v16, %v3160_v32  ;;  %v3165_v5 = vrot.slane %v1041_v29, 3  ;;  %v3167_v33 = vrot.slane %v1044_v26, 2  ;;  %v3459_v26 = vld [vmem:[%s7418_s7 + $0x70] sm:$0xff]  ;;  %v1155_v61 = vpop.permute.xlu0 %1154 }
 0x18f   :  { %v3184_v58 = vsel %vm3141_vm9, %v3183_v63, %v3182_v51  ;;  %v3164_v59 = vsel %vm3132_vm6, %v3163_v56, %v3162_v47  ;;  %v3169_v1 = vrot.slane %v1047_v38, 1  ;;  %v1715_v19 = vadd.f32 %v1714_v39, %v1595_v6  ;;  %v3453_v6 = vld [vmem:[%s7418_s7 + $0x40] sm:$0xff]  ;;  %v3455_v39 = vld [vmem:[%s7418_s7 + $0x50] sm:$0xff] }
 0x190   :  { %3426 = vmatprep.mubr.f32.mxu1 %v3184_v58  ;;  %v3166_v15 = vsel %vm3135_vm7, %v3165_v5, %v3164_v59  ;;  %v1724_v13 = vadd.f32 %v1723_v7, %v1722_v10  ;;  %v1558_v23 = vmul.bf16 %v1374_v60, %v1062_v31  ;;  %v1599_v52 = vunpack.c.l.bf16 %v6267_v46  ;;  %v6318_v60 = vld [vmem:[%s7416_s5] sm:$0xff]  ;;  %v1058_v5 = vld [vmem:[%s7412_s1 + $0x38] sm:$0x33]  ;;  %v5397_v59 = vld [vmem:[%s7415_s4 + $0x8] sm:$0xff] }
 0x191   :  { %v3168_v10 = vsel %vm3138_vm8, %v3167_v33, %v3166_v15  ;;  %v1716_v7 = vrot.slane %v1715_v19, 4  ;;  %v6322_v34 = vrot.slane %v6318_v60, %v5741_v3  ;;  %v1739_v29 = vsel %vm1652_vm10, %v1600_v20, 0.0 }
 0x192   :  { %v3170_v43 = vsel %vm3141_vm9, %v3169_v1, %v3168_v10  ;;  %v1725_v22 = vrot.slane %v1724_v13, 4  ;;  %v1601_v48 = vunpack.c.l.bf16 %v1558_v23  ;;  %v1602_v44 = vunpack.c.h.bf16 %v1558_v23  ;;  %v7467_v1 = vld [vmem:[#allocation23_spill] sm:$0xff] }
 0x193   :  { %3427 = vmatmul.mubr.f32.gmra.mrb[2].mxu1 %v3170_v43  ;;  %v1717_v46 = vadd.f32 %v1716_v7, %v1715_v19  ;;  %2092 = vbcast.lane.b32.xlu1 %v6322_v34, 256  ;;  %v4878_v40 = vpack.c.bf16 %v3456_v8, %v3454_v12  ;;  %v4880_v17 = vpack.c.bf16 %v3455_v39, %v3453_v6  ;;  %v1661_v14 = vrot.slane %v6244_v36, 1  ;;  %v1064_v8 = vld [vmem:[%s7412_s1 + $0x68] sm:$0x33] }
 0x194   :  { %v6342_v49 = vadd.f32 %v1695_v42, %v6183_v45  ;;  %v1731_v41 = vsel %vm1643_vm11, %v1601_v48, 0.0  ;;  %v1740_v38 = vsel %vm1654_vm12, %v1602_v44, 0.0  ;;  %v1726_v18 = vadd.f32 %v1725_v22, %v1724_v13  ;;  %v1057_v42 = vld [vmem:[%s7412_s1 + $0x30] sm:$0xff]  ;;  %v3462_v22 = vld [vmem:[%s7418_s7 + $0x88] sm:$0xff]  ;;  %v3464_v48 = vld [vmem:[%s7418_s7 + $0x98] sm:$0xff] }
 0x195   :  { %v1732_v55 = vadd.f32 %v1731_v41, %v1599_v52  ;;  %v1741_v62 = vadd.f32 %v1740_v38, %v1739_v29  ;;  %4879 = vmatprep.subr.bf16.mxu1 %v4878_v40  ;;  %v1262_v16 = vpack.c.bf16 %v6158_v50, %v1122_v9  ;;  %v6351_v63 = vadd.f32 %v1650_v11, %v6218_v21  ;;  %v1159_v50 = vpop.permute.xlu1 %1158  ;;  %v1063_v52 = vld [vmem:[%s7412_s1 + $0x60] sm:$0xff]  ;;  %v3463_v38 = vld [vmem:[%s7418_s7 + $0x90] sm:$0xff] }
 0x196   :  { %v6354_v45 = vmax.f32 %v6279_v28, 1.0  ;;  %4881 = vmatpush1.bf16.msra.mxu1 %v4880_v17  ;;  %v4882_v32 = vpack.c.bf16 %v3460_v27, %v3458_v37  ;;  %v4884_v56 = vpack.c.bf16 %v3459_v26, %v3457_v30  ;;  %v1718_v31 = vrot.slane %v1717_v46, 2  ;;  %v3461_v41 = vld [vmem:[%s7418_s7 + $0x80] sm:$0xff] }
 0x197   :  { %v1733_v51 = vrot.slane %v1732_v55, 4  ;;  %v1742_v47 = vrot.slane %v1741_v62, 4  ;;  %v1339_v21 = vrot.slane %v1262_v16, %v5823_v24  ;;  %2096 = vbcast.lane.b32.xlu1 %v6322_v34, 264  ;;  %v1346_v33 = vrot.slane %v1262_v16, %v5826_v25 }
 0x198   :  { %v1931_v11 = vrot.slane %v6354_v45, 3  ;;  %4883 = vmatprep.subr.bf16.mxu1 %v4882_v32  ;;  %v1265_v58 = vpack.c.bf16 %v1159_v50, %v1155_v61  ;;  %v1251_v19 = vrot.slane %v5397_v59, %v7467_v1  ;;  %v1727_v12 = vrot.slane %v1726_v18, 2  ;;  %v1166_v61 = vpop.permute.xlu0 %1165 }
 0x199   :  { %v1734_v9 = vadd.f32 %v1733_v51, %v1732_v55  ;;  %v1743_v15 = vadd.f32 %v1742_v47, %v1741_v62  ;;  %v1553_v13 = vmul.bf16 %v1339_v21, %v1057_v42  ;;  %v1554_v23 = vmul.bf16 %v1346_v33, %v1058_v5  ;;  %v1170_v5 = vpop.permute.xlu1 %1169 }
 0x19a   :  { %4885 = vmatpush1.bf16.msra.mxu1 %v4884_v56  ;;  %v1381_v6 = vrot.slane %v1265_v58, %v5823_v24  ;;  %v1388_v39 = vrot.slane %v1265_v58, %v5826_v25  ;;  %1253 = vbcast.lane.b32.xlu0 %v1251_v19, 256  ;;  %v6379_v10 = vadd.f32 %v1661_v14, %v6244_v36  ;;  %5300 = vrcp.f32 %v1931_v11  ;;  %v3468_v11 = vld [vmem:[%s7418_s7 + $0xb8] sm:$0xff] }
 0x19b   :  { %v6381_v7 = vadd.f32 %v1718_v31, %v1717_v46  ;;  %v1735_v20 = vrot.slane %v1734_v9, 2  ;;  %v1591_v43 = vunpack.c.l.bf16 %v1553_v13  ;;  %1257 = vbcast.lane.b32.xlu1 %v1251_v19, 264  ;;  %v1592_v44 = vunpack.c.h.bf16 %v1553_v13  ;;  %v1065_v19 = vld [vmem:[%s7412_s1 + $0x70] sm:$0xff] }
 0x19c   :  { %v1593_v37 = vunpack.c.l.bf16 %v1554_v23  ;;  %v1594_v29 = vunpack.c.h.bf16 %v1554_v23  ;;  %v6389_v40 = vadd.f32 %v1727_v12, %v1726_v18  ;;  %v1744_v36 = vrot.slane %v1743_v15, 2 }
 0x19d   :  { %v1559_v46 = vmul.bf16 %v1381_v6, %v1063_v52  ;;  %v1560_v17 = vmul.bf16 %v1388_v39, %v1064_v8  ;;  %v1705_v30 = vsel %vm1652_vm10, %v1592_v44, 0.0  ;;  %v4886_v14 = vpack.c.bf16 %v3464_v48, %v3462_v22  ;;  %v1066_v52 = vld [vmem:[%s7412_s1 + $0x78] sm:$0x33]  ;;  %v3465_v8 = vld [vmem:[%s7418_s7 + $0xa0] sm:$0xff]  ;;  %v3467_v6 = vld [vmem:[%s7418_s7 + $0xb0] sm:$0xff] }
 0x19e   :  { %v1697_v27 = vsel %vm1643_vm11, %v1593_v37, 0.0  ;;  %v1706_v26 = vsel %vm1654_vm12, %v1594_v29, 0.0  ;;  %2100 = vbcast.lane.b32.xlu0 %v6322_v34, 272  ;;  %v1720_v18 = vrot.slane %v6381_v7, 1  ;;  %v6402_v55 = vadd.f32 %v1735_v20, %v1734_v9  ;;  %v3466_v34 = vld [vmem:[%s7418_s7 + $0xa8] sm:$0xff] }
 0x19f   :  { %v1698_v62 = vadd.f32 %v1697_v27, %v1591_v43  ;;  %v1707_v16 = vadd.f32 %v1706_v26, %v1705_v30  ;;  %v1603_v42 = vunpack.c.l.bf16 %v1559_v46  ;;  %v1604_v32 = vunpack.c.h.bf16 %v1559_v46  ;;  %4887 = vmatprep.subr.bf16.mxu1 %v4886_v14  ;;  %v7468_v43 = vld [vmem:[#allocation19_spill] sm:$0xff] }
 0x1a0   :  { %v1605_v56 = vunpack.c.l.bf16 %v1560_v17  ;;  %v1606_v31 = vunpack.c.h.bf16 %v1560_v17  ;;  %v6404_v51 = vadd.f32 %v1744_v36, %v1743_v15  ;;  %v4888_v21 = vpack.c.bf16 %v3463_v38, %v3461_v41 }
 0x1a1   :  { %v1699_v47 = vrot.slane %v1698_v62, 4  ;;  %v1708_v50 = vrot.slane %v1707_v16, 4  ;;  %v1756_v58 = vsel %vm1652_vm10, %v1604_v32, 0.0  ;;  %v1266_v12 = vpack.c.bf16 %v1170_v5, %v1166_v61  ;;  %v3472_v61 = vld [vmem:[%s7418_s7 + $0xd8] sm:$0xff] }
 0x1a2   :  { %v1748_v33 = vsel %vm1643_vm11, %v1605_v56, 0.0  ;;  %v1757_v59 = vsel %vm1654_vm12, %v1606_v31, 0.0  ;;  %4889 = vmatpush1.bf16.msra.mxu1 %v4888_v21  ;;  %v6431_v22 = vrot.slane %v6318_v60, %v7468_v43  ;;  %v4890_v48 = vpack.c.bf16 %v3468_v11, %v3466_v34 }
 0x1a3   :  { %v1700_v9 = vadd.f32 %v1699_v47, %v1698_v62  ;;  %v1709_v15 = vadd.f32 %v1708_v50, %v1707_v16  ;;  %v1749_v13 = vadd.f32 %v1748_v33, %v1603_v42  ;;  %v1758_v23 = vadd.f32 %v1757_v59, %v1756_v58  ;;  %v3470_v16 = vld [vmem:[%s7418_s7 + $0xc8] sm:$0xff]  ;;  %v3469_v47 = vld [vmem:[%s7418_s7 + $0xc0] sm:$0xff]  ;;  %v3471_v50 = vld [vmem:[%s7418_s7 + $0xd0] sm:$0xff] }
 0x1a4   :  { %v1395_v39 = vrot.slane %v1266_v12, %v5823_v24  ;;  %v1402_v20 = vrot.slane %v1266_v12, %v5826_v25  ;;  %v6433_v46 = vpop.eup %5300  ;;  %v1729_v17 = vrot.slane %v6389_v40, 1  ;;  %2062 = vbcast.lane.b32.xlu1 %v6431_v22, 256  ;;  %4891 = vmatprep.subr.bf16.mxu1 %v4890_v48  ;;  %v4892_v26 = vpack.c.bf16 %v3467_v6, %v3465_v8  ;;  %v3474_v33 = vld [vmem:[%s7418_s7 + $0xe8] sm:$0xff]  ;;  %v3476_v58 = vld [vmem:[%s7418_s7 + $0xf8] sm:$0xff]  ;;  %v3473_v59 = vld [vmem:[%s7418_s7 + $0xe0] sm:$0xff] }
 0x1a5   :  { %v1701_v44 = vrot.slane %v1700_v9, 2  ;;  %v1710_v37 = vrot.slane %v1709_v15, 2  ;;  %v1750_v29 = vrot.slane %v1749_v13, 4  ;;  %v1759_v36 = vrot.slane %v1758_v23, 4  ;;  %v3475_v8 = vld [vmem:[%s7418_s7 + $0xf0] sm:$0xff]  ;;  %v3478_v6 = vld [vmem:[%s7418_s7 + $0x108] sm:$0xff] }
 0x1a6   :  { %v1561_v27 = vmul.bf16 %v1395_v39, %v1065_v19  ;;  %v1562_v30 = vmul.bf16 %v1402_v20, %v1066_v52  ;;  %4893 = vmatpush1.bf16.msra.mxu1 %v4892_v26  ;;  %v6450_v5 = vadd.f32 %v1720_v18, %v6381_v7  ;;  %v1737_v21 = vrot.slane %v6402_v55, 1  ;;  %v3480_v39 = vld [vmem:[%s7418_s7 + $0x118] sm:$0xff]  ;;  %v3482_v26 = vld [vmem:[%s7418_s7 + $0x128] sm:$0xff] }
 0x1a7   :  { %v1702_v14 = vadd.f32 %v1701_v44, %v1700_v9  ;;  %v1711_v41 = vadd.f32 %v1710_v37, %v1709_v15  ;;  %v1751_v38 = vadd.f32 %v1750_v29, %v1749_v13  ;;  %v1760_v62 = vadd.f32 %v1759_v36, %v1758_v23  ;;  %v6466_v9 = vld [vmem:[#allocation2] sm:$0x11]  ;;  %v3479_v29 = vld [vmem:[%s7418_s7 + $0x110] sm:$0xff] }
 0x1a8   :  { %v1607_v42 = vunpack.c.l.bf16 %v1561_v27  ;;  %v1608_v32 = vunpack.c.h.bf16 %v1561_v27  ;;  %v1609_v56 = vunpack.c.l.bf16 %v1562_v30  ;;  %v1610_v31 = vunpack.c.h.bf16 %v1562_v30  ;;  %2066 = vbcast.lane.b32.xlu1 %v6431_v22, 264  ;;  %v3477_v37 = vld [vmem:[%s7418_s7 + $0x100] sm:$0xff]  ;;  %v6487_v36 = vld [vmem:[#allocation2 + $0x10] sm:$0x11] }
 0x1a9   :  { %v1703_v34 = vrot.slane %v1702_v14, 1  ;;  %v1712_v11 = vrot.slane %v1711_v41, 1  ;;  %v4894_v12 = vpack.c.bf16 %v3472_v61, %v3470_v16  ;;  %v6469_v15 = vadd.f32 %v1729_v17, %v6389_v40  ;;  %v3484_v16 = vld [vmem:[%s7418_s7 + $0x138] sm:$0xff]  ;;  %v6502_v61 = vld [vmem:[#allocation2 + $0x20] sm:$0x11] }
 0x1aa   :  { %v1765_v19 = vsel %vm1643_vm11, %v1609_v56, 0.0  ;;  %v1773_v7 = vsel %vm1652_vm10, %v1608_v32, 0.0  ;;  %v1774_v18 = vsel %vm1654_vm12, %v1610_v31, 0.0  ;;  %v1752_v23 = vrot.slane %v1751_v38, 2  ;;  %v6506_v32 = vld [vmem:[#allocation2 + $0x40] sm:$0x11] }
 0x1ab   :  { %v1761_v52 = vrot.slane %v1760_v62, 2  ;;  %v1766_v20 = vadd.f32 %v1765_v19, %v1607_v42  ;;  %v1775_v48 = vadd.f32 %v1774_v18, %v1773_v7  ;;  %4895 = vmatprep.subr.bf16.mxu1 %v4894_v12  ;;  %v4896_v40 = vpack.c.bf16 %v3471_v50, %v3469_v47  ;;  %v6504_v42 = vld [vmem:[#allocation2 + $0x30] sm:$0x11]  ;;  %v7470_v31 = vld [vmem:[#allocation20_spill] sm:$0xff]  ;;  %v6515_v50 = vld [vmem:[%s7418_s7 + $0x120] sm:$0xff] }
 0x1ac   :  { %v4898_v44 = vpack.c.bf16 %v3476_v58, %v3474_v33  ;;  %v6490_v17 = vadd.f32 %v1737_v21, %v6402_v55  ;;  %v6492_v27 = vadd.f32 %v1703_v34, %v1702_v14  ;;  %v6494_v30 = vadd.f32 %v1712_v11, %v1711_v41  ;;  %2085 = vbcast.lane.b32.xlu1 %v6044_v54, 272  ;;  %v3047_v21 = vld [vmem:[#allocation2 + $0x50] sm:$0x11]  ;;  %v7471_v58 = vld [vmem:[#allocation21_spill] sm:$0xff] }
 0x1ad   :  { %v3059_v55 = vunpack.c.h.bf16 %v6466_v9  ;;  %v1767_v14 = vrot.slane %v1766_v20, 4  ;;  %v1776_v56 = vrot.slane %v1775_v48, 4  ;;  %4897 = vmatpush1.bf16.msra.mxu1 %v4896_v40  ;;  %v4900_v41 = vpack.c.bf16 %v3475_v8, %v3473_v59  ;;  %v3483_v54 = vld [vmem:[%s7418_s7 + $0x130] sm:$0xff]  ;;  %v3048_v59 = vld [vmem:[#allocation2 + $0x60] sm:$0x11] }
 0x1ae   :  { %7469 = vst [vmem:[#allocation23_spill] sm:$0xff] %v6490_v17  ;;  %v2105_v47 = vrot.slane %v6318_v60, %v7470_v31  ;;  %v6517_v34 = vadd.f32 %v1752_v23, %v1751_v38  ;;  %v6519_v11 = vadd.f32 %v1761_v52, %v1760_v62  ;;  %4899 = vmatprep.subr.bf16.mxu1 %v4898_v44  ;;  %v3049_v7 = vld [vmem:[#allocation2 + $0x70] sm:$0x11]  ;;  %v3061_v62 = vunpack.c.h.bf16 %v6487_v36 }
 0x1af   :  { %v4902_v33 = vpack.c.bf16 %v3480_v39, %v3478_v6  ;;  %v6523_v19 = vrot.slane %v6318_v60, %v7471_v58  ;;  %v6528_v18 = vadd.f32 %v1767_v14, %v1766_v20  ;;  %v6530_v12 = vadd.f32 %v1776_v56, %v1775_v48 }
 0x1b0   :  { %v4904_v38 = vpack.c.bf16 %v3479_v29, %v3477_v37  ;;  %v3063_v23 = vunpack.c.h.bf16 %v6502_v61  ;;  %v3065_v52 = vunpack.c.h.bf16 %v6504_v42  ;;  %v3067_v8 = vunpack.c.h.bf16 %v6506_v32  ;;  %2107 = vbcast.lane.b32.xlu1 %v2105_v47, 256 }
 0x1b1   :  { %2126 = vbcast.lane.b32.xlu0 %v6523_v19, 264  ;;  %v3069_v6 = vunpack.c.h.bf16 %v3047_v21  ;;  %4901 = vmatpush1.bf16.msra.mxu1 %v4900_v41  ;;  %v4906_v39 = vpack.c.bf16 %v3484_v16, %v3482_v26  ;;  %v4908_v20 = vpack.c.bf16 %v3483_v54, %v6515_v50  ;;  %v3071_v40 = vunpack.c.h.bf16 %v3048_v59 }
 0x1b2   :  { %v3073_v48 = vunpack.c.h.bf16 %v3049_v7  ;;  %v1769_v44 = vrot.slane %v6528_v18, 2  ;;  %4903 = vmatprep.subr.bf16.mxu1 %v4902_v33  ;;  %v3235_v37 = vrot.slane %v3061_v62, 7  ;;  %v3237_v29 = vrot.slane %v3063_v23, 6  ;;  %v3486_v23 = vld [vmem:[%s7418_s7 + $0x148] sm:$0xff] }
 0x1b3   :  { %v3239_v14 = vrot.slane %v3065_v52, 5  ;;  %v3241_v13 = vrot.slane %v3067_v8, 4  ;;  %v3243_v28 = vrot.slane %v3069_v6, 3  ;;  %v3245_v4 = vrot.slane %v3071_v40, 2 }
 0x1b4   :  { %v3236_v41 = vsel %vm3123_vm3, %v3235_v37, %v3059_v55  ;;  %v3247_v17 = vrot.slane %v3073_v48, 1  ;;  %v3060_v26 = vunpack.c.l.bf16 %v6487_v36  ;;  %v3062_v16 = vunpack.c.l.bf16 %v6502_v61  ;;  %2111 = vbcast.lane.b32.xlu1 %v2105_v47, 264  ;;  %v3488_v36 = vld [vmem:[%s7418_s7 + $0x158] sm:$0xff] }
 0x1b5   :  { %2115 = vbcast.lane.b32.xlu0 %v2105_v47, 272  ;;  %4905 = vmatpush1.bf16.msra.mxu1 %v4904_v38  ;;  %v3238_v50 = vsel %vm3126_vm4, %v3237_v29, %v3236_v41  ;;  %v3058_v33 = vunpack.c.l.bf16 %v6466_v9  ;;  %v3064_v54 = vunpack.c.l.bf16 %v6504_v42  ;;  %v3066_v62 = vunpack.c.l.bf16 %v6506_v32  ;;  %v3485_v9 = vld [vmem:[%s7418_s7 + $0x140] sm:$0xff]  ;;  %v6559_v32 = vld [vmem:[#allocation2 + $0x90] sm:$0x11] }
 0x1b6   :  { %4907 = vmatprep.subr.bf16.mxu1 %v4906_v39  ;;  %v3240_v61 = vsel %vm3129_vm5, %v3239_v14, %v3238_v50  ;;  %v3068_v55 = vunpack.c.l.bf16 %v3047_v21  ;;  %v3070_v47 = vunpack.c.l.bf16 %v3048_v59  ;;  %v3072_v38 = vunpack.c.l.bf16 %v3049_v7  ;;  %v6557_v42 = vld [vmem:[#allocation2 + $0x80] sm:$0x11]  ;;  %v3487_v39 = vld [vmem:[%s7418_s7 + $0x150] sm:$0xff] }
 0x1b7   :  { %v3242_v52 = vsel %vm3132_vm6, %v3241_v13, %v3240_v61  ;;  %v3221_v8 = vrot.slane %v3060_v26, 7  ;;  %v3223_v6 = vrot.slane %v3062_v16, 6  ;;  %v3225_v40 = vrot.slane %v3064_v54, 5  ;;  %v6565_v21 = vld [vmem:[#allocation2 + $0xa0] sm:$0x11]  ;;  %v6575_v54 = vpop.xlane.xlu0 %1923 }
 0x1b8   :  { %v3244_v59 = vsel %vm3135_vm7, %v3243_v28, %v3242_v52  ;;  %v3227_v7 = vrot.slane %v3066_v62, 4  ;;  %v3229_v48 = vrot.slane %v3068_v55, 3  ;;  %v3231_v37 = vrot.slane %v3070_v47, 2  ;;  %v3053_v29 = vld [vmem:[#allocation2 + $0xb0] sm:$0x11]  ;;  %2122 = vbcast.lane.b32.xlu1 %v6523_v19, 256 }
 0x1b9   :  { %4909 = vmatpush1.bf16.msra.mxu1 %v4908_v20  ;;  %v3246_v13 = vsel %vm3138_vm8, %v3245_v4, %v3244_v59  ;;  %v3222_v14 = vsel %vm3123_vm3, %v3221_v8, %v3058_v33  ;;  %v3233_v41 = vrot.slane %v3072_v38, 1  ;;  %v4910_v26 = vpack.c.bf16 %v3488_v36, %v3486_v23  ;;  %v6571_v16 = vld [vmem:[#allocation2 + $0xc0] sm:$0x11]  ;;  %v6573_v50 = vld [vmem:[#allocation2 + $0xd0] sm:$0x11]  ;;  %7472 = vst [vmem:[#allocation20_spill] sm:$0xff] %v6575_v54 }
 0x1ba   :  { %v3248_v28 = vsel %vm3141_vm9, %v3247_v17, %v3246_v13  ;;  %v3224_v62 = vsel %vm3126_vm4, %v3223_v6, %v3222_v14  ;;  %v4912_v61 = vpack.c.bf16 %v3487_v39, %v3485_v9  ;;  %v7473_v20 = vld [vmem:[#allocation22_spill] sm:$0xff]  ;;  %v6583_v4 = vld [vmem:[#allocation2 + $0xe0] sm:$0x11]  ;;  %v6585_v33 = vld [vmem:[#allocation2 + $0xf0] sm:$0x11]  ;;  %v3075_v36 = vunpack.c.h.bf16 %v6557_v42 }
 0x1bb   :  { %v6581_v55 = vrot.slane %v6318_v60, %v7473_v20  ;;  %3432 = vmatprep.mubr.f32.mxu1 %v3248_v28  ;;  %v3226_v23 = vsel %vm3129_vm5, %v3225_v40, %v3224_v62  ;;  %4911 = vmatprep.subr.bf16.mxu1 %v4910_v26  ;;  %v3077_v47 = vunpack.c.h.bf16 %v6559_v32  ;;  %v3079_v17 = vunpack.c.h.bf16 %v6565_v21 }
 0x1bc   :  { %v3228_v38 = vsel %vm3132_vm6, %v3227_v7, %v3226_v23  ;;  %v3081_v9 = vunpack.c.h.bf16 %v3053_v29  ;;  %v3083_v52 = vunpack.c.h.bf16 %v6571_v16  ;;  %v3085_v8 = vunpack.c.h.bf16 %v6573_v50  ;;  %2070 = vbcast.lane.b32.xlu1 %v6431_v22, 272 }
 0x1bd   :  { %2141 = vbcast.lane.b32.xlu0 %v6581_v55, 264  ;;  %v3230_v6 = vsel %vm3135_vm7, %v3229_v48, %v3228_v38  ;;  %4913 = vmatpush1.bf16.msra.mxu1 %v4912_v61  ;;  %v3087_v40 = vunpack.c.h.bf16 %v6583_v4  ;;  %v3089_v39 = vunpack.c.h.bf16 %v6585_v33  ;;  %v3263_v59 = vrot.slane %v3077_v47, 7  ;;  %v6602_v48 = vpop.permute.xlu0 %1187 }
 0x1be   :  { %v3232_v13 = vsel %vm3138_vm8, %v3231_v37, %v3230_v6  ;;  %v3265_v7 = vrot.slane %v3079_v17, 6  ;;  %v3267_v14 = vrot.slane %v3081_v9, 5  ;;  %v3269_v26 = vrot.slane %v3083_v52, 4 }
 0x1bf   :  { %v3234_v28 = vsel %vm3141_vm9, %v3233_v41, %v3232_v13  ;;  %v3264_v62 = vsel %vm3123_vm3, %v3263_v59, %v3075_v36  ;;  %v3271_v23 = vrot.slane %v3085_v8, 3  ;;  %v3273_v56 = vrot.slane %v3087_v40, 2 }
 0x1c0   :  { %v6604_v61 = vpop.xlane.xlu1 %2971  ;;  %3433 = vmatmul.mubr.f32.gmra.mrb[4].mxu1 %v3234_v28  ;;  %v3266_v22 = vsel %vm3126_vm4, %v3265_v7, %v3264_v62  ;;  %v3275_v38 = vrot.slane %v3089_v39, 1  ;;  %v3074_v47 = vunpack.c.l.bf16 %v6557_v42  ;;  %v3076_v37 = vunpack.c.l.bf16 %v6559_v32  ;;  %2137 = vbcast.lane.b32.xlu1 %v6581_v55, 256  ;;  %v3490_v42 = vld [vmem:[%s7418_s7 + $0x168] sm:$0xff]  ;;  %v3492_v32 = vld [vmem:[%s7418_s7 + $0x178] sm:$0xff] }
 0x1c1   :  { %7474 = vst [vmem:[#allocation21_spill] sm:$0xff] %v6604_v61  ;;  %v3268_v17 = vsel %vm3129_vm5, %v3267_v14, %v3266_v22  ;;  %v3078_v41 = vunpack.c.l.bf16 %v6565_v21  ;;  %v3080_v9 = vunpack.c.l.bf16 %v3053_v29  ;;  %v3082_v36 = vunpack.c.l.bf16 %v6571_v16  ;;  %v1199_v22 = vpop.permute.xlu0 %1198 }
 0x1c2   :  { %v3270_v52 = vsel %vm3132_vm6, %v3269_v26, %v3268_v17  ;;  %v3084_v8 = vunpack.c.l.bf16 %v6573_v50  ;;  %v3086_v6 = vunpack.c.l.bf16 %v6583_v4  ;;  %v3088_v40 = vunpack.c.l.bf16 %v6585_v33  ;;  %v3489_v50 = vld [vmem:[%s7418_s7 + $0x160] sm:$0xff]  ;;  %v3491_v4 = vld [vmem:[%s7418_s7 + $0x170] sm:$0xff]  ;;  %s5580_s7 = smov [#allocation13]  }
 0x1c3   :  { %v3272_v21 = vsel %vm3135_vm7, %v3271_v23, %v3270_v52  ;;  %v3249_v29 = vrot.slane %v3076_v37, 7  ;;  %v3251_v16 = vrot.slane %v3078_v41, 6  ;;  %v3253_v39 = vrot.slane %v3080_v9, 5  ;;  %v6644_v41 = vld [vmem:[%s7416_s5 + $0x8] sm:$0xff]  ;;  %s4727_s28 = sshll.u32 %s5580_s7, 4  ;;  %s4728_s28 = int_to_ptr.vmem [resolvable:$true] %s4727_s28 }
 0x1c4   :  { %v1192_v33 = vpop.permute.xlu1 %1191  ;;  %v6632_v59 = vmul.f32 %v6433_v46, %v6492_v27  ;;  %v1770_v13 = vadd.f32 %v1769_v44, %v6528_v18  ;;  %v3274_v7 = vsel %vm3138_vm8, %v3273_v56, %v3272_v21  ;;  %v3255_v14 = vrot.slane %v3082_v36, 4  ;;  %s5531_s5 = scalar_lea.vmem %s4728_s28, 256  ;;  %p5536_p7 = scmp.lt.s32.totalorder %s4728_s28, %s4728_s28 }
 0x1c5   :  { %v3276_v26 = vsel %vm3141_vm9, %v3275_v38, %v3274_v7  ;;  %v3250_v28 = vsel %vm3123_vm3, %v3249_v29, %v3074_v47  ;;  %v3257_v62 = vrot.slane %v3084_v8, 3  ;;  %v4914_v23 = vpack.c.bf16 %v3492_v32, %v3490_v42  ;;  %p5532_p6 = scmp.ne.s32.totalorder %s4728_s28, %s5531_s5  ;;  %p5537_p8 = scmp.lt.s32.totalorder %s5531_s5, %s5531_s5 }
 0x1c6   :  { %3438 = vmatprep.mubr.f32.mxu1 %v3276_v26  ;;  %v3252_v37 = vsel %vm3126_vm4, %v3251_v16, %v3250_v28  ;;  %v3259_v17 = vrot.slane %v3086_v6, 2  ;;  %v4916_v27 = vpack.c.bf16 %v3491_v4, %v3489_v50  ;;  %v6648_v18 = vrot.slane %v6644_v41, %v5738_v2 }
 0x1c7   :  { %v3254_v44 = vsel %vm3129_vm5, %v3253_v39, %v3252_v37  ;;  %v3261_v56 = vrot.slane %v3088_v40, 1  ;;  %4915 = vmatprep.subr.bf16.mxu1 %v4914_v23  ;;  %v7475_v38 = vrot.slane %v6530_v12, 2  ;;  %v1929_v9 = vrot.slane %v6354_v45, 1  ;;  %p5538_p9 = por %p5537_p8, %p5536_p7 }
 0x1c8   :  { %v1203_v36 = vpop.permute.xlu1 %1202  ;;  %v3540_v52 = vrot.slane %v6632_v59, 5  ;;  %v1754_v8 = vrot.slane %v6517_v34, 1  ;;  %v3256_v6 = vsel %vm3132_vm6, %v3255_v14, %v3254_v44  ;;  %4917 = vmatpush1.bf16.msra.mxu1 %v4916_v27  ;;  %2201 = vbcast.lane.b32.xlu0 %v6648_v18, 264  ;;  %v1930_v42 = vrot.slane %v6354_v45, 2  ;;  %v1177_v14 = vpop.permute.xlu0 %1176 }
 0x1c9   :  { %v1779_v47 = vadd.f32 %v7475_v38, %v6530_v12  ;;  %v1771_v40 = vrot.slane %v1770_v13, 1  ;;  %v3258_v32 = vsel %vm3135_vm7, %v3257_v62, %v3256_v6  ;;  %v1763_v21 = vrot.slane %v6519_v11, 1  ;;  %2197 = vbcast.lane.b32.xlu1 %v6648_v18, 256  ;;  %v1070_v38 = vld [vmem:[%s7412_s1 + $0x98] sm:$0x33]  ;;  %p5539_p10 = pnand %p5538_p9, %p5532_p6 }
 0x1ca   :  { %v1932_v12 = vrot.slane %v6354_v45, 4  ;;  %v3260_v29 = vsel %vm3138_vm8, %v3259_v17, %v3258_v32  ;;  %v1933_v39 = vrot.slane %v6354_v45, 5  ;;  %5302 = vrcp.f32 %v6354_v45 }
 0x1cb   :  { %v1780_v16 = vrot.slane %v1779_v47, 1  ;;  %v3262_v50 = vsel %vm3141_vm9, %v3261_v56, %v3260_v29  ;;  %v1934_v4 = vrot.slane %v6354_v45, 6  ;;  %5304 = vrcp.f32 %v1929_v9  ;;  %v1071_v9 = vld [vmem:[%s7412_s1 + $0xa0] sm:$0xff] }
 0x1cc   :  { %v6671_v7 = vmul.f32 %v6433_v46, %v6494_v30  ;;  %v1181_v26 = vpop.permute.xlu1 %1180  ;;  %v6674_v28 = vadd.f32 %v1754_v8, %v6517_v34  ;;  %3439 = vmatmul.mubr.f32.gmra.mrb[6].mxu1 %v3262_v50  ;;  %v1935_v62 = vrot.slane %v6354_v45, 7  ;;  %5306 = vrcp.f32 %v1930_v42  ;;  %v1072_v8 = vld [vmem:[%s7412_s1 + $0xa8] sm:$0x33]  ;;  %v1210_v6 = vpop.permute.xlu0 %1209 }
 0x1cd   :  { %v6679_v23 = vrot.slane %v6318_v60, %v5775_v57  ;;  %v7476_v37 = vrot.slane %v6404_v51, 1  ;;  %v6687_v46 = vadd.f32 %v1763_v21, %v6519_v11  ;;  %5308 = vrcp.f32 %v1932_v12  ;;  %2130 = vbcast.lane.b32.xlu1 %v6523_v19, 272 }
 0x1ce   :  { %v6691_v30 = vmax.f32 %v6575_v54, 1.0  ;;  %v6693_v45 = vadd.f32 %v1780_v16, %v1779_v47  ;;  %5310 = vrcp.f32 %v1933_v39  ;;  %v6695_v34 = vadd.f32 %v1771_v40, %v1770_v13  ;;  %v2056_v54 = vld [vmem:[#allocation5 + $0xbc] sm:$0xf] }
 0x1cf   :  { %v6684_v17 = vadd.f32 %v7476_v37, %v6404_v51  ;;  %2152 = vbcast.lane.b32.xlu0 %v6679_v23, 256  ;;  %v6700_v51 = vrot.slane %v6644_v41, %v5741_v3  ;;  %5312 = vrcp.f32 %v1934_v4  ;;  %v3554_v11 = vrot.slane %v6671_v7, 5  ;;  %v1069_v3 = vld [vmem:[%s7412_s1 + $0x90] sm:$0xff] }
 0x1d0   :  { %v1936_v27 = vrot.slane %v6691_v30, 1  ;;  %v1268_v19 = vpack.c.bf16 %v1192_v33, %v6602_v48  ;;  %v1214_v44 = vpop.permute.xlu1 %1213  ;;  %5314 = vrcp.f32 %v1935_v62  ;;  %v6707_v56 = vrot.slane %v6318_v60, %v7467_v1 }
 0x1d1   :  { %v6711_v13 = vrot.slane %v6644_v41, %v7468_v43  ;;  %v1269_v47 = vpack.c.bf16 %v1203_v36, %v1199_v22  ;;  %2156 = vbcast.lane.b32.xlu1 %v6679_v23, 264  ;;  %v6722_v48 = vrot.slane %v6644_v41, %v7470_v31  ;;  %v6732_v22 = vpack.c.bf16 %v1181_v26, %v1177_v14 }
 0x1d2   :  { %v1423_v60 = vrot.slane %v1268_v19, %v5823_v24  ;;  %v1430_v33 = vrot.slane %v1268_v19, %v5826_v25  ;;  %v6737_v31 = vrot.slane %v6644_v41, %v7471_v58  ;;  %v6741_v40 = vpack.c.bf16 %v1214_v44, %v1210_v6 }
 0x1d3   :  { %2212 = vbcast.lane.b32.xlu0 %v6700_v51, 256  ;;  %v1437_v36 = vrot.slane %v1269_v47, %v5823_v24  ;;  %v1444_v42 = vrot.slane %v1269_v47, %v5826_v25  ;;  %5316 = vrcp.f32 %v1936_v27  ;;  %v1409_v12 = vrot.slane %v6732_v22, %v5823_v24 }
 0x1d4   :  { %v6743_v32 = vmul.bf16 %v1423_v60, %v1069_v3  ;;  %v6745_v21 = vmul.bf16 %v1430_v33, %v1070_v38  ;;  %v5303_v29 = vpop.eup %5302  ;;  %v1416_v58 = vrot.slane %v6732_v22, %v5826_v25  ;;  %v1451_v50 = vrot.slane %v6741_v40, %v5823_v24 }
 0x1d5   :  { %v6749_v16 = vmul.bf16 %v1437_v36, %v1071_v9  ;;  %v6751_v39 = vmul.bf16 %v1444_v42, %v1072_v8  ;;  %v5305_v4 = vpop.eup %5304  ;;  %v1961_v14 = vmul.f32 %v5303_v29, %v6379_v10  ;;  %v1960_v26 = vmul.f32 %v5303_v29, %v6351_v63  ;;  %2216 = vbcast.lane.b32.xlu1 %v6700_v51, 264 }
 0x1d6   :  { %v1615_v62 = vunpack.c.l.bf16 %v6743_v32  ;;  %v1616_v37 = vunpack.c.h.bf16 %v6743_v32  ;;  %v5307_v27 = vpop.eup %5306  ;;  %v1964_v19 = vmul.f32 %v5305_v4, %v6197_v0  ;;  %v1963_v44 = vmul.f32 %v5305_v4, %v6192_v35  ;;  %v7477_v32 = vld [vmem:[#allocation23_spill] sm:$0xff] }
 0x1d7   :  { %2145 = vbcast.lane.b32.xlu0 %v6581_v55, 272  ;;  %v1617_v3 = vunpack.c.l.bf16 %v6745_v21  ;;  %v1618_v38 = vunpack.c.h.bf16 %v6745_v21  ;;  %v5309_v10 = vpop.eup %5308  ;;  %v1967_v63 = vmul.f32 %v5307_v27, %v6342_v49  ;;  %v1966_v47 = vmul.f32 %v5307_v27, %v6221_v53  ;;  %v6776_v53 = vpop.permute.xlu1 %1224 }
 0x1d8   :  { %v1807_v60 = vsel %vm1652_vm10, %v1616_v37, 0.0  ;;  %v1619_v33 = vunpack.c.l.bf16 %v6749_v16  ;;  %v5311_v9 = vpop.eup %5310  ;;  %v1973_v0 = vmul.f32 %v5309_v10, %v6469_v15  ;;  %v3550_v8 = vrot.slane %v1964_v19, 7 }
 0x1d9   :  { %v1972_v35 = vmul.f32 %v5309_v10, %v6450_v5  ;;  %v3536_v55 = vrot.slane %v1963_v44, 7  ;;  %v5313_v6 = vpop.eup %5312  ;;  %v1976_v36 = vmul.f32 %v5311_v9, %v6684_v17  ;;  %v3552_v42 = vrot.slane %v1967_v63, 6  ;;  %2167 = vbcast.lane.b32.xlu1 %v6707_v56, 256 }
 0x1da   :  { %v1975_v21 = vmul.f32 %v5311_v9, %v7477_v32  ;;  %v3538_v49 = vrot.slane %v1966_v47, 6  ;;  %v5315_v29 = vpop.eup %5314  ;;  %v1979_v4 = vmul.f32 %v5313_v6, %v6687_v46  ;;  %v3551_v15 = vsel %vm3123_vm3, %v3550_v8, %v1961_v14 }
 0x1db   :  { %v3556_v37 = vrot.slane %v1973_v0, 4  ;;  %v1978_v5 = vmul.f32 %v5313_v6, %v6674_v28  ;;  %2171 = vbcast.lane.b32.xlu0 %v6707_v56, 264  ;;  %v1982_v17 = vmul.f32 %v5315_v29, %v6693_v45  ;;  %v3553_v27 = vsel %vm3126_vm4, %v3552_v42, %v3551_v15  ;;  %v6806_v42 = vpop.permute.xlu1 %1231 }
 0x1dc   :  { %v3558_v19 = vrot.slane %v1976_v36, 3  ;;  %v1981_v44 = vmul.f32 %v5315_v29, %v6695_v34  ;;  %v3555_v10 = vsel %vm3129_vm5, %v3554_v11, %v3553_v27  ;;  %v3560_v63 = vrot.slane %v1979_v4, 2  ;;  %v1067_v36 = vld [vmem:[%s7412_s1 + $0x80] sm:$0xff] }
 0x1dd   :  { %v3537_v46 = vsel %vm3123_vm3, %v3536_v55, %v1960_v26  ;;  %v3542_v14 = vrot.slane %v1972_v35, 4  ;;  %v6789_v47 = vpop.eup %5316  ;;  %v3557_v28 = vsel %vm3132_vm6, %v3556_v37, %v3555_v10  ;;  %v3562_v9 = vrot.slane %v1982_v17, 1  ;;  %2182 = vbcast.lane.b32.xlu1 %v6711_v13, 256 }
 0x1de   :  { %v3539_v45 = vsel %vm3126_vm4, %v3538_v49, %v3537_v46  ;;  %v3544_v0 = vrot.slane %v1975_v21, 3  ;;  %v3559_v34 = vsel %vm3135_vm7, %v3558_v19, %v3557_v28  ;;  %v3546_v11 = vrot.slane %v1978_v5, 2  ;;  %v1068_v49 = vld [vmem:[%s7412_s1 + $0x88] sm:$0x33]  ;;  %v1074_v28 = vld [vmem:[%s7412_s1 + $0xb8] sm:$0x33] }
 0x1df   :  { %v3541_v7 = vsel %vm3129_vm5, %v3540_v52, %v3539_v45  ;;  %v3548_v8 = vrot.slane %v1981_v44, 1  ;;  %2186 = vbcast.lane.b32.xlu0 %v6711_v13, 264  ;;  %v3561_v26 = vsel %vm3138_vm8, %v3560_v63, %v3559_v34  ;;  %v1799_v55 = vsel %vm1643_vm11, %v1617_v3, 0.0 }
 0x1e0   :  { %v3543_v35 = vsel %vm3132_vm6, %v3542_v14, %v3541_v7  ;;  %v1808_v6 = vsel %vm1654_vm12, %v1618_v38, 0.0  ;;  %v3563_v59 = vsel %vm3141_vm9, %v3562_v9, %v3561_v26  ;;  %v1800_v32 = vadd.f32 %v1799_v55, %v1615_v62  ;;  %v6836_v9 = vpop.permute.xlu1 %1235 }
 0x1e1   :  { %v3545_v52 = vsel %vm3135_vm7, %v3544_v0, %v3543_v35  ;;  %v1809_v21 = vadd.f32 %v1808_v6, %v1807_v60  ;;  %4749 = vmatprep.mubr.msk.f32.mxu1 %vm1652_vm10, %v3563_v59  ;;  %2205 = vbcast.lane.b32.xlu1 %v6648_v18, 272  ;;  %v1620_v38 = vunpack.c.h.bf16 %v6749_v16  ;;  %v1621_v29 = vunpack.c.l.bf16 %v6751_v39 }
 0x1e2   :  { %v3547_v3 = vsel %vm3138_vm8, %v3546_v11, %v3545_v52  ;;  %v1622_v4 = vunpack.c.h.bf16 %v6751_v39  ;;  %v1801_v62 = vrot.slane %v1800_v32, 4  ;;  %v1563_v37 = vmul.bf16 %v1409_v12, %v1067_v36 }
 0x1e3   :  { %v3549_v15 = vsel %vm3141_vm9, %v3548_v8, %v3547_v3  ;;  %2227 = vbcast.lane.b32.xlu0 %v6722_v48, 256  ;;  %v1810_v60 = vrot.slane %v1809_v21, 4  ;;  %v1816_v5 = vsel %vm1643_vm11, %v1621_v29, 0.0  ;;  %v1824_v18 = vsel %vm1652_vm10, %v1620_v38, 0.0 }
 0x1e4   :  { %3663 = vmatmul.mubr.f32.vlgmr.msra.gmra.mrb[8].mxu1 %v3549_v15  ;;  %v1825_v17 = vsel %vm1654_vm12, %v1622_v4, 0.0  ;;  %v1564_v39 = vmul.bf16 %v1416_v58, %v1068_v49  ;;  %v1802_v27 = vadd.f32 %v1801_v62, %v1800_v32  ;;  %v1817_v44 = vadd.f32 %v1816_v5, %v1619_v33  ;;  %v1073_v33 = vld [vmem:[%s7412_s1 + $0xb0] sm:$0xff]  ;;  %v2078_v49 = vpop.permute.xlu1 %2077 }
 0x1e5   :  { %v1811_v19 = vadd.f32 %v1810_v60, %v1809_v21  ;;  %v1826_v10 = vadd.f32 %v1825_v17, %v1824_v18  ;;  %2231 = vbcast.lane.b32.xlu1 %v6722_v48, 264  ;;  %v1611_v12 = vunpack.c.l.bf16 %v1563_v37  ;;  %v1612_v63 = vunpack.c.h.bf16 %v1563_v37 }
 0x1e6   :  { %v1613_v46 = vunpack.c.l.bf16 %v1564_v39  ;;  %v1614_v14 = vunpack.c.h.bf16 %v1564_v39  ;;  %v1803_v22 = vrot.slane %v1802_v27, 2  ;;  %v1818_v45 = vrot.slane %v1817_v44, 4 }
 0x1e7   :  { %2160 = vbcast.lane.b32.xlu0 %v6679_v23, 272  ;;  %v1812_v58 = vrot.slane %v1811_v19, 2  ;;  %v1827_v16 = vrot.slane %v1826_v10, 4  ;;  %v1790_v34 = vsel %vm1652_vm10, %v1612_v63, 0.0  ;;  %v1458_v11 = vrot.slane %v6741_v40, %v5826_v25 }
 0x1e8   :  { %v1782_v0 = vsel %vm1643_vm11, %v1613_v46, 0.0  ;;  %v1791_v7 = vsel %vm1654_vm12, %v1614_v14, 0.0  ;;  %v1804_v8 = vadd.f32 %v1803_v22, %v1802_v27  ;;  %v1819_v23 = vadd.f32 %v1818_v45, %v1817_v44  ;;  %v2082_v44 = vpop.permute.xlu1 %2081 }
 0x1e9   :  { %v1813_v26 = vadd.f32 %v1812_v58, %v1811_v19  ;;  %v1828_v35 = vadd.f32 %v1827_v16, %v1826_v10  ;;  %2220 = vbcast.lane.b32.xlu1 %v6700_v51, 272  ;;  %v1783_v55 = vadd.f32 %v1782_v0, %v1611_v12  ;;  %v1792_v6 = vadd.f32 %v1791_v7, %v1790_v34 }
 0x1ea   :  { %v1569_v36 = vmul.bf16 %v1451_v50, %v1073_v33  ;;  %v1570_v59 = vmul.bf16 %v1458_v11, %v1074_v28  ;;  %v1805_v52 = vrot.slane %v1804_v8, 1  ;;  %v1820_v21 = vrot.slane %v1819_v23, 2 }
 0x1eb   :  { %2242 = vbcast.lane.b32.xlu0 %v6737_v31, 256  ;;  %v1814_v32 = vrot.slane %v1813_v26, 1  ;;  %v1937_v3 = vrot.slane %v6691_v30, 2  ;;  %v1829_v38 = vrot.slane %v1828_v35, 2  ;;  %v1784_v29 = vrot.slane %v1783_v55, 4 }
 0x1ec   :  { %v1793_v4 = vrot.slane %v1792_v6, 4  ;;  %v1624_v51 = vunpack.c.h.bf16 %v1569_v36  ;;  %v1625_v15 = vunpack.c.l.bf16 %v1570_v59  ;;  %v1626_v62 = vunpack.c.h.bf16 %v1570_v59 }
 0x1ed   :  { %2246 = vbcast.lane.b32.xlu1 %v6737_v31, 264  ;;  %v1806_v60 = vadd.f32 %v1805_v52, %v1804_v8  ;;  %v1815_v40 = vadd.f32 %v1814_v32, %v1813_v26  ;;  %v1821_v50 = vadd.f32 %v1820_v21, %v1819_v23  ;;  %v1623_v37 = vunpack.c.l.bf16 %v1569_v36  ;;  %v1077_v23 = vld [vmem:[%s7412_s1 + $0xd0] sm:$0xff] }
 0x1ee   :  { %5318 = vrcp.f32 %v1937_v3  ;;  %v1830_v5 = vadd.f32 %v1829_v38, %v1828_v35  ;;  %v1833_v18 = vsel %vm1643_vm11, %v1625_v15, 0.0  ;;  %v1785_v17 = vadd.f32 %v1784_v29, %v1783_v55  ;;  %v1243_v35 = vpop.permute.xlu1 %1242 }
 0x1ef   :  { %2175 = vbcast.lane.b32.xlu0 %v6707_v56, 272  ;;  %v1794_v39 = vadd.f32 %v1793_v4, %v1792_v6  ;;  %v1841_v27 = vsel %vm1652_vm10, %v1624_v51, 0.0  ;;  %v1842_v19 = vsel %vm1654_vm12, %v1626_v62, 0.0  ;;  %v6860_v10 = vmul.f32 %v6789_v47, %v1806_v60  ;;  %v1221_v56 = vpop.permute.xlu0 %1220 }
 0x1f0   :  { %v2255_v12 = vrot.slane %v6644_v41, %v7473_v20  ;;  %v6866_v63 = vmul.f32 %v6789_v47, %v1815_v40  ;;  %v1822_v46 = vrot.slane %v1821_v50, 1  ;;  %v1834_v14 = vadd.f32 %v1833_v18, %v1623_v37  ;;  %v1076_v47 = vld [vmem:[%s7412_s1 + $0xc8] sm:$0x33] }
 0x1f1   :  { %2190 = vbcast.lane.b32.xlu1 %v6711_v13, 272  ;;  %v1271_v28 = vpack.c.bf16 %v6776_v53, %v1221_v56  ;;  %v6870_v22 = vmax.f32 %v6604_v61, 1.0  ;;  %5320 = vrcp.f32 %v6691_v30  ;;  %v1843_v13 = vadd.f32 %v1842_v19, %v1841_v27 }
 0x1f2   :  { %v1831_v58 = vrot.slane %v1830_v5, 1  ;;  %v1786_v45 = vrot.slane %v1785_v17, 2  ;;  %v1795_v20 = vrot.slane %v1794_v39, 2  ;;  %v3564_v53 = vrot.slane %v6860_v10, 7  ;;  %v1247_v27 = vpop.permute.xlu1 %1246 }
 0x1f3   :  { %2235 = vbcast.lane.b32.xlu0 %v6722_v48, 272  ;;  %v1075_v48 = vld [vmem:[%s7412_s1 + $0xc0] sm:$0xff]  ;;  %v1465_v16 = vrot.slane %v1271_v28, %v5823_v24  ;;  %v1472_v33 = vrot.slane %v1271_v28, %v5826_v25  ;;  %v6884_v0 = vrot.slane %v6644_v41, %v5775_v57  ;;  %v1272_v34 = vpack.c.bf16 %v6836_v9, %v6806_v42  ;;  %v1078_v57 = vld [vmem:[%s7412_s1 + $0xd8] sm:$0x33] }
 0x1f4   :  { %v3578_v7 = vrot.slane %v6866_v63, 7  ;;  %v1823_v11 = vadd.f32 %v1822_v46, %v1821_v50  ;;  %v1835_v8 = vrot.slane %v1834_v14, 4  ;;  %v1844_v55 = vrot.slane %v1843_v13, 4 }
 0x1f5   :  { %2257 = vbcast.lane.b32.xlu1 %v2255_v12, 256  ;;  %v1571_v26 = vmul.bf16 %v1465_v16, %v1075_v48  ;;  %v1572_v6 = vmul.bf16 %v1472_v33, %v1076_v47  ;;  %v1479_v36 = vrot.slane %v1272_v34, %v5823_v24  ;;  %v1486_v42 = vrot.slane %v1272_v34, %v5826_v25 }
 0x1f6   :  { %v1832_v9 = vadd.f32 %v1831_v58, %v1830_v5  ;;  %v6898_v32 = vpack.c.bf16 %v2082_v44, %v2078_v49  ;;  %v6900_v3 = vadd.f32 %v1786_v45, %v1785_v17  ;;  %v6903_v51 = vadd.f32 %v1795_v20, %v1794_v39 }
 0x1f7   :  { %2261 = vbcast.lane.b32.xlu0 %v2255_v12, 264  ;;  %v1627_v59 = vunpack.c.l.bf16 %v1571_v26  ;;  %v1628_v52 = vunpack.c.h.bf16 %v1571_v26  ;;  %v1629_v38 = vunpack.c.l.bf16 %v1572_v6  ;;  %v1630_v29 = vunpack.c.h.bf16 %v1572_v6 }
 0x1f8   :  { %v5319_v21 = vpop.eup %5318  ;;  %v1573_v4 = vmul.bf16 %v1479_v36, %v1077_v23  ;;  %v1836_v15 = vadd.f32 %v1835_v8, %v1834_v14  ;;  %v1574_v60 = vmul.bf16 %v1486_v42, %v1078_v57  ;;  %v1845_v50 = vadd.f32 %v1844_v55, %v1843_v13 }
 0x1f9   :  { %2250 = vbcast.lane.b32.xlu1 %v6737_v31, 272  ;;  %v1858_v62 = vsel %vm1652_vm10, %v1628_v52, 0.0  ;;  %v6906_v40 = vmul.f32 %v5319_v21, %v1823_v11  ;;  %v1850_v31 = vsel %vm1643_vm11, %v1629_v38, 0.0  ;;  %v1859_v49 = vsel %vm1654_vm12, %v1630_v29, 0.0 }
 0x1fa   :  { %v1851_v37 = vadd.f32 %v1850_v31, %v1627_v59  ;;  %v1860_v5 = vadd.f32 %v1859_v49, %v1858_v62  ;;  %v1631_v18 = vunpack.c.l.bf16 %v1573_v4  ;;  %v1632_v17 = vunpack.c.h.bf16 %v1573_v4  ;;  %v2013_v59 = vld [vmem:[#allocation5 + $0x10] sm:$0xf]  ;;  %v6937_v31 = vpop.xlane.xlu0 %2974 }
 0x1fb   :  { %2272 = vbcast.lane.b32.xlu0 %v6884_v0, 256  ;;  %v6911_v39 = vpop.eup %5320  ;;  %v6913_v19 = vmul.f32 %v5319_v21, %v1832_v9  ;;  %v1633_v44 = vunpack.c.l.bf16 %v1574_v60  ;;  %v1634_v56 = vunpack.c.h.bf16 %v1574_v60  ;;  %v2285_v46 = vrot.slane %v6644_v41, %v7467_v1  ;;  %v1079_v1 = vld [vmem:[%s7412_s1 + $0xe0] sm:$0xff]  ;;  %v1080_v41 = vld [vmem:[%s7412_s1 + $0xe8] sm:$0x33]  ;;  %7478 = vst [vmem:[#allocation22_spill] sm:$0xff] %v6937_v31 }
 0x1fc   :  { %v1837_v14 = vrot.slane %v1836_v15, 2  ;;  %v1852_v28 = vrot.slane %v1851_v37, 4  ;;  %v1861_v13 = vrot.slane %v1860_v5, 4  ;;  %v1875_v48 = vsel %vm1652_vm10, %v1632_v17, 0.0  ;;  %v2012_v9 = vld [vmem:[#allocation5 + $0xc] sm:$0xf] }
 0x1fd   :  { %2276 = vbcast.lane.b32.xlu1 %v6884_v0, 264  ;;  %v1846_v58 = vrot.slane %v1845_v50, 2  ;;  %v1867_v45 = vsel %vm1643_vm11, %v1633_v44, 0.0  ;;  %v1876_v20 = vsel %vm1654_vm12, %v1634_v56, 0.0  ;;  %v1273_v47 = vpack.c.bf16 %v1247_v27, %v1243_v35 }
 0x1fe   :  { %v1853_v16 = vadd.f32 %v1852_v28, %v1851_v37  ;;  %v1862_v33 = vadd.f32 %v1861_v13, %v1860_v5  ;;  %v1868_v34 = vadd.f32 %v1867_v45, %v1631_v18  ;;  %v1788_v11 = vrot.slane %v6900_v3, 1 }
 0x1ff   :  { %2265 = vbcast.lane.b32.xlu0 %v2255_v12, 272  ;;  %v1877_v12 = vadd.f32 %v1876_v20, %v1875_v48  ;;  %v1797_v8 = vrot.slane %v6903_v51, 1  ;;  %v1493_v26 = vrot.slane %v1273_v47, %v5823_v24  ;;  %v1500_v23 = vrot.slane %v1273_v47, %v5826_v25 }
 0x200   :  { %v1854_v35 = vrot.slane %v1853_v16, 2  ;;  %v1869_v55 = vrot.slane %v1868_v34, 4  ;;  %v2388_v6 = vrot.slane %v6898_v32, %v5823_v24  ;;  %v2395_v57 = vrot.slane %v6898_v32, %v5826_v25 }
 0x201   :  { %2287 = vbcast.lane.b32.xlu1 %v2285_v46, 256  ;;  %v3566_v36 = vrot.slane %v6906_v40, 6  ;;  %v1878_v42 = vrot.slane %v1877_v12, 4  ;;  %v1575_v52 = vmul.bf16 %v1493_v26, %v1079_v1  ;;  %v1576_v21 = vmul.bf16 %v1500_v23, %v1080_v41  ;;  %v2015_v41 = vld [vmem:[#allocation5 + $0x18] sm:$0xf] }
 0x202   :  { %v3580_v29 = vrot.slane %v6913_v19, 6  ;;  %v1838_v4 = vadd.f32 %v1837_v14, %v1836_v15  ;;  %v1847_v62 = vadd.f32 %v1846_v58, %v1845_v50  ;;  %v1863_v60 = vrot.slane %v1862_v33, 2  ;;  %v2016_v26 = vld [vmem:[#allocation5 + $0x1c] sm:$0xf] }
 0x203   :  { %2291 = vbcast.lane.b32.xlu0 %v2285_v46, 264  ;;  %v1635_v49 = vunpack.c.l.bf16 %v1575_v52  ;;  %v1636_v32 = vunpack.c.h.bf16 %v1575_v52  ;;  %v1637_v37 = vunpack.c.l.bf16 %v1576_v21  ;;  %v1638_v5 = vunpack.c.h.bf16 %v1576_v21  ;;  %v1081_v21 = vld [vmem:[%s7412_s1 + $0xf0] sm:$0xff] }
 0x204   :  { %v1855_v18 = vadd.f32 %v1854_v35, %v1853_v16  ;;  %v1870_v17 = vadd.f32 %v1869_v55, %v1868_v34  ;;  %v2748_v27 = vmul.bf16 %v2388_v6, %v2012_v9  ;;  %v2749_v44 = vmul.bf16 %v2395_v57, %v2013_v59 }
 0x205   :  { %v2093_v38 = vpop.permute.xlu1 %2092  ;;  %2280 = vbcast.lane.b32.xlu1 %v6884_v0, 272  ;;  %v1879_v56 = vadd.f32 %v1878_v42, %v1877_v12  ;;  %v1884_v28 = vsel %vm1643_vm11, %v1637_v37, 0.0  ;;  %v1892_v15 = vsel %vm1652_vm10, %v1636_v32, 0.0  ;;  %v1893_v50 = vsel %vm1654_vm12, %v1638_v5, 0.0 }
 0x206   :  { %v1789_v0 = vadd.f32 %v1788_v11, %v6900_v3  ;;  %v1839_v13 = vrot.slane %v1838_v4, 1  ;;  %v1864_v48 = vadd.f32 %v1863_v60, %v1862_v33  ;;  %v1848_v58 = vrot.slane %v1847_v62, 1 }
 0x207   :  { %2295 = vbcast.lane.b32.xlu0 %v2285_v46, 272  ;;  %v1798_v46 = vadd.f32 %v1797_v8, %v6903_v51  ;;  %v1885_v45 = vadd.f32 %v1884_v28, %v1635_v49  ;;  %v1894_v20 = vadd.f32 %v1893_v50, %v1892_v15  ;;  %v1856_v16 = vrot.slane %v1855_v18, 1 }
 0x208   :  { %v1871_v34 = vrot.slane %v1870_v17, 2  ;;  %v2796_v12 = vunpack.c.l.bf16 %v2748_v27  ;;  %v2797_v1 = vunpack.c.l.bf16 %v2749_v44  ;;  %v1880_v35 = vrot.slane %v1879_v56, 2 }
 0x209   :  { %v2097_v14 = vpop.permute.xlu1 %2096  ;;  %v1895_v55 = vrot.slane %v1894_v20, 4  ;;  %v6947_v33 = vmul.f32 %v6911_v39, %v1789_v0  ;;  %v6950_v11 = vmul.f32 %v6911_v39, %v1798_v46  ;;  %v1865_v8 = vrot.slane %v1864_v48, 1 }
 0x20a   :  { %v2301_v47 = vpack.c.bf16 %v2097_v14, %v2093_v38  ;;  %v6952_v42 = vadd.f32 %v1839_v13, %v1838_v4  ;;  %v1886_v9 = vrot.slane %v1885_v45, 4  ;;  %v1082_v38 = vld [vmem:[%s7412_s1 + $0xf8] sm:$0x33]  ;;  %v6960_v60 = vadd.f32 %v1848_v58, %v1847_v62 }
 0x20b   :  { %v6962_v49 = vadd.f32 %v2797_v1, %v2796_v12  ;;  %v6966_v37 = vadd.f32 %v1856_v16, %v1855_v18  ;;  %v6968_v5 = vadd.f32 %v1871_v34, %v1870_v17  ;;  %v6970_v27 = vadd.f32 %v1880_v35, %v1879_v56  ;;  %v2017_v16 = vld [vmem:[#allocation5 + $0x20] sm:$0xf] }
 0x20c   :  { %v1254_v23 = vpop.permute.xlu0 %1253  ;;  %v2409_v6 = vrot.slane %v2301_v47, %v5823_v24  ;;  %v2416_v3 = vrot.slane %v2301_v47, %v5826_v25  ;;  %v1896_v44 = vadd.f32 %v1895_v55, %v1894_v20  ;;  %v6972_v28 = vadd.f32 %v1865_v8, %v1864_v48 }
 0x20d   :  { %v1258_v51 = vpop.permute.xlu1 %1257  ;;  %v1887_v14 = vadd.f32 %v1886_v9, %v1885_v45  ;;  %v2980_v13 = vrot.slane %v6870_v22, 1  ;;  %v1873_v17 = vrot.slane %v6968_v5, 1  ;;  %v1882_v56 = vrot.slane %v6970_v27, 1 }
 0x20e   :  { %v1274_v57 = vpack.c.bf16 %v1258_v51, %v1254_v23  ;;  %v2751_v59 = vmul.bf16 %v2409_v6, %v2015_v41  ;;  %v2752_v52 = vmul.bf16 %v2416_v3, %v2016_v26  ;;  %v1897_v20 = vrot.slane %v1896_v44, 2  ;;  %v127_v6 = vld [vmem:[%s7422_s11] ss:$8 sm:$0x3] }
 0x20f   :  { %v1938_v41 = vrot.slane %v6691_v30, 3  ;;  %v1888_v26 = vrot.slane %v1887_v14, 2  ;;  %v1939_v8 = vrot.slane %v6691_v30, 4  ;;  %v1941_v9 = vrot.slane %v6691_v30, 6 }
 0x210   :  { %v1507_v39 = vrot.slane %v1274_v57, %v5823_v24  ;;  %v1514_v4 = vrot.slane %v1274_v57, %v5826_v25  ;;  %v2101_v32 = vpop.permute.xlu0 %2100  ;;  %v2799_v0 = vunpack.c.l.bf16 %v2751_v59  ;;  %v2800_v46 = vunpack.c.l.bf16 %v2752_v52 }
 0x211   :  { %v2302_v62 = vpack.c.bf16 %v2101_v32, %v2101_v32  ;;  %v1940_v57 = vrot.slane %v6691_v30, 5  ;;  %5322 = vrcp.f32 %v1938_v41  ;;  %v6993_v32 = vrot.slane %v127_v6, %v7468_v43 }
 0x212   :  { %v1577_v15 = vmul.bf16 %v1507_v39, %v1081_v21  ;;  %v1578_v50 = vmul.bf16 %v1514_v4, %v1082_v38  ;;  %v2857_v3 = vadd.f32 %v2800_v46, %v2799_v0  ;;  %v4744_v38 = vld [vmem:[%s7422_s11 + $0x3] ss:$8 sm:$0x3]  ;;  %v1898_v39 = vadd.f32 %v1897_v20, %v1896_v44  ;;  %v3678_v46 = vld [vmem:[#allocation8 + $0x18] sm:$0xff] }
 0x213   :  { %v2423_v48 = vrot.slane %v2302_v62, %v5823_v24  ;;  %v2981_v4 = vrot.slane %v6870_v22, 2  ;;  %5324 = vrcp.f32 %v1939_v8  ;;  %v3676_v0 = vld [vmem:[#allocation8 + $0x8] sm:$0xff]  ;;  %v1942_v44 = vrot.slane %v6691_v30, 7 }
 0x214   :  { %v1639_v58 = vunpack.c.l.bf16 %v1577_v15  ;;  %v1640_v47 = vunpack.c.h.bf16 %v1577_v15  ;;  %v1641_v12 = vunpack.c.l.bf16 %v1578_v50  ;;  %v1642_v18 = vunpack.c.h.bf16 %v1578_v50 }
 0x215   :  { %v2753_v55 = vmul.bf16 %v2423_v48, %v2017_v16  ;;  %5326 = vrcp.f32 %v1940_v57  ;;  %v2982_v40 = vrot.slane %v6870_v22, 3 }
 0x216   :  { %v1901_v34 = vsel %vm1643_vm11, %v1641_v12, 0.0  ;;  %v1909_v45 = vsel %vm1652_vm10, %v1640_v47, 0.0  ;;  %v1910_v1 = vsel %vm1654_vm12, %v1642_v18, 0.0  ;;  %v2063_v51 = vpop.permute.xlu1 %2062  ;;  %5328 = vrcp.f32 %v2980_v13  ;;  %v3675_v18 = vld [vmem:[#allocation8] sm:$0xff] }
 0x217   :  { %v1902_v23 = vadd.f32 %v1901_v34, %v1639_v58  ;;  %v1911_v35 = vadd.f32 %v1910_v1, %v1909_v45  ;;  %v2801_v21 = vunpack.c.l.bf16 %v2753_v55  ;;  %v1889_v58 = vadd.f32 %v1888_v26, %v1887_v14  ;;  %v3677_v34 = vld [vmem:[#allocation8 + $0x10] sm:$0xff]  ;;  %v3680_v45 = vld [vmem:[#allocation8 + $0x28] sm:$0xff]  ;;  %v3682_v1 = vld [vmem:[#allocation8 + $0x38] sm:$0xff] }
 0x218   :  { %v6996_v12 = vrot.slane %v4744_v38, %v7468_v43  ;;  %5330 = vrcp.f32 %v1941_v9  ;;  %v4918_v14 = vpack.c.bf16 %v3678_v46, %v3676_v0  ;;  %v7003_v26 = vrot.slane %v4744_v38, %v5738_v2  ;;  %v3679_v55 = vld [vmem:[#allocation8 + $0x20] sm:$0xff]  ;;  %v7481_v46 = vld [vmem:[#allocation24_spill] sm:$0xff] }
 0x219   :  { %v1903_v59 = vrot.slane %v1902_v23, 4  ;;  %v1912_v52 = vrot.slane %v1911_v35, 4  ;;  %v2858_v62 = vadd.f32 %v2857_v3, %v2801_v21  ;;  %5332 = vrcp.f32 %v2981_v4  ;;  %v3681_v3 = vld [vmem:[#allocation8 + $0x30] sm:$0xff] }
 0x21a   :  { %v2067_v47 = vpop.permute.xlu1 %2066  ;;  %7479 = vst [vmem:[#allocation23_spill] sm:$0xff] %v6996_v12  ;;  %7480 = vst [vmem:[#allocation27_spill] sm:$0xff] %v7003_v26  ;;  %5334 = vrcp.f32 %v1942_v44  ;;  %4919 = vmatprep.subr.bf16.mxu0 %v4918_v14  ;;  %v4920_v9 = vpack.c.bf16 %v3677_v34, %v3675_v18  ;;  %v1890_v21 = vrot.slane %v1889_v58, 1  ;;  %vm3841_vm13 = vcmp.gt.f32.partialorder %v7481_v46, 0.0  ;;  %v2010_v44 = vld [vmem:[#allocation5 + $0x4] sm:$0xf] }
 0x21b   :  { %v1904_v15 = vadd.f32 %v1903_v59, %v1902_v23  ;;  %v1913_v50 = vadd.f32 %v1912_v52, %v1911_v35  ;;  %v2859_v48 = vrot.slane %v2858_v62, 4  ;;  %v2297_v41 = vpack.c.bf16 %v2067_v47, %v2063_v51  ;;  %v5323_v0 = vpop.eup %5322  ;;  %v2009_v47 = vld [vmem:[#allocation5] sm:$0xf]  ;;  %v4047_v46 = vld [vmem:[#allocation10 + $0x278] sm:$0xff] }
 0x21c   :  { %v7000_v23 = vrot.slane %v127_v6, %v5738_v2  ;;  %v1899_v35 = vrot.slane %v1898_v39, 1  ;;  %v4922_v59 = vpack.c.bf16 %v3682_v1, %v3680_v45  ;;  %v3579_v6 = vsel %vm3123_vm3, %v3578_v7, %v6950_v11  ;;  %4921 = vmatpush1.bf16.msra.mxu0 %v4920_v9 }
 0x21d   :  { %v1905_v16 = vrot.slane %v1904_v15, 2  ;;  %v1914_v20 = vrot.slane %v1913_v50, 2  ;;  %v2860_v13 = vadd.f32 %v2859_v48, %v2858_v62  ;;  %v2367_v38 = vrot.slane %v2297_v41, %v5823_v24 }
 0x21e   :  { %v2086_v8 = vpop.permute.xlu1 %2085  ;;  %v2374_v4 = vrot.slane %v2297_v41, %v5826_v25  ;;  %v4924_v62 = vpack.c.bf16 %v3681_v3, %v3679_v55  ;;  %4923 = vmatprep.subr.bf16.mxu0 %v4922_v59  ;;  %v1900_v34 = vadd.f32 %v1899_v35, %v1898_v39  ;;  %v1874_v45 = vadd.f32 %v1873_v17, %v6968_v5 }
 0x21f   :  { %v1915_v30 = vadd.f32 %v1914_v20, %v1913_v50  ;;  %v1906_v57 = vadd.f32 %v1905_v16, %v1904_v15  ;;  %v2300_v51 = vpack.c.bf16 %v2086_v8, %v2086_v8  ;;  %v2861_v52 = vrot.slane %v2860_v13, 2  ;;  %v2014_v50 = vld [vmem:[#allocation5 + $0x14] sm:$0xf]  ;;  %v5325_v20 = vpop.eup %5324 }
 0x220   :  { %v1883_v15 = vadd.f32 %v1882_v56, %v6970_v27  ;;  %v1994_v27 = vmul.f32 %v5323_v0, %v6960_v60  ;;  %v3581_v56 = vsel %vm3126_vm4, %v3580_v29, %v3579_v6  ;;  %v5327_v1 = vpop.eup %5326  ;;  %v7026_v55 = vadd.f32 %v1890_v21, %v1889_v58  ;;  %4925 = vmatpush1.bf16.msra.mxu0 %v4924_v62  ;;  %v2020_v62 = vld [vmem:[#allocation5 + $0x2c] sm:$0xf] }
 0x221   :  { %v2402_v63 = vrot.slane %v2300_v51, %v5823_v24  ;;  %v2862_v7 = vadd.f32 %v2861_v52, %v2860_v13  ;;  %v1916_v18 = vrot.slane %v1915_v30, 1  ;;  %v1907_v16 = vrot.slane %v1906_v57, 1  ;;  %v7028_v3 = vpop.eup %5328 }
 0x222   :  { %v2108_v48 = vpop.permute.xlu1 %2107  ;;  %v1997_v13 = vmul.f32 %v5325_v20, %v6972_v28  ;;  %v7030_v39 = vmul.bf16 %v2367_v38, %v2009_v47  ;;  %v7032_v60 = vmul.bf16 %v2374_v4, %v2010_v44  ;;  %v2000_v19 = vmul.f32 %v5327_v1, %v1883_v15  ;;  %v5331_v29 = vpop.eup %5330 }
 0x223   :  { %v7016_v11 = vpop.permute.xlu0 %2126  ;;  %v2750_v41 = vmul.bf16 %v2402_v63, %v2014_v50  ;;  %v2863_v14 = vrot.slane %v2862_v7, 1  ;;  %v3582_v35 = vrot.slane %v1994_v27, 5  ;;  %v1917_v17 = vadd.f32 %v1916_v18, %v1915_v30  ;;  %v5333_v51 = vpop.eup %5332  ;;  %v2018_v63 = vld [vmem:[#allocation5 + $0x24] sm:$0xf]  ;;  %v2019_v18 = vld [vmem:[#allocation5 + $0x28] sm:$0xf] }
 0x224   :  { %v7034_v59 = vadd.f32 %v1907_v16, %v1906_v57  ;;  %v2003_v52 = vmul.f32 %v5331_v29, %v1900_v34  ;;  %v7037_v6 = vmul.f32 %v5323_v0, %v6952_v42  ;;  %v7040_v21 = vmul.f32 %v5325_v20, %v6966_v37  ;;  %v5335_v57 = vpop.eup %5334 }
 0x225   :  { %v2798_v8 = vunpack.c.l.bf16 %v2750_v41  ;;  %v2864_v9 = vadd.f32 %v2863_v14, %v2862_v7  ;;  %v3584_v30 = vrot.slane %v1997_v13, 4  ;;  %v3583_v0 = vsel %vm3129_vm5, %v3582_v35, %v3581_v56 }
 0x226   :  { %v2112_v28 = vpop.permute.xlu1 %2111  ;;  %v3586_v37 = vrot.slane %v2000_v19, 3  ;;  %v2006_v20 = vmul.f32 %v5335_v57, %v1917_v17  ;;  %v3588_v14 = vrot.slane %v2003_v52, 2  ;;  %v1999_v17 = vmul.f32 %v5327_v1, %v1874_v45 }
 0x227   :  { %v2116_v5 = vpop.permute.xlu0 %2115  ;;  %v2850_v38 = vadd.f32 %v6962_v49, %v2798_v8  ;;  %v7043_v4 = vmul.f32 %v5333_v51, %v2864_v9  ;;  %v2303_v15 = vpack.c.bf16 %v2112_v28, %v2108_v48  ;;  %v3565_v45 = vsel %vm3123_vm3, %v3564_v53, %v6947_v33 }
 0x228   :  { %v2304_v58 = vpack.c.bf16 %v2116_v5, %v2116_v5  ;;  %v3585_v5 = vsel %vm3132_vm6, %v3584_v30, %v3583_v0  ;;  %v2793_v1 = vunpack.c.l.bf16 %v7030_v39  ;;  %v2011_v0 = vld [vmem:[#allocation5 + $0x8] sm:$0xf]  ;;  %v3570_v10 = vrot.slane %v7040_v21, 4 }
 0x229   :  { %v3422_v50 = vpop.f32.mrb[0].mxu1  ;;  %v2851_v7 = vrot.slane %v2850_v38, 4  ;;  %v2430_v16 = vrot.slane %v2303_v15, %v5823_v24  ;;  %v2437_v34 = vrot.slane %v2303_v15, %v5826_v25  ;;  %v2005_v53 = vmul.f32 %v5335_v57, %v7034_v59 }
 0x22a   :  { %v7046_v47 = vadd.f32 %v3422_v50, %v6993_v32  ;;  %v3424_v44 = vpop.f32.mrb[1].mxu1  ;;  %v2444_v42 = vrot.slane %v2304_v58, %v5823_v24  ;;  %v2123_v41 = vpop.permute.xlu1 %2122  ;;  %v3587_v58 = vsel %vm3135_vm7, %v3586_v37, %v3585_v5  ;;  %v3590_v50 = vrot.slane %v2006_v20, 1 }
 0x22b   :  { %v7051_v49 = vadd.f32 %v3424_v44, %v7000_v23  ;;  %v2852_v13 = vadd.f32 %v2851_v7, %v2850_v38  ;;  %v2754_v35 = vmul.bf16 %v2430_v16, %v2018_v63  ;;  %v2755_v9 = vmul.bf16 %v2437_v34, %v2019_v18 }
 0x22c   :  { %v3847_v48 = vsel %vm3841_vm13, %v7046_v47, 0.0  ;;  %v2756_v27 = vmul.bf16 %v2444_v42, %v2020_v62  ;;  %v3589_v44 = vsel %vm3138_vm8, %v3588_v14, %v3587_v58  ;;  %v2002_v37 = vmul.f32 %v5331_v29, %v7026_v55  ;;  %v3688_v58 = vld [vmem:[#allocation8 + $0x68] sm:$0xff] }
 0x22d   :  { %v3882_v56 = vmul.f32 %v6996_v12, %v3847_v48  ;;  %v3848_v19 = vsel %vm3841_vm13, %v7051_v49, 0.0  ;;  %v2853_v51 = vrot.slane %v2852_v13, 2  ;;  %v2802_v28 = vunpack.c.l.bf16 %v2754_v35 }
 0x22e   :  { %v3883_v8 = vmul.f32 %v7003_v26, %v3848_v19  ;;  %v2803_v52 = vunpack.c.l.bf16 %v2755_v9  ;;  %v2804_v38 = vunpack.c.l.bf16 %v2756_v27  ;;  %v2071_v62 = vpop.permute.xlu1 %2070  ;;  %v3591_v63 = vsel %vm3141_vm9, %v3590_v50, %v3589_v44  ;;  %v3684_v19 = vld [vmem:[#allocation8 + $0x48] sm:$0xff]  ;;  %v3690_v50 = vld [vmem:[#allocation8 + $0x78] sm:$0xff]  ;;  %v7197_v26 = vld [vmem:[#allocation10 + $0x30] sm:$0xff] }
 0x22f   :  { %v2854_v42 = vadd.f32 %v2853_v51, %v2852_v13  ;;  %v2298_v7 = vpack.c.bf16 %v2071_v62, %v2071_v62  ;;  %4750 = vmatprep.mubr.msk.f32.mxu1 %vm1652_vm10, %v3591_v63  ;;  %v3568_v18 = vrot.slane %v7037_v6, 5  ;;  %v2794_v16 = vunpack.c.l.bf16 %v7032_v60  ;;  %v2142_v14 = vpop.permute.xlu0 %2141  ;;  %v2022_v63 = vld [vmem:[#allocation5 + $0x34] sm:$0xf] }
 0x230   :  { %v3886_v15 = vadd.f32 %v3883_v8, %v3882_v56  ;;  %v2865_v30 = vadd.f32 %v2803_v52, %v2802_v28  ;;  %v3572_v33 = vrot.slane %v1999_v17, 3  ;;  %v2305_v27 = vpack.c.bf16 %v7016_v11, %v2123_v41  ;;  %v3686_v11 = vld [vmem:[#allocation8 + $0x58] sm:$0xff]  ;;  %v3683_v41 = vld [vmem:[#allocation8 + $0x40] sm:$0xff]  ;;  %v3685_v8 = vld [vmem:[#allocation8 + $0x50] sm:$0xff] }
 0x231   :  { %v2855_v20 = vrot.slane %v2854_v42, 1  ;;  %v2381_v48 = vrot.slane %v2298_v7, %v5823_v24  ;;  %v3567_v55 = vsel %vm3126_vm4, %v3566_v36, %v3565_v45  ;;  %v3574_v56 = vrot.slane %v2002_v37, 2  ;;  %v3689_v7 = vld [vmem:[#allocation8 + $0x70] sm:$0xff] }
 0x232   :  { %3887 = vadd.xlane.f32.xlu1 %v3886_v15  ;;  %v2866_v34 = vadd.f32 %v2865_v30, %v2804_v38  ;;  %v2138_v60 = vpop.permute.xlu1 %2137  ;;  %v3569_v6 = vsel %vm3129_vm5, %v3568_v18, %v3567_v55  ;;  %v2841_v21 = vadd.f32 %v2794_v16, %v2793_v1  ;;  %v3576_v5 = vrot.slane %v2005_v53, 1  ;;  %v2021_v38 = vld [vmem:[#allocation5 + $0x30] sm:$0xf]  ;;  %v3692_v30 = vld [vmem:[#allocation8 + $0x88] sm:$0xff] }
 0x233   :  { %v2856_v39 = vadd.f32 %v2855_v20, %v2854_v42  ;;  %v2747_v13 = vmul.bf16 %v2381_v48, %v2011_v0  ;;  %v3571_v57 = vsel %vm3132_vm6, %v3570_v10, %v3569_v6  ;;  %v2451_v17 = vrot.slane %v2305_v27, %v5823_v24  ;;  %v3687_v42 = vld [vmem:[#allocation8 + $0x60] sm:$0xff]  ;;  %v3694_v0 = vld [vmem:[#allocation8 + $0x98] sm:$0xff] }
 0x234   :  { %v2867_v29 = vrot.slane %v2866_v34, 4  ;;  %v3573_v36 = vsel %vm3135_vm7, %v3572_v33, %v3571_v57  ;;  %v2458_v51 = vrot.slane %v2305_v27, %v5826_v25  ;;  %v4926_v62 = vpack.c.bf16 %v3686_v11, %v3684_v19  ;;  %v3691_v33 = vld [vmem:[#allocation8 + $0x80] sm:$0xff]  ;;  %v3698_v6 = vld [vmem:[#allocation8 + $0xb8] sm:$0xff] }
 0x235   :  { %v7085_v35 = vmul.f32 %v7028_v3, %v2856_v39  ;;  %v2795_v59 = vunpack.c.l.bf16 %v2747_v13  ;;  %v3575_v3 = vsel %vm3138_vm8, %v3574_v56, %v3573_v36  ;;  %v4928_v44 = vpack.c.bf16 %v3685_v8, %v3683_v41  ;;  %v3693_v39 = vld [vmem:[#allocation8 + $0x90] sm:$0xff]  ;;  %v2023_v8 = vld [vmem:[#allocation5 + $0x38] sm:$0xf] }
 0x236   :  { %v2868_v9 = vadd.f32 %v2867_v29, %v2866_v34  ;;  %v3577_v15 = vsel %vm3141_vm9, %v3576_v5, %v3575_v3  ;;  %5336 = vrcp.f32 %v6870_v22  ;;  %4927 = vmatprep.subr.bf16.mxu0 %v4926_v62  ;;  %v4930_v16 = vpack.c.bf16 %v3690_v50, %v3688_v58  ;;  %v3696_v29 = vld [vmem:[#allocation8 + $0xa8] sm:$0xff]  ;;  %v3697_v36 = vld [vmem:[#allocation8 + $0xb0] sm:$0xff]  ;;  %v2024_v58 = vld [vmem:[#allocation5 + $0x3c] sm:$0xf] }
 0x237   :  { %v2842_v28 = vadd.f32 %v2841_v21, %v2795_v59  ;;  %3669 = vmatmul.mubr.f32.gmra.mrb[10].mxu1 %v3577_v15  ;;  %5338 = vrcp.f32 %v2982_v40  ;;  %4929 = vmatpush1.bf16.msra.mxu0 %v4928_v44  ;;  %v4932_v48 = vpack.c.bf16 %v3689_v7, %v3687_v42  ;;  %v2757_v10 = vmul.bf16 %v2451_v17, %v2021_v38  ;;  %v3695_v40 = vld [vmem:[#allocation8 + $0xa0] sm:$0xff] }
 0x238   :  { %v2869_v52 = vrot.slane %v2868_v9, 2  ;;  %v2758_v34 = vmul.bf16 %v2458_v51, %v2022_v63  ;;  %4931 = vmatprep.subr.bf16.mxu0 %v4930_v16  ;;  %v4934_v53 = vpack.c.bf16 %v3694_v0, %v3692_v30  ;;  %v2307_v55 = vpack.c.bf16 %v2142_v14, %v2138_v60  ;;  %v3700_v51 = vld [vmem:[#allocation8 + $0xc8] sm:$0xff]  ;;  %v2025_v62 = vld [vmem:[#allocation5 + $0x40] sm:$0xf] }
 0x239   :  { %v2843_v45 = vrot.slane %v2842_v28, 4  ;;  %v4936_v57 = vpack.c.bf16 %v3693_v39, %v3691_v33  ;;  %v2805_v11 = vunpack.c.l.bf16 %v2757_v10  ;;  %v7441_v3 = vmov 0.0   ;;  %v3699_v0 = vld [vmem:[#allocation8 + $0xc0] sm:$0xff] }
 0x23a   :  { %v7095_v1 = vpop.permute.xlu0 %2201  ;;  %v2870_v37 = vadd.f32 %v2869_v52, %v2868_v9  ;;  %v2806_v41 = vunpack.c.l.bf16 %v2758_v34  ;;  %v4938_v9 = vpack.c.bf16 %v3698_v6, %v3696_v29  ;;  %v2472_v14 = vrot.slane %v2307_v55, %v5823_v24  ;;  %3828 = vmatprep.mubr.f32.mxu0 %v7441_v3  ;;  %v3704_v34 = vld [vmem:[#allocation8 + $0xe8] sm:$0xff] }
 0x23b   :  { %v7097_v18 = vpop.permute.xlu1 %2197  ;;  %v2844_v20 = vadd.f32 %v2843_v45, %v2842_v28  ;;  %4933 = vmatpush1.bf16.msra.mxu0 %v4932_v48  ;;  %v3702_v28 = vld [vmem:[#allocation8 + $0xd8] sm:$0xff]  ;;  %v2479_v50 = vrot.slane %v2307_v55, %v5826_v25  ;;  %v4940_v7 = vpack.c.bf16 %v3697_v36, %v3695_v40  ;;  %v3734_v33 = vrot.slane %v7085_v35, 7  ;;  %v3703_v35 = vld [vmem:[#allocation8 + $0xe0] sm:$0xff] }
 0x23c   :  { %v2871_v27 = vrot.slane %v2870_v37, 1  ;;  %4935 = vmatprep.subr.bf16.mxu0 %v4934_v53  ;;  %v2873_v45 = vadd.f32 %v2806_v41, %v2805_v11  ;;  %v4942_v30 = vpack.c.bf16 %v3702_v28, %v3700_v51  ;;  %v2760_v48 = vmul.bf16 %v2472_v14, %v2024_v58  ;;  %v3706_v53 = vld [vmem:[#allocation8 + $0xf8] sm:$0xff]  ;;  %v3705_v41 = vld [vmem:[#allocation8 + $0xf0] sm:$0xff]  ;;  %v2026_v36 = vld [vmem:[#allocation5 + $0x44] sm:$0xf] }
 0x23d   :  { %v2845_v13 = vrot.slane %v2844_v20, 2  ;;  %v2761_v39 = vmul.bf16 %v2479_v50, %v2025_v62  ;;  %v7110_v55 = vmax.f32 %v6937_v31, 1.0  ;;  %v3736_v29 = vrot.slane %v7043_v4, 6  ;;  %v7195_v31 = vld [vmem:[#allocation10 + $0x20] sm:$0xff] }
 0x23e   :  { %v2872_v5 = vadd.f32 %v2871_v27, %v2870_v37  ;;  %v3701_v37 = vld [vmem:[#allocation8 + $0xd0] sm:$0xff]  ;;  %v4946_v11 = vpack.c.bf16 %v3706_v53, %v3704_v34  ;;  %v4948_v50 = vpack.c.bf16 %v3705_v41, %v3703_v35 }
 0x23f   :  { %v2131_v56 = vpop.permute.xlu1 %2130  ;;  %v2846_v19 = vadd.f32 %v2845_v13, %v2844_v20  ;;  %4937 = vmatpush1.bf16.msra.mxu0 %v4936_v57  ;;  %v2983_v13 = vrot.slane %v6870_v22, 4  ;;  %v2809_v14 = vunpack.c.l.bf16 %v2761_v39  ;;  %v2027_v39 = vld [vmem:[#allocation5 + $0x48] sm:$0xf] }
 0x240   :  { %v2306_v59 = vpack.c.bf16 %v2131_v56, %v2131_v56  ;;  %v5337_v38 = vpop.eup %5336  ;;  %4939 = vmatprep.subr.bf16.mxu0 %v4938_v9  ;;  %v2808_v9 = vunpack.c.l.bf16 %v2760_v48 }
 0x241   :  { %v7099_v21 = vpop.permute.xlu0 %2152  ;;  %v2847_v17 = vrot.slane %v2846_v19, 1  ;;  %v5339_v63 = vpop.eup %5338  ;;  %5340 = vrcp.f32 %v2983_v13 }
 0x242   :  { %v2465_v60 = vrot.slane %v2306_v59, %v5823_v24  ;;  %v3017_v16 = vmul.f32 %v5339_v63, %v2872_v5  ;;  %v2315_v59 = vpack.c.bf16 %v7095_v1, %v7097_v18  ;;  %v3969_v5 = vld [vmem:[#allocation10 + $0x8] sm:$0xff] }
 0x243   :  { %v2157_v52 = vpop.permute.xlu1 %2156  ;;  %v2848_v15 = vadd.f32 %v2847_v17, %v2846_v19  ;;  %4941 = vmatpush1.bf16.msra.mxu0 %v4940_v7  ;;  %v4944_v19 = vpack.c.bf16 %v3701_v37, %v3699_v0  ;;  %v3971_v17 = vld [vmem:[#allocation10 + $0x18] sm:$0xff]  ;;  %v2036_v63 = vld [vmem:[#allocation5 + $0x6c] sm:$0xf]  ;;  %v2988_v0 = vrot.slane %v7110_v55, 2 }
 0x244   :  { %v2759_v42 = vmul.bf16 %v2465_v60, %v2023_v8  ;;  %4943 = vmatprep.subr.bf16.mxu0 %v4942_v30  ;;  %v3738_v4 = vrot.slane %v3017_v16, 5  ;;  %v2309_v28 = vpack.c.bf16 %v2157_v52, %v7099_v21  ;;  %v4950_v7 = vpack.c.bf16 %v3971_v17, %v3969_v5  ;;  %v2037_v52 = vld [vmem:[#allocation5 + $0x70] sm:$0xf] }
 0x245   :  { %v7105_v44 = vpop.permute.xlu0 %2212  ;;  %v3011_v20 = vmul.f32 %v5337_v38, %v2848_v15  ;;  %v2556_v15 = vrot.slane %v2315_v59, %v5823_v24  ;;  %v2881_v21 = vadd.f32 %v2809_v14, %v2808_v9 }
 0x246   :  { %v2807_v10 = vunpack.c.l.bf16 %v2759_v42  ;;  %v2987_v42 = vrot.slane %v7110_v55, 1  ;;  %v2500_v13 = vrot.slane %v2309_v28, %v5826_v25 }
 0x247   :  { %v2217_v27 = vpop.permute.xlu1 %2216  ;;  %v3735_v8 = vsel %vm3123_vm3, %v3734_v33, %v3011_v20  ;;  %4945 = vmatpush1.bf16.msra.mxu0 %v4944_v19  ;;  %v2984_v20 = vrot.slane %v6870_v22, 5  ;;  %v2772_v53 = vmul.bf16 %v2556_v15, %v2036_v63  ;;  %v7140_v15 = vld [vmem:[#allocation10] sm:$0xff] }
 0x248   :  { %v2874_v6 = vadd.f32 %v2873_v45, %v2807_v10  ;;  %v3737_v1 = vsel %vm3126_vm4, %v3736_v29, %v3735_v8  ;;  %4947 = vmatprep.subr.bf16.mxu0 %v4946_v11  ;;  %v2563_v45 = vrot.slane %v2315_v59, %v5826_v25  ;;  %v2493_v10 = vrot.slane %v2309_v28, %v5823_v24 }
 0x249   :  { %v2146_v56 = vpop.permute.xlu0 %2145  ;;  %v7120_v38 = vsel %vm3129_vm5, %v3738_v4, %v3737_v1  ;;  %5342 = vrcp.f32 %v2987_v42  ;;  %v2317_v19 = vpack.c.bf16 %v2217_v27, %v7105_v44  ;;  %v2989_v11 = vrot.slane %v7110_v55, 3  ;;  %v2038_v27 = vld [vmem:[#allocation5 + $0x74] sm:$0xf] }
 0x24a   :  { %v2308_v57 = vpack.c.bf16 %v2146_v56, %v2146_v56  ;;  %v2875_v40 = vrot.slane %v2874_v6, 4  ;;  %v2773_v29 = vmul.bf16 %v2563_v45, %v2037_v52  ;;  %v2028_v56 = vld [vmem:[#allocation5 + $0x4c] sm:$0xf]  ;;  %5344 = vrcp.f32 %v2988_v0 }
 0x24b   :  { %v2168_v51 = vpop.permute.xlu1 %2167  ;;  %4949 = vmatpush1.bf16.msra.mxu0 %v4948_v50  ;;  %5346 = vrcp.f32 %v2984_v20  ;;  %v2763_v41 = vmul.bf16 %v2493_v10, %v2027_v39  ;;  %v2820_v5 = vunpack.c.l.bf16 %v2772_v53  ;;  %v2764_v4 = vmul.bf16 %v2500_v13, %v2028_v56  ;;  %v2031_v20 = vld [vmem:[#allocation5 + $0x58] sm:$0xf]  ;;  %v2029_v39 = vld [vmem:[#allocation5 + $0x50] sm:$0xf] }
 0x24c   :  { %v2486_v60 = vrot.slane %v2308_v57, %v5823_v24  ;;  %v2876_v18 = vadd.f32 %v2875_v40, %v2874_v6  ;;  %4951 = vmatprep.subr.bf16.mxu0 %v4950_v7  ;;  %5348 = vrcp.f32 %v7110_v55  ;;  %v2821_v14 = vunpack.c.l.bf16 %v2773_v29  ;;  %v2040_v7 = vld [vmem:[#allocation5 + $0x7c] sm:$0xf] }
 0x24d   :  { %v2172_v58 = vpop.permute.xlu0 %2171  ;;  %v2577_v44 = vrot.slane %v2317_v19, %v5823_v24  ;;  %5350 = vrcp.f32 %v2989_v11  ;;  %v2811_v42 = vunpack.c.l.bf16 %v2763_v41  ;;  %v2584_v63 = vrot.slane %v2317_v19, %v5826_v25  ;;  %v7151_v56 = vld [vmem:[#allocation10 + $0x38] sm:$0xff] }
 0x24e   :  { %v2762_v62 = vmul.bf16 %v2486_v60, %v2026_v36  ;;  %v2877_v30 = vrot.slane %v2876_v18, 2  ;;  %v2311_v8 = vpack.c.bf16 %v2172_v58, %v2168_v51  ;;  %v5341_v36 = vpop.eup %5340  ;;  %v2039_v60 = vld [vmem:[#allocation5 + $0x78] sm:$0xf]  ;;  %v2985_v51 = vrot.slane %v6870_v22, 6 }
 0x24f   :  { %v7126_v16 = vpop.permute.xlu1 %2182  ;;  %v2986_v58 = vrot.slane %v6870_v22, 7  ;;  %v2812_v52 = vunpack.c.l.bf16 %v2764_v4  ;;  %v2913_v53 = vadd.f32 %v2821_v14, %v2820_v5 }
 0x250   :  { %v2810_v37 = vunpack.c.l.bf16 %v2762_v62  ;;  %v2878_v48 = vadd.f32 %v2877_v30, %v2876_v18  ;;  %v7142_v62 = vld [vmem:[#allocation10 + $0x10] sm:$0xff]  ;;  %v2514_v45 = vrot.slane %v2311_v8, %v5823_v24  ;;  %v2521_v30 = vrot.slane %v2311_v8, %v5826_v25 }
 0x251   :  { %v7130_v34 = vpop.permute.xlu0 %2186  ;;  %5352 = vrcp.f32 %v2985_v51 }
 0x252   :  { %v2882_v33 = vadd.f32 %v2881_v21, %v2810_v37  ;;  %v2879_v6 = vrot.slane %v2878_v48, 1  ;;  %v2030_v37 = vld [vmem:[#allocation5 + $0x54] sm:$0xf]  ;;  %v2767_v5 = vmul.bf16 %v2521_v30, %v2031_v20  ;;  %v2042_v20 = vld [vmem:[#allocation5 + $0x84] sm:$0xf]  ;;  %5354 = vrcp.f32 %v2986_v58 }
 0x253   :  { %v2206_v57 = vpop.permute.xlu1 %2205  ;;  %v7153_v19 = vpop.eup %5342 }
 0x254   :  { %v2883_v59 = vrot.slane %v2882_v33, 4  ;;  %v2880_v35 = vadd.f32 %v2879_v6, %v2878_v48  ;;  %v2316_v40 = vpack.c.bf16 %v2206_v57, %v2206_v57  ;;  %v7149_v6 = vld [vmem:[#allocation10 + $0x28] sm:$0xff]  ;;  %v7158_v8 = vpop.eup %5344 }
 0x255   :  { %v2228_v9 = vpop.permute.xlu0 %2227  ;;  %v5347_v14 = vpop.eup %5346 }
 0x256   :  { %v2884_v17 = vadd.f32 %v2883_v59, %v2882_v33  ;;  %v2570_v1 = vrot.slane %v2316_v40, %v5823_v24  ;;  %v3019_v18 = vmul.f32 %v5341_v36, %v2880_v35  ;;  %v2775_v33 = vmul.bf16 %v2577_v44, %v2039_v60 }
 0x257   :  { %v2232_v50 = vpop.permute.xlu1 %2231  ;;  %v2776_v40 = vmul.bf16 %v2584_v63, %v2040_v7  ;;  %v2766_v36 = vmul.bf16 %v2514_v45, %v2030_v37  ;;  %v2889_v44 = vadd.f32 %v2812_v52, %v2811_v42  ;;  %v7165_v7 = vpop.eup %5348  ;;  %v2815_v37 = vunpack.c.l.bf16 %v2767_v5 }
 0x258   :  { %v2885_v28 = vrot.slane %v2884_v17, 2  ;;  %v3740_v10 = vrot.slane %v3019_v18, 4  ;;  %v2774_v13 = vmul.bf16 %v2570_v1, %v2038_v27  ;;  %v2319_v11 = vpack.c.bf16 %v2232_v50, %v2228_v9  ;;  %v2041_v1 = vld [vmem:[#allocation5 + $0x80] sm:$0xf]  ;;  %v2035_v18 = vld [vmem:[#allocation5 + $0x68] sm:$0xf] }
 0x259   :  { %v2161_v0 = vpop.permute.xlu0 %2160  ;;  %v2823_v9 = vunpack.c.l.bf16 %v2775_v33  ;;  %v2814_v52 = vunpack.c.l.bf16 %v2766_v36  ;;  %v2034_v36 = vld [vmem:[#allocation5 + $0x64] sm:$0xf] }
 0x25a   :  { %v2886_v21 = vadd.f32 %v2885_v28, %v2884_v17  ;;  %v2310_v48 = vpack.c.bf16 %v2161_v0, %v2161_v0  ;;  %v3741_v41 = vsel %vm3132_vm6, %v3740_v10, %v7120_v38  ;;  %v2313_v28 = vpack.c.bf16 %v7130_v34, %v7126_v16  ;;  %v7169_v16 = vpop.eup %5350 }
 0x25b   :  { %v2221_v35 = vpop.permute.xlu1 %2220  ;;  %v2822_v38 = vunpack.c.l.bf16 %v2774_v13  ;;  %v2598_v45 = vrot.slane %v2319_v11, %v5823_v24  ;;  %v2605_v30 = vrot.slane %v2319_v11, %v5826_v25 }
 0x25c   :  { %v2887_v59 = vrot.slane %v2886_v21, 1  ;;  %v2507_v57 = vrot.slane %v2310_v48, %v5823_v24  ;;  %v2318_v4 = vpack.c.bf16 %v2221_v35, %v2221_v35  ;;  %v2043_v48 = vld [vmem:[#allocation5 + $0x88] sm:$0xf]  ;;  %v2542_v35 = vrot.slane %v2313_v28, %v5826_v25 }
 0x25d   :  { %v2243_v17 = vpop.permute.xlu0 %2242  ;;  %v2914_v11 = vadd.f32 %v2913_v53, %v2822_v38  ;;  %v2778_v5 = vmul.bf16 %v2598_v45, %v2042_v20  ;;  %v2044_v38 = vld [vmem:[#allocation5 + $0x8c] sm:$0xf] }
 0x25e   :  { %v2888_v60 = vadd.f32 %v2887_v59, %v2886_v21  ;;  %v2765_v27 = vmul.bf16 %v2507_v57, %v2029_v39  ;;  %v2591_v50 = vrot.slane %v2318_v4, %v5823_v24  ;;  %v2824_v21 = vunpack.c.l.bf16 %v2776_v40  ;;  %v2032_v4 = vld [vmem:[#allocation5 + $0x5c] sm:$0xf]  ;;  %v2033_v40 = vld [vmem:[#allocation5 + $0x60] sm:$0xf] }
 0x25f   :  { %v2247_v42 = vpop.permute.xlu1 %2246  ;;  %v2535_v57 = vrot.slane %v2313_v28, %v5823_v24  ;;  %v2770_v20 = vmul.bf16 %v2542_v35, %v2034_v36 }
 0x260   :  { %v2813_v63 = vunpack.c.l.bf16 %v2765_v27  ;;  %v3021_v0 = vmul.f32 %v5347_v14, %v2888_v60  ;;  %v2777_v33 = vmul.bf16 %v2591_v50, %v2041_v1  ;;  %v2321_v13 = vpack.c.bf16 %v2247_v42, %v2243_v17 }
 0x261   :  { %v2176_v10 = vpop.permute.xlu0 %2175  ;;  %v2779_v14 = vmul.bf16 %v2605_v30, %v2043_v48  ;;  %v2921_v17 = vadd.f32 %v2824_v21, %v2823_v9  ;;  %v2897_v1 = vadd.f32 %v2815_v37, %v2814_v52  ;;  %v2769_v30 = vmul.bf16 %v2535_v57, %v2033_v40  ;;  %v2046_v9 = vld [vmem:[#allocation5 + $0x94] sm:$0xf] }
 0x262   :  { %v2890_v34 = vadd.f32 %v2889_v44, %v2813_v63  ;;  %v2312_v39 = vpack.c.bf16 %v2176_v10, %v2176_v10  ;;  %v3742_v59 = vrot.slane %v3021_v0, 3  ;;  %v2825_v63 = vunpack.c.l.bf16 %v2777_v33 }
 0x263   :  { %v2191_v27 = vpop.permute.xlu1 %2190  ;;  %v2619_v51 = vrot.slane %v2321_v13, %v5823_v24  ;;  %v2626_v45 = vrot.slane %v2321_v13, %v5826_v25  ;;  %v2915_v48 = vrot.slane %v2914_v11, 4  ;;  %v2826_v52 = vunpack.c.l.bf16 %v2778_v5 }
 0x264   :  { %v2528_v60 = vrot.slane %v2312_v39, %v5823_v24  ;;  %v7177_v44 = vsel %vm3135_vm7, %v3742_v59, %v3741_v41  ;;  %v2891_v50 = vrot.slane %v2890_v34, 4  ;;  %v2045_v41 = vld [vmem:[#allocation5 + $0x90] sm:$0xf]  ;;  %v2314_v21 = vpack.c.bf16 %v2191_v27, %v2191_v27 }
 0x265   :  { %v2236_v28 = vpop.permute.xlu0 %2235  ;;  %v2827_v37 = vunpack.c.l.bf16 %v2779_v14  ;;  %v2990_v13 = vrot.slane %v7110_v55, 4  ;;  %v2781_v40 = vmul.bf16 %v2619_v51, %v2045_v41  ;;  %v2782_v36 = vmul.bf16 %v2626_v45, %v2046_v9  ;;  %v2049_v51 = vld [vmem:[#allocation5 + $0xa0] sm:$0xf] }
 0x266   :  { %v2768_v53 = vmul.bf16 %v2528_v60, %v2032_v4  ;;  %v2320_v42 = vpack.c.bf16 %v2236_v28, %v2236_v28  ;;  %v7179_v0 = vpop.f32.mrb[2].mxu1  ;;  %v2892_v4 = vadd.f32 %v2891_v50, %v2890_v34  ;;  %v2922_v60 = vadd.f32 %v2921_v17, %v2825_v63  ;;  %v7190_v63 = vpop.eup %5352 }
 0x267   :  { %7482 = vst [vmem:[#allocation24_spill] sm:$0xff] %v7179_v0  ;;  %v7183_v10 = vpop.f32.mrb[3].mxu1  ;;  %v2258_v59 = vpop.permute.xlu1 %2257  ;;  %v2817_v27 = vunpack.c.l.bf16 %v2769_v30  ;;  %v2818_v5 = vunpack.c.l.bf16 %v2770_v20  ;;  %v2916_v14 = vadd.f32 %v2915_v48, %v2914_v11  ;;  %v2829_v41 = vunpack.c.l.bf16 %v2781_v40  ;;  %v2047_v48 = vld [vmem:[#allocation5 + $0x98] sm:$0xf] }
 0x268   :  { %v2816_v33 = vunpack.c.l.bf16 %v2768_v53  ;;  %v2612_v39 = vrot.slane %v2320_v42, %v5823_v24  ;;  %v2549_v53 = vrot.slane %v2314_v21, %v5823_v24  ;;  %v2929_v42 = vadd.f32 %v2827_v37, %v2826_v52 }
 0x269   :  { %v2262_v28 = vpop.permute.xlu0 %2261  ;;  %v2893_v22 = vrot.slane %v2892_v4, 2  ;;  %v2923_v58 = vrot.slane %v2922_v60, 4  ;;  %v2830_v30 = vunpack.c.l.bf16 %v2782_v36  ;;  %v2905_v9 = vadd.f32 %v2818_v5, %v2817_v27 }
 0x26a   :  { %v2898_v57 = vadd.f32 %v2897_v1, %v2816_v33  ;;  %v2780_v35 = vmul.bf16 %v2612_v39, %v2044_v38  ;;  %v2323_v17 = vpack.c.bf16 %v2262_v28, %v2258_v59  ;;  %v2771_v29 = vmul.bf16 %v2549_v53, %v2035_v18  ;;  %v2048_v38 = vld [vmem:[#allocation5 + $0x9c] sm:$0xf] }
 0x26b   :  { %v2251_v50 = vpop.permute.xlu1 %2250  ;;  %v2917_v33 = vrot.slane %v2916_v14, 2  ;;  %v2924_v53 = vadd.f32 %v2923_v58, %v2922_v60  ;;  %5356 = vrcp.f32 %v2990_v13 }
 0x26c   :  { %v2899_v3 = vrot.slane %v2898_v57, 4  ;;  %v2828_v34 = vunpack.c.l.bf16 %v2780_v35  ;;  %v2322_v45 = vpack.c.bf16 %v2251_v50, %v2251_v50  ;;  %v2640_v11 = vrot.slane %v2323_v17, %v5823_v24 }
 0x26d   :  { %v2273_v1 = vpop.permute.xlu0 %2272  ;;  %v2647_v20 = vrot.slane %v2323_v17, %v5826_v25  ;;  %v2819_v52 = vunpack.c.l.bf16 %v2771_v29  ;;  %v2894_v35 = vadd.f32 %v2893_v22, %v2892_v4  ;;  %v2937_v17 = vadd.f32 %v2830_v30, %v2829_v41 }
 0x26e   :  { %v2900_v21 = vadd.f32 %v2899_v3, %v2898_v57  ;;  %v2633_v37 = vrot.slane %v2322_v45, %v5823_v24  ;;  %v2930_v39 = vadd.f32 %v2929_v42, %v2828_v34  ;;  %v2784_v59 = vmul.bf16 %v2640_v11, %v2048_v38  ;;  %v5355_v57 = vpop.eup %5354  ;;  %v2050_v42 = vld [vmem:[#allocation5 + $0xa4] sm:$0xf] }
 0x26f   :  { %v2785_v18 = vmul.bf16 %v2647_v20, %v2049_v51  ;;  %v2277_v28 = vpop.permute.xlu1 %2276  ;;  %v2906_v50 = vadd.f32 %v2905_v9, %v2819_v52  ;;  %v7199_v51 = vadd.f32 %v2917_v33, %v2916_v14  ;;  %v2925_v11 = vrot.slane %v2924_v53, 2 }
 0x270   :  { %v2783_v36 = vmul.bf16 %v2633_v37, %v2047_v48  ;;  %v2832_v27 = vunpack.c.l.bf16 %v2784_v59  ;;  %v2901_v5 = vrot.slane %v2900_v21, 2  ;;  %v2325_v38 = vpack.c.bf16 %v2277_v28, %v2273_v1  ;;  %v2051_v1 = vld [vmem:[#allocation5 + $0xa8] sm:$0xf] }
 0x271   :  { %v2266_v40 = vpop.permute.xlu0 %2265  ;;  %v2833_v3 = vunpack.c.l.bf16 %v2785_v18  ;;  %v2907_v45 = vrot.slane %v2906_v50, 4  ;;  %v2931_v4 = vrot.slane %v2930_v39, 4  ;;  %v2895_v37 = vrot.slane %v2894_v35, 1  ;;  %v2054_v18 = vld [vmem:[#allocation5 + $0xb4] sm:$0xf] }
 0x272   :  { %v2324_v29 = vpack.c.bf16 %v2266_v40, %v2266_v40  ;;  %v2831_v34 = vunpack.c.l.bf16 %v2783_v36  ;;  %v2661_v14 = vrot.slane %v2325_v38, %v5823_v24  ;;  %v2668_v33 = vrot.slane %v2325_v38, %v5826_v25 }
 0x273   :  { %v2288_v22 = vpop.permute.xlu1 %2287  ;;  %v2908_v41 = vadd.f32 %v2907_v45, %v2906_v50  ;;  %v2945_v48 = vadd.f32 %v2833_v3, %v2832_v27  ;;  %v2902_v28 = vadd.f32 %v2901_v5, %v2900_v21  ;;  %v2919_v40 = vrot.slane %v7199_v51, 1  ;;  %v2052_v50 = vld [vmem:[#allocation5 + $0xac] sm:$0xf] }
 0x274   :  { %v2654_v60 = vrot.slane %v2324_v29, %v5823_v24  ;;  %v2938_v30 = vadd.f32 %v2937_v17, %v2831_v34  ;;  %v2932_v36 = vadd.f32 %v2931_v4, %v2930_v39  ;;  %v2055_v17 = vld [vmem:[#allocation5 + $0xb8] sm:$0xf]  ;;  %v2896_v38 = vadd.f32 %v2895_v37, %v2894_v35 }
 0x275   :  { %v2292_v20 = vpop.permute.xlu0 %2291  ;;  %v2909_v27 = vrot.slane %v2908_v41, 2  ;;  %v2903_v34 = vrot.slane %v2902_v28, 1  ;;  %v2787_v58 = vmul.bf16 %v2661_v14, %v2051_v1  ;;  %v2788_v21 = vmul.bf16 %v2668_v33, %v2052_v50 }
 0x276   :  { %v2786_v9 = vmul.bf16 %v2654_v60, %v2050_v42  ;;  %v2327_v52 = vpack.c.bf16 %v2292_v20, %v2288_v22  ;;  %v2939_v59 = vrot.slane %v2938_v30, 4  ;;  %v2926_v60 = vadd.f32 %v2925_v11, %v2924_v53 }
 0x277   :  { %v2281_v39 = vpop.permute.xlu1 %2280  ;;  %v2904_v43 = vadd.f32 %v2903_v34, %v2902_v28  ;;  %v2933_v0 = vrot.slane %v2932_v36, 2  ;;  %v3023_v53 = vmul.f32 %v7190_v63, %v2896_v38  ;;  %v2835_v37 = vunpack.c.l.bf16 %v2787_v58 }
 0x278   :  { %v2834_v29 = vunpack.c.l.bf16 %v2786_v9  ;;  %v2682_v13 = vrot.slane %v2327_v52, %v5823_v24  ;;  %v2940_v3 = vadd.f32 %v2939_v59, %v2938_v30  ;;  %v2689_v45 = vrot.slane %v2327_v52, %v5826_v25 }
 0x279   :  { %v2296_v42 = vpop.permute.xlu0 %2295  ;;  %v2910_v30 = vadd.f32 %v2909_v27, %v2908_v41  ;;  %v3025_v11 = vmul.f32 %v5355_v57, %v2904_v43  ;;  %v2326_v35 = vpack.c.bf16 %v2281_v39, %v2281_v39  ;;  %v2836_v1 = vunpack.c.l.bf16 %v2788_v21 }
 0x27a   :  { %v2946_v22 = vadd.f32 %v2945_v48, %v2834_v29  ;;  %v2790_v20 = vmul.bf16 %v2682_v13, %v2054_v18  ;;  %v2791_v5 = vmul.bf16 %v2689_v45, %v2055_v17  ;;  %v2328_v12 = vpack.c.bf16 %v2296_v42, %v2296_v42  ;;  %v7211_v48 = vpop.eup %5356  ;;  %v2053_v18 = vld [vmem:[#allocation5 + $0xb0] sm:$0xf]  ;;  %v3979_v42 = vld [vmem:[#allocation10 + $0x58] sm:$0xff] }
 0x27b   :  { %v2941_v9 = vrot.slane %v2940_v3, 2  ;;  %v3744_v50 = vrot.slane %v3023_v53, 2  ;;  %v3746_v28 = vrot.slane %v3025_v11, 1  ;;  %v2675_v41 = vrot.slane %v2326_v35, %v5823_v24  ;;  %v3983_v53 = vld [vmem:[#allocation10 + $0x78] sm:$0xff] }
 0x27c   :  { %v2947_v4 = vrot.slane %v2946_v22, 4  ;;  %v2838_v61 = vunpack.c.l.bf16 %v2790_v20  ;;  %v2839_v59 = vunpack.c.l.bf16 %v2791_v5  ;;  %v2696_v25 = vrot.slane %v2328_v12, %v5823_v24  ;;  %v3978_v5 = vld [vmem:[#allocation10 + $0x50] sm:$0xff] }
 0x27d   :  { %v2942_v29 = vadd.f32 %v2941_v9, %v2940_v3  ;;  %v2934_v17 = vadd.f32 %v2933_v0, %v2932_v36  ;;  %v2911_v13 = vrot.slane %v2910_v30, 1  ;;  %v2927_v45 = vrot.slane %v2926_v60, 1  ;;  %v3977_v3 = vld [vmem:[#allocation10 + $0x48] sm:$0xff] }
 0x27e   :  { %v2948_v52 = vadd.f32 %v2947_v4, %v2946_v22  ;;  %v2961_v14 = vadd.f32 %v2839_v59, %v2838_v61  ;;  %v2792_v33 = vmul.bf16 %v2696_v25, %v2056_v54  ;;  %v3745_v43 = vsel %vm3138_vm8, %v3744_v50, %v7177_v44  ;;  %v3985_v50 = vld [vmem:[#allocation10 + $0x88] sm:$0xff] }
 0x27f   :  { %v2789_v63 = vmul.bf16 %v2675_v41, %v2053_v18  ;;  %v2991_v57 = vrot.slane %v7110_v55, 5  ;;  %v2920_v61 = vadd.f32 %v2919_v40, %v7199_v51  ;;  %v3747_v58 = vsel %vm3141_vm9, %v3746_v28, %v3745_v43  ;;  %v3976_v40 = vld [vmem:[#allocation10 + $0x40] sm:$0xff]  ;;  %v3987_v28 = vld [vmem:[#allocation10 + $0x98] sm:$0xff] }
 0x280   :  { %v2949_v12 = vrot.slane %v2948_v52, 2  ;;  %v2840_v27 = vunpack.c.l.bf16 %v2792_v33  ;;  %v2992_v24 = vrot.slane %v7110_v55, 6  ;;  %v2943_v0 = vrot.slane %v2942_v29, 1  ;;  %3829 = vmatmul.mubr.f32.vlgmr.msra.gmra.mrb[0].mxu0 %v3747_v58 }
 0x281   :  { %v2953_v36 = vadd.f32 %v2836_v1, %v2835_v37  ;;  %v2837_v34 = vunpack.c.l.bf16 %v2789_v63  ;;  %v2993_v22 = vrot.slane %v7110_v55, 7  ;;  %v2935_v20 = vrot.slane %v2934_v17, 1  ;;  %v3984_v63 = vld [vmem:[#allocation10 + $0x80] sm:$0xff] }
 0x282   :  { %v2962_v54 = vadd.f32 %v2961_v14, %v2840_v27  ;;  %v2912_v44 = vadd.f32 %v2911_v13, %v2910_v30  ;;  %v2950_v38 = vadd.f32 %v2949_v12, %v2948_v52  ;;  %v7483_v51 = vpack.c.bf16 %v7142_v62, %v7140_v15  ;;  %v3981_v52 = vld [vmem:[#allocation10 + $0x68] sm:$0xff]  ;;  %v3982_v14 = vld [vmem:[#allocation10 + $0x70] sm:$0xff] }
 0x283   :  { %v7484_v39 = vmov 0.0   ;;  %v2928_v4 = vadd.f32 %v2927_v45, %v2926_v60  ;;  %v2954_v9 = vadd.f32 %v2953_v36, %v2837_v34  ;;  %v7485_v59 = vpack.c.bf16 %v7151_v56, %v7149_v6  ;;  %v3980_v56 = vld [vmem:[#allocation10 + $0x60] sm:$0xff] }
 0x284   :  { %v2963_v21 = vrot.slane %v2962_v54, 4  ;;  %4953 = vmatpush1.bf16.msra.mxu0 %v7483_v51  ;;  %3834 = vmatprep.mubr.f32.mxu0 %v7484_v39  ;;  %v4958_v25 = vpack.c.bf16 %v3979_v42, %v3977_v3  ;;  %5358 = vrcp.f32 %v2991_v57  ;;  %v3029_v55 = vmul.f32 %v7153_v19, %v2920_v61  ;;  %v3986_v57 = vld [vmem:[#allocation10 + $0x90] sm:$0xff]  ;;  %v3989_v61 = vld [vmem:[#allocation10 + $0xa8] sm:$0xff] }
 0x285   :  { %4955 = vmatprep.subr.bf16.mxu0 %v7485_v59  ;;  %5360 = vrcp.f32 %v2992_v24  ;;  %v2944_v15 = vadd.f32 %v2943_v0, %v2942_v29  ;;  %v2955_v62 = vrot.slane %v2954_v9, 4  ;;  %v4960_v11 = vpack.c.bf16 %v3978_v5, %v3976_v40  ;;  %v3993_v51 = vld [vmem:[#allocation10 + $0xc8] sm:$0xff]  ;;  %v3995_v40 = vld [vmem:[#allocation10 + $0xd8] sm:$0xff] }
 0x286   :  { %v2964_v30 = vadd.f32 %v2963_v21, %v2962_v54  ;;  %5362 = vrcp.f32 %v2993_v22  ;;  %v2936_v35 = vadd.f32 %v2935_v20, %v2934_v17  ;;  %v3027_v60 = vmul.f32 %v7165_v7, %v2912_v44  ;;  %v3991_v54 = vld [vmem:[#allocation10 + $0xb8] sm:$0xff]  ;;  %v3988_v44 = vld [vmem:[#allocation10 + $0xa0] sm:$0xff] }
 0x287   :  { %v2951_v37 = vrot.slane %v2950_v38, 1  ;;  %v7486_v6 = vpack.c.bf16 %v7197_v26, %v7195_v31  ;;  %v3031_v19 = vmul.f32 %v7158_v8, %v2928_v4  ;;  %v2956_v33 = vadd.f32 %v2955_v62, %v2954_v9 }
 0x288   :  { %v2965_v1 = vrot.slane %v2964_v30, 2  ;;  %v4962_v18 = vpack.c.bf16 %v3983_v53, %v3981_v52  ;;  %v3748_v29 = vrot.slane %v3029_v55, 7  ;;  %v4964_v13 = vpack.c.bf16 %v3982_v14, %v3980_v56  ;;  %v3992_v53 = vld [vmem:[#allocation10 + $0xc0] sm:$0xff] }
 0x289   :  { %4957 = vmatpush1.bf16.msra.mxu0 %v7486_v6  ;;  %v2957_v17 = vrot.slane %v2956_v33, 2  ;;  %v3035_v7 = vmul.f32 %v7211_v48, %v2944_v15  ;;  %v3033_v12 = vmul.f32 %v7169_v16, %v2936_v35  ;;  %v2952_v27 = vadd.f32 %v2951_v37, %v2950_v38  ;;  %v3990_v38 = vld [vmem:[#allocation10 + $0xb0] sm:$0xff]  ;;  %v3999_v35 = vld [vmem:[#allocation10 + $0xf8] sm:$0xff] }
 0x28a   :  { %4959 = vmatprep.subr.bf16.mxu0 %v4958_v25  ;;  %v2966_v41 = vadd.f32 %v2965_v1, %v2964_v30  ;;  %v3749_v26 = vsel %vm3123_vm3, %v3748_v29, %v3027_v60  ;;  %v3750_v45 = vrot.slane %v3031_v19, 6  ;;  %v4966_v43 = vpack.c.bf16 %v3987_v28, %v3985_v50  ;;  %v3994_v15 = vld [vmem:[#allocation10 + $0xd0] sm:$0xff]  ;;  %v3996_v19 = vld [vmem:[#allocation10 + $0xe0] sm:$0xff]  ;;  %v4003_v29 = vld [vmem:[#allocation10 + $0x118] sm:$0xff] }
 0x28b   :  { %v2958_v8 = vadd.f32 %v2957_v17, %v2956_v33  ;;  %v3754_v24 = vrot.slane %v3035_v7, 4  ;;  %v4968_v0 = vpack.c.bf16 %v3986_v57, %v3984_v63  ;;  %v3752_v34 = vrot.slane %v3033_v12, 5  ;;  %v3998_v33 = vld [vmem:[#allocation10 + $0xf0] sm:$0xff]  ;;  %v4007_v7 = vld [vmem:[#allocation10 + $0x138] sm:$0xff] }
 0x28c   :  { %v2967_v31 = vrot.slane %v2966_v41, 1  ;;  %v3751_v48 = vsel %vm3126_vm4, %v3750_v45, %v3749_v26  ;;  %v4970_v20 = vpack.c.bf16 %v3991_v54, %v3989_v61  ;;  %v4972_v25 = vpack.c.bf16 %v3990_v38, %v3988_v44  ;;  %v4002_v17 = vld [vmem:[#allocation10 + $0x110] sm:$0xff]  ;;  %v4004_v45 = vld [vmem:[#allocation10 + $0x120] sm:$0xff]  ;;  %v4021_v38 = vld [vmem:[#allocation10 + $0x1a8] sm:$0xff] }
 0x28d   :  { %4961 = vmatpush1.bf16.msra.mxu0 %v4960_v11  ;;  %v2959_v42 = vrot.slane %v2958_v8, 1  ;;  %v3753_v39 = vsel %vm3129_vm5, %v3752_v34, %v3751_v48  ;;  %v4974_v52 = vpack.c.bf16 %v3995_v40, %v3993_v51  ;;  %v3997_v11 = vld [vmem:[#allocation10 + $0xe8] sm:$0xff]  ;;  %v4976_v6 = vpack.c.bf16 %v3994_v15, %v3992_v53  ;;  %v4008_v61 = vld [vmem:[#allocation10 + $0x140] sm:$0xff]  ;;  %v4010_v54 = vld [vmem:[#allocation10 + $0x150] sm:$0xff] }
 0x28e   :  { %4963 = vmatprep.subr.bf16.mxu0 %v4962_v18  ;;  %v2968_v58 = vadd.f32 %v2967_v31, %v2966_v41  ;;  %v5359_v3 = vpop.eup %5358  ;;  %v3755_v9 = vsel %vm3132_vm6, %v3754_v24, %v3753_v39  ;;  %v4978_v14 = vpack.c.bf16 %v3999_v35, %v3997_v11  ;;  %v4001_v18 = vld [vmem:[#allocation10 + $0x108] sm:$0xff]  ;;  %v4980_v50 = vpack.c.bf16 %v3998_v33, %v3996_v19  ;;  %v4000_v41 = vld [vmem:[#allocation10 + $0x100] sm:$0xff]  ;;  %v4018_v44 = vld [vmem:[#allocation10 + $0x190] sm:$0xff] }
 0x28f   :  { %v5361_v16 = vpop.eup %5360  ;;  %v3037_v36 = vmul.f32 %v5359_v3, %v2952_v27  ;;  %v2960_v21 = vadd.f32 %v2959_v42, %v2958_v8  ;;  %v4982_v28 = vpack.c.bf16 %v4003_v29, %v4001_v18  ;;  %v4984_v27 = vpack.c.bf16 %v4002_v17, %v4000_v41  ;;  %v4006_v8 = vld [vmem:[#allocation10 + $0x130] sm:$0xff]  ;;  %v4015_v3 = vld [vmem:[#allocation10 + $0x178] sm:$0xff]  ;;  %v4012_v24 = vld [vmem:[#allocation10 + $0x160] sm:$0xff] }
 0x290   :  { %v5363_v22 = vpop.eup %5362  ;;  %v4988_v63 = vpack.c.bf16 %v4006_v8, %v4004_v45  ;;  %v4992_v42 = vpack.c.bf16 %v4010_v54, %v4008_v61  ;;  %v4022_v39 = vld [vmem:[#allocation10 + $0x1b0] sm:$0xff]  ;;  %v4031_v11 = vld [vmem:[#allocation10 + $0x1f8] sm:$0xff]  ;;  %v4032_v18 = vld [vmem:[#allocation10 + $0x200] sm:$0xff] }
 0x291   :  { %4965 = vmatpush1.bf16.msra.mxu0 %v4964_v13  ;;  %v3041_v5 = vmul.f32 %v5363_v22, %v2968_v58  ;;  %v3039_v4 = vmul.f32 %v5361_v16, %v2960_v21  ;;  %v3756_v55 = vrot.slane %v3037_v36, 3  ;;  %v4005_v13 = vld [vmem:[#allocation10 + $0x128] sm:$0xff]  ;;  %v4014_v16 = vld [vmem:[#allocation10 + $0x170] sm:$0xff]  ;;  %v4019_v36 = vld [vmem:[#allocation10 + $0x198] sm:$0xff] }
 0x292   :  { %4967 = vmatprep.subr.bf16.mxu0 %v4966_v43  ;;  %v4986_v26 = vpack.c.bf16 %v4007_v7, %v4005_v13  ;;  %v4009_v43 = vld [vmem:[#allocation10 + $0x148] sm:$0xff]  ;;  %v4996_v34 = vpack.c.bf16 %v4014_v16, %v4012_v24  ;;  %v4023_v21 = vld [vmem:[#allocation10 + $0x1b8] sm:$0xff]  ;;  %v4026_v53 = vld [vmem:[#allocation10 + $0x1d0] sm:$0xff] }
 0x293   :  { %v7240_v59 = vpop.f32.mrb[4].mxu1  ;;  %v3758_v62 = vrot.slane %v3039_v4, 2  ;;  %v3757_v60 = vsel %vm3135_vm7, %v3756_v55, %v3755_v9  ;;  %v3760_v37 = vrot.slane %v3041_v5, 1  ;;  %v4013_v58 = vld [vmem:[#allocation10 + $0x168] sm:$0xff]  ;;  %v5002_v40 = vpack.c.bf16 %v4023_v21, %v4021_v38  ;;  %v4020_v5 = vld [vmem:[#allocation10 + $0x1a0] sm:$0xff]  ;;  %v4027_v9 = vld [vmem:[#allocation10 + $0x1d8] sm:$0xff] }
 0x294   :  { %v7242_v30 = vpop.f32.mrb[5].mxu1  ;;  %v4994_v48 = vpack.c.bf16 %v4015_v3, %v4013_v58  ;;  %v4025_v4 = vld [vmem:[#allocation10 + $0x1c8] sm:$0xff]  ;;  %v4034_v29 = vld [vmem:[#allocation10 + $0x210] sm:$0xff]  ;;  %v4036_v7 = vld [vmem:[#allocation10 + $0x220] sm:$0xff] }
 0x295   :  { %4969 = vmatpush1.bf16.msra.mxu0 %v4968_v0  ;;  %v3759_v1 = vsel %vm3138_vm8, %v3758_v62, %v3757_v60  ;;  %v4017_v0 = vld [vmem:[#allocation10 + $0x188] sm:$0xff]  ;;  %v5006_v55 = vpack.c.bf16 %v4027_v9, %v4025_v4  ;;  %v5016_v17 = vpack.c.bf16 %v4034_v29, %v4032_v18  ;;  %v4040_v54 = vld [vmem:[#allocation10 + $0x240] sm:$0xff]  ;;  %v4042_v58 = vld [vmem:[#allocation10 + $0x250] sm:$0xff] }
 0x296   :  { %4971 = vmatprep.subr.bf16.mxu0 %v4970_v20  ;;  %v3761_v56 = vsel %vm3141_vm9, %v3760_v37, %v3759_v1  ;;  %v4998_v22 = vpack.c.bf16 %v4019_v36, %v4017_v0  ;;  %v4016_v20 = vld [vmem:[#allocation10 + $0x180] sm:$0xff]  ;;  %v4029_v62 = vld [vmem:[#allocation10 + $0x1e8] sm:$0xff]  ;;  %v4046_v0 = vld [vmem:[#allocation10 + $0x270] sm:$0xff] }
 0x297   :  { %3835 = vmatmul.mubr.f32.gmra.mrb[2].mxu0 %v3761_v56  ;;  %v5000_v51 = vpack.c.bf16 %v4018_v44, %v4016_v20  ;;  %v5010_v37 = vpack.c.bf16 %v4031_v11, %v4029_v62  ;;  %v4028_v1 = vld [vmem:[#allocation10 + $0x1e0] sm:$0xff]  ;;  %v4033_v56 = vld [vmem:[#allocation10 + $0x208] sm:$0xff]  ;;  %v4050_v38 = vld [vmem:[#allocation10 + $0x290] sm:$0xff] }
 0x298   :  { %4751 = vmatprep.mubr.msk.f32.mxu0 %vm3841_vm13, %v7051_v49  ;;  %v4011_v49 = vld [vmem:[#allocation10 + $0x158] sm:$0xff]  ;;  %v7259_v41 = vld [vmem:[%s7422_s11 + $0x1] ss:$8 sm:$0x3]  ;;  %v4054_v4 = vld [vmem:[#allocation10 + $0x2b0] sm:$0xff] }
 0x299   :  { %4973 = vmatpush1.bf16.msra.mxu0 %v4972_v25  ;;  %v4990_v57 = vpack.c.bf16 %v4011_v49, %v4009_v43  ;;  %v5004_v25 = vpack.c.bf16 %v4022_v39, %v4020_v5  ;;  %v7267_v45 = vrot.slane %v7259_v41, %v5738_v2  ;;  %v4041_v8 = vld [vmem:[#allocation10 + $0x248] sm:$0xff]  ;;  %v4043_v43 = vld [vmem:[#allocation10 + $0x258] sm:$0xff]  ;;  %v7487_v49 = vld [vmem:[#allocation25_spill] sm:$0xff] }
 0x29a   :  { %4975 = vmatprep.subr.bf16.mxu0 %v4974_v52  ;;  %v4024_v52 = vld [vmem:[#allocation10 + $0x1c0] sm:$0xff]  ;;  %vm3842_vm14 = vcmp.gt.f32.partialorder %v7487_v49, 0.0  ;;  %v5022_v61 = vpack.c.bf16 %v4043_v43, %v4041_v8  ;;  %v4049_v36 = vld [vmem:[#allocation10 + $0x288] sm:$0xff]  ;;  %v4058_v62 = vld [vmem:[#allocation10 + $0x2d0] sm:$0xff] }
 0x29b   :  { %v5008_v60 = vpack.c.bf16 %v4026_v53, %v4024_v52  ;;  %v4044_v16 = vld [vmem:[#allocation10 + $0x260] sm:$0xff]  ;;  %v4053_v21 = vld [vmem:[#allocation10 + $0x2a8] sm:$0xff]  ;;  %v4066_v29 = vld [vmem:[#allocation10 + $0x310] sm:$0xff] }
 0x29c   :  { %v4048_v44 = vld [vmem:[#allocation10 + $0x280] sm:$0xff]  ;;  %v4057_v9 = vld [vmem:[#allocation10 + $0x2c8] sm:$0xff]  ;;  %v4075_v43 = vld [vmem:[#allocation10 + $0x358] sm:$0xff] }
 0x29d   :  { %4977 = vmatpush1.bf16.msra.mxu0 %v4976_v6  ;;  %v4030_v6 = vld [vmem:[#allocation10 + $0x1f0] sm:$0xff]  ;;  %v4052_v39 = vld [vmem:[#allocation10 + $0x2a0] sm:$0xff]  ;;  %v4061_v11 = vld [vmem:[#allocation10 + $0x2e8] sm:$0xff] }
 0x29e   :  { %4979 = vmatprep.subr.bf16.mxu0 %v4978_v14  ;;  %v4035_v14 = vld [vmem:[#allocation10 + $0x218] sm:$0xff]  ;;  %v5012_v19 = vpack.c.bf16 %v4030_v6, %v4028_v1  ;;  %v4056_v53 = vld [vmem:[#allocation10 + $0x2c0] sm:$0xff]  ;;  %v4062_v6 = vld [vmem:[#allocation10 + $0x2f0] sm:$0xff] }
 0x29f   :  { %v7250_v12 = vpop.f32.mrb[6].mxu1  ;;  %v5014_v33 = vpack.c.bf16 %v4035_v14, %v4033_v56  ;;  %v4060_v1 = vld [vmem:[#allocation10 + $0x2e0] sm:$0xff]  ;;  %v4065_v56 = vld [vmem:[#allocation10 + $0x308] sm:$0xff]  ;;  %v4067_v14 = vld [vmem:[#allocation10 + $0x318] sm:$0xff] }
 0x2a0   :  { %v7252_v31 = vpop.f32.mrb[7].mxu1  ;;  %v4064_v18 = vld [vmem:[#allocation10 + $0x300] sm:$0xff]  ;;  %v4073_v8 = vld [vmem:[#allocation10 + $0x348] sm:$0xff] }
 0x2a1   :  { %4981 = vmatpush1.bf16.msra.mxu0 %v4980_v50  ;;  %v4037_v50 = vld [vmem:[#allocation10 + $0x228] sm:$0xff] }
 0x2a2   :  { %4983 = vmatprep.subr.bf16.mxu0 %v4982_v28  ;;  %v4039_v28 = vld [vmem:[#allocation10 + $0x238] sm:$0xff] }
 0x2a3   :  { %v5018_v13 = vpack.c.bf16 %v4039_v28, %v4037_v50  ;;  %v4069_v50 = vld [vmem:[#allocation10 + $0x328] sm:$0xff]  ;;  %v4071_v28 = vld [vmem:[#allocation10 + $0x338] sm:$0xff] }
 0x2a5   :  { %4985 = vmatpush1.bf16.msra.mxu0 %v4984_v27  ;;  %v4038_v27 = vld [vmem:[#allocation10 + $0x230] sm:$0xff] }
 0x2a6   :  { %4987 = vmatprep.subr.bf16.mxu0 %v4986_v26  ;;  %v7263_v26 = vadd.f32 %v7183_v10, %v7000_v23  ;;  %v7488_v10 = vld [vmem:[#allocation24_spill] sm:$0xff] }
 0x2a9   :  { %4989 = vmatpush1.bf16.msra.mxu0 %v4988_v63  ;;  %v5020_v63 = vpack.c.bf16 %v4038_v27, %v4036_v7  ;;  %v4068_v7 = vld [vmem:[#allocation10 + $0x320] sm:$0xff]  ;;  %v4070_v27 = vld [vmem:[#allocation10 + $0x330] sm:$0xff] }
 0x2aa   :  { %4991 = vmatprep.subr.bf16.mxu0 %v4990_v57  ;;  %v7278_v57 = vadd.f32 %v7488_v10, %v6993_v32  ;;  %v5054_v10 = vpack.c.bf16 %v4075_v43, %v4073_v8  ;;  %v4100_v8 = vld [vmem:[#allocation10 + $0x420] sm:$0xff]  ;;  %v4102_v43 = vld [vmem:[#allocation10 + $0x430] sm:$0xff] }
 0x2ad   :  { %4993 = vmatpush1.bf16.msra.mxu0 %v4992_v42  ;;  %v4045_v42 = vld [vmem:[#allocation10 + $0x268] sm:$0xff] }
 0x2ae   :  { %4995 = vmatprep.subr.bf16.mxu0 %v4994_v48  ;;  %v5024_v48 = vpack.c.bf16 %v4042_v58, %v4040_v54  ;;  %v5026_v24 = vpack.c.bf16 %v4047_v46, %v4045_v42  ;;  %v4074_v54 = vld [vmem:[#allocation10 + $0x350] sm:$0xff]  ;;  %v4077_v58 = vld [vmem:[#allocation10 + $0x368] sm:$0xff]  ;;  %v4079_v42 = vld [vmem:[#allocation10 + $0x378] sm:$0xff] }
 0x2b1   :  { %4997 = vmatpush1.bf16.msra.mxu0 %v4996_v34  ;;  %v4051_v34 = vld [vmem:[#allocation10 + $0x298] sm:$0xff] }
 0x2b2   :  { %4999 = vmatprep.subr.bf16.mxu0 %v4998_v22  ;;  %v5028_v22 = vpack.c.bf16 %v4046_v0, %v4044_v16  ;;  %v5030_v20 = vpack.c.bf16 %v4051_v34, %v4049_v36  ;;  %v4078_v16 = vld [vmem:[#allocation10 + $0x370] sm:$0xff]  ;;  %v4081_v0 = vld [vmem:[#allocation10 + $0x388] sm:$0xff]  ;;  %v4083_v36 = vld [vmem:[#allocation10 + $0x398] sm:$0xff] }
 0x2b5   :  { %5001 = vmatpush1.bf16.msra.mxu0 %v5000_v51  ;;  %v4055_v51 = vld [vmem:[#allocation10 + $0x2b8] sm:$0xff] }
 0x2b6   :  { %5003 = vmatprep.subr.bf16.mxu0 %v5002_v40  ;;  %v5032_v40 = vpack.c.bf16 %v4050_v38, %v4048_v44  ;;  %v5034_v5 = vpack.c.bf16 %v4055_v51, %v4053_v21  ;;  %v4082_v44 = vld [vmem:[#allocation10 + $0x390] sm:$0xff]  ;;  %v4085_v38 = vld [vmem:[#allocation10 + $0x3a8] sm:$0xff]  ;;  %v4087_v21 = vld [vmem:[#allocation10 + $0x3b8] sm:$0xff] }
 0x2b7   :  { %v7254_v15 = vpop.f32.mrb[8].mxu1 }
 0x2b8   :  { %v3666_v35 = vpop.f32.mrb[9].mxu1 }
 0x2b9   :  { %5005 = vmatpush1.bf16.msra.mxu0 %v5004_v25  ;;  %v7281_v3 = vadd.f32 %v3666_v35, %v7267_v45  ;;  %v4059_v25 = vld [vmem:[#allocation10 + $0x2d8] sm:$0xff] }
 0x2ba   :  { %5007 = vmatprep.subr.bf16.mxu0 %v5006_v55  ;;  %v5036_v55 = vpack.c.bf16 %v4054_v4, %v4052_v39  ;;  %v5038_v52 = vpack.c.bf16 %v4059_v25, %v4057_v9  ;;  %v4063_v35 = vld [vmem:[#allocation10 + $0x2f8] sm:$0xff]  ;;  %v4086_v39 = vld [vmem:[#allocation10 + $0x3b0] sm:$0xff]  ;;  %v4089_v4 = vld [vmem:[#allocation10 + $0x3c8] sm:$0xff] }
 0x2bb   :  { %v4091_v9 = vld [vmem:[#allocation10 + $0x3d8] sm:$0xff] }
 0x2bd   :  { %5009 = vmatpush1.bf16.msra.mxu0 %v5008_v60  ;;  %v5040_v60 = vpack.c.bf16 %v4058_v62, %v4056_v53  ;;  %v4090_v53 = vld [vmem:[#allocation10 + $0x3d0] sm:$0xff]  ;;  %v4093_v62 = vld [vmem:[#allocation10 + $0x3e8] sm:$0xff] }
 0x2be   :  { %5011 = vmatprep.subr.bf16.mxu0 %v5010_v37  ;;  %v5042_v37 = vpack.c.bf16 %v4063_v35, %v4061_v11  ;;  %v4095_v11 = vld [vmem:[#allocation10 + $0x3f8] sm:$0xff] }
 0x2c1   :  { %5013 = vmatpush1.bf16.msra.mxu0 %v5012_v19  ;;  %v5044_v19 = vpack.c.bf16 %v4062_v6, %v4060_v1  ;;  %v4094_v1 = vld [vmem:[#allocation10 + $0x3f0] sm:$0xff]  ;;  %v4097_v6 = vld [vmem:[#allocation10 + $0x408] sm:$0xff] }
 0x2c2   :  { %5015 = vmatprep.subr.bf16.mxu0 %v5014_v33  ;;  %v5046_v33 = vpack.c.bf16 %v4067_v14, %v4065_v56  ;;  %v4099_v56 = vld [vmem:[#allocation10 + $0x418] sm:$0xff] }
 0x2c4   :  { %4752 = vmatmul.mubr.msk.f32.vlgmr.msra.gmra.mrb[4].mxu0 %vm3841_vm13, %v7046_v47  ;;  %v7489_v47 = vld [vmem:[#allocation26_spill] sm:$0xff] }
 0x2c5   :  { %4753 = vmatprep.mubr.msk.f32.mxu0 %vm3842_vm14, %v7263_v26  ;;  %5017 = vmatpush1.bf16.msra.mxu0 %v5016_v17  ;;  %vm3851_vm15 = vcmp.gt.f32.partialorder %v7489_v47, 0.0  ;;  %v5048_v17 = vpack.c.bf16 %v4066_v29, %v4064_v18  ;;  %v5078_v18 = vpack.c.bf16 %v4099_v56, %v4097_v6  ;;  %v4096_v29 = vld [vmem:[#allocation10 + $0x400] sm:$0xff]  ;;  %v4123_v6 = vld [vmem:[#allocation10 + $0x4d8] sm:$0xff]  ;;  %v3850_v47 = vsel %vm3842_vm14, %v7263_v26, 0.0 }
 0x2c6   :  { %5019 = vmatprep.subr.bf16.mxu0 %v5018_v13  ;;  %v5050_v13 = vpack.c.bf16 %v4071_v28, %v4069_v50  ;;  %v4098_v50 = vld [vmem:[#allocation10 + $0x410] sm:$0xff]  ;;  %v4101_v28 = vld [vmem:[#allocation10 + $0x428] sm:$0xff] }
 0x2c8   :  { %4754 = vmatmul.mubr.msk.f32.gmra.mrb[6].mxu0 %vm3842_vm14, %v7278_v57 }
 0x2c9   :  { %5021 = vmatpush1.bf16.msra.mxu0 %v5020_v63  ;;  %4755 = vmatprep.mubr.msk.f32.mxu0 %vm3851_vm15, %v7281_v3  ;;  %v5052_v63 = vpack.c.bf16 %v4070_v27, %v4068_v7 }
 0x2ca   :  { %5023 = vmatprep.subr.bf16.mxu0 %v5022_v61  ;;  %v4072_v61 = vld [vmem:[#allocation10 + $0x340] sm:$0xff] }
 0x2cb   :  { %v5056_v46 = vpack.c.bf16 %v4074_v54, %v4072_v61  ;;  %v4104_v54 = vld [vmem:[#allocation10 + $0x440] sm:$0xff] }
 0x2cd   :  { %5025 = vmatpush1.bf16.msra.mxu0 %v5024_v48  ;;  %v5058_v48 = vpack.c.bf16 %v4079_v42, %v4077_v58  ;;  %v4106_v58 = vld [vmem:[#allocation10 + $0x450] sm:$0xff]  ;;  %v4109_v42 = vld [vmem:[#allocation10 + $0x468] sm:$0xff] }
 0x2ce   :  { %5027 = vmatprep.subr.bf16.mxu0 %v5026_v24  ;;  %v4076_v24 = vld [vmem:[#allocation10 + $0x360] sm:$0xff] }
 0x2cf   :  { %v5060_v34 = vpack.c.bf16 %v4078_v16, %v4076_v24  ;;  %v4108_v24 = vld [vmem:[#allocation10 + $0x460] sm:$0xff]  ;;  %v4110_v16 = vld [vmem:[#allocation10 + $0x470] sm:$0xff] }
 0x2d1   :  { %5029 = vmatpush1.bf16.msra.mxu0 %v5028_v22  ;;  %v5062_v22 = vpack.c.bf16 %v4083_v36, %v4081_v0  ;;  %v4113_v0 = vld [vmem:[#allocation10 + $0x488] sm:$0xff]  ;;  %v4115_v36 = vld [vmem:[#allocation10 + $0x498] sm:$0xff] }
 0x2d2   :  { %5031 = vmatprep.subr.bf16.mxu0 %v5030_v20  ;;  %v4080_v20 = vld [vmem:[#allocation10 + $0x380] sm:$0xff] }
 0x2d3   :  { %v5064_v51 = vpack.c.bf16 %v4082_v44, %v4080_v20  ;;  %v5094_v44 = vpack.c.bf16 %v4115_v36, %v4113_v0  ;;  %v4139_v0 = vld [vmem:[#allocation10 + $0x558] sm:$0xff] }
 0x2d5   :  { %5033 = vmatpush1.bf16.msra.mxu0 %v5032_v40  ;;  %v5066_v40 = vpack.c.bf16 %v4087_v21, %v4085_v38  ;;  %v4112_v38 = vld [vmem:[#allocation10 + $0x480] sm:$0xff]  ;;  %v4114_v21 = vld [vmem:[#allocation10 + $0x490] sm:$0xff] }
 0x2d6   :  { %5035 = vmatprep.subr.bf16.mxu0 %v5034_v5  ;;  %v4084_v5 = vld [vmem:[#allocation10 + $0x3a0] sm:$0xff] }
 0x2d7   :  { %v5068_v25 = vpack.c.bf16 %v4086_v39, %v4084_v5  ;;  %v4117_v5 = vld [vmem:[#allocation10 + $0x4a8] sm:$0xff]  ;;  %v4119_v39 = vld [vmem:[#allocation10 + $0x4b8] sm:$0xff] }
 0x2d9   :  { %5037 = vmatpush1.bf16.msra.mxu0 %v5036_v55  ;;  %v5070_v55 = vpack.c.bf16 %v4091_v9, %v4089_v4  ;;  %v7491_v4 = vld [vmem:[#allocation20_spill] sm:$0xff] }
 0x2da   :  { %5039 = vmatprep.subr.bf16.mxu0 %v5038_v52  ;;  %v4088_v52 = vld [vmem:[#allocation10 + $0x3c0] sm:$0xff]  ;;  %vm3852_vm0 = vcmp.gt.f32.partialorder %v7491_v4, 0.0  ;;  %v4147_v4 = vld [vmem:[#allocation10 + $0x598] sm:$0xff] }
 0x2db   :  { %v5072_v35 = vpack.c.bf16 %v4090_v53, %v4088_v52  ;;  %v5096_v53 = vpack.c.bf16 %v4114_v21, %v4112_v38  ;;  %v4143_v38 = vld [vmem:[#allocation10 + $0x578] sm:$0xff] }
 0x2dd   :  { %5041 = vmatpush1.bf16.msra.mxu0 %v5040_v60  ;;  %v5074_v60 = vpack.c.bf16 %v4095_v11, %v4093_v62 }
 0x2de   :  { %5043 = vmatprep.subr.bf16.mxu0 %v5042_v37  ;;  %v4092_v37 = vld [vmem:[#allocation10 + $0x3e0] sm:$0xff] }
 0x2df   :  { %v5076_v14 = vpack.c.bf16 %v4094_v1, %v4092_v37  ;;  %v4118_v37 = vld [vmem:[#allocation10 + $0x4b0] sm:$0xff]  ;;  %v4121_v1 = vld [vmem:[#allocation10 + $0x4c8] sm:$0xff] }
 0x2e1   :  { %5045 = vmatpush1.bf16.msra.mxu0 %v5044_v19  ;;  %v7490_v19 = vld [vmem:[#allocation19_spill] sm:$0xff] }
 0x2e2   :  { %5047 = vmatprep.subr.bf16.mxu0 %v5046_v33  ;;  %v3497_v33 = vrot.slane %v7259_v41, %v7490_v19  ;;  %v5084_v41 = vpack.c.bf16 %v4102_v43, %v4100_v8  ;;  %v4126_v8 = vld [vmem:[#allocation10 + $0x4f0] sm:$0xff]  ;;  %v4129_v43 = vld [vmem:[#allocation10 + $0x508] sm:$0xff] }
 0x2e4   :  { %v7293_v7 = vadd.f32 %v7254_v15, %v3497_v33  ;;  %v5088_v15 = vpack.c.bf16 %v4106_v58, %v4104_v54  ;;  %v4130_v54 = vld [vmem:[#allocation10 + $0x510] sm:$0xff]  ;;  %v4133_v58 = vld [vmem:[#allocation10 + $0x528] sm:$0xff] }
 0x2e5   :  { %5049 = vmatpush1.bf16.msra.mxu0 %v5048_v17  ;;  %v4103_v17 = vld [vmem:[#allocation10 + $0x438] sm:$0xff] }
 0x2e6   :  { %5051 = vmatprep.subr.bf16.mxu0 %v5050_v13  ;;  %v5080_v13 = vpack.c.bf16 %v4098_v50, %v4096_v29  ;;  %v5082_v27 = vpack.c.bf16 %v4103_v17, %v4101_v28  ;;  %v4122_v29 = vld [vmem:[#allocation10 + $0x4d0] sm:$0xff]  ;;  %v4125_v50 = vld [vmem:[#allocation10 + $0x4e8] sm:$0xff]  ;;  %v4127_v28 = vld [vmem:[#allocation10 + $0x4f8] sm:$0xff] }
 0x2e9   :  { %5053 = vmatpush1.bf16.msra.mxu0 %v5052_v63  ;;  %v4105_v63 = vld [vmem:[#allocation10 + $0x448] sm:$0xff] }
 0x2ea   :  { %5055 = vmatprep.subr.bf16.mxu0 %v5054_v10  ;;  %v4107_v10 = vld [vmem:[#allocation10 + $0x458] sm:$0xff] }
 0x2eb   :  { %v5086_v61 = vpack.c.bf16 %v4107_v10, %v4105_v63  ;;  %v4131_v63 = vld [vmem:[#allocation10 + $0x518] sm:$0xff] }
 0x2ed   :  { %5057 = vmatpush1.bf16.msra.mxu0 %v5056_v46  ;;  %v4111_v46 = vld [vmem:[#allocation10 + $0x478] sm:$0xff] }
 0x2ee   :  { %5059 = vmatprep.subr.bf16.mxu0 %v5058_v48  ;;  %v5090_v48 = vpack.c.bf16 %v4111_v46, %v4109_v42  ;;  %v4135_v42 = vld [vmem:[#allocation10 + $0x538] sm:$0xff] }
 0x2f1   :  { %5061 = vmatpush1.bf16.msra.mxu0 %v5060_v34  ;;  %v4745_v34 = vld [vmem:[%s7422_s11 + $0x4] ss:$8 sm:$0x3] }
 0x2f2   :  { %5063 = vmatprep.subr.bf16.mxu0 %v5062_v22  ;;  %v5092_v22 = vpack.c.bf16 %v4110_v16, %v4108_v24  ;;  %v7303_v9 = vrot.slane %v4745_v34, %v7490_v19  ;;  %v7309_v52 = vrot.slane %v4745_v34, %v5738_v2  ;;  %v4134_v24 = vld [vmem:[#allocation10 + $0x530] sm:$0xff]  ;;  %v4137_v16 = vld [vmem:[#allocation10 + $0x548] sm:$0xff] }
 0x2f3   :  { %v5118_v34 = vpack.c.bf16 %v4139_v0, %v4137_v16  ;;  %v7492_v16 = vld [vmem:[#allocation21_spill] sm:$0xff] }
 0x2f4   :  { %vm3861_vm1 = vcmp.gt.f32.partialorder %v7492_v16, 0.0 }
 0x2f5   :  { %5065 = vmatpush1.bf16.msra.mxu0 %v5064_v51 }
 0x2f6   :  { %5067 = vmatprep.subr.bf16.mxu0 %v5066_v40 }
 0x2f9   :  { %5069 = vmatpush1.bf16.msra.mxu0 %v5068_v25 }
 0x2fa   :  { %5071 = vmatprep.subr.bf16.mxu0 %v5070_v55 }
 0x2fd   :  { %5073 = vmatpush1.bf16.msra.mxu0 %v5072_v35  ;;  %v5098_v35 = vpack.c.bf16 %v4119_v39, %v4117_v5  ;;  %v4142_v5 = vld [vmem:[#allocation10 + $0x570] sm:$0xff]  ;;  %v4145_v39 = vld [vmem:[#allocation10 + $0x588] sm:$0xff] }
 0x2fe   :  { %5075 = vmatprep.subr.bf16.mxu0 %v5074_v60  ;;  %v4116_v60 = vld [vmem:[#allocation10 + $0x4a0] sm:$0xff] }
 0x301   :  { %5077 = vmatpush1.bf16.msra.mxu0 %v5076_v14  ;;  %v5100_v14 = vpack.c.bf16 %v4118_v37, %v4116_v60  ;;  %v4149_v60 = vld [vmem:[#allocation10 + $0x5a8] sm:$0xff]  ;;  %v4151_v37 = vld [vmem:[#allocation10 + $0x5b8] sm:$0xff] }
 0x302   :  { %5079 = vmatprep.subr.bf16.mxu0 %v5078_v18  ;;  %v4120_v18 = vld [vmem:[#allocation10 + $0x4c0] sm:$0xff] }
 0x303   :  { %v5104_v17 = vpack.c.bf16 %v4122_v29, %v4120_v18 }
 0x304   :  { %4756 = vmatmul.mubr.msk.f32.vlgmr.msra.gmra.mrb[4].mxu0 %vm3851_vm15, %v7293_v7 }
 0x305   :  { %5081 = vmatpush1.bf16.msra.mxu0 %v5080_v13  ;;  %v5106_v13 = vpack.c.bf16 %v4127_v28, %v4125_v50  ;;  %v4152_v50 = vld [vmem:[#allocation10 + $0x5c0] sm:$0xff]  ;;  %v4154_v28 = vld [vmem:[#allocation10 + $0x5d0] sm:$0xff] }
 0x306   :  { %5083 = vmatprep.subr.bf16.mxu0 %v5082_v27  ;;  %v4124_v27 = vld [vmem:[#allocation10 + $0x4e0] sm:$0xff] }
 0x307   :  { %v5108_v10 = vpack.c.bf16 %v4126_v8, %v4124_v27  ;;  %v5136_v27 = vpack.c.bf16 %v4154_v28, %v4152_v50 }
 0x309   :  { %5085 = vmatpush1.bf16.msra.mxu0 %v5084_v41  ;;  %v5110_v41 = vpack.c.bf16 %v4131_v63, %v4129_v43  ;;  %v4156_v43 = vld [vmem:[#allocation10 + $0x5e0] sm:$0xff]  ;;  %v4158_v63 = vld [vmem:[#allocation10 + $0x5f0] sm:$0xff] }
 0x30a   :  { %5087 = vmatprep.subr.bf16.mxu0 %v5086_v61  ;;  %v3670_v20 = vpop.f32.mrb[10].mxu1  ;;  %v4128_v61 = vld [vmem:[#allocation10 + $0x500] sm:$0xff] }
 0x30b   :  { %v3671_v51 = vadd.f32 %v3670_v20, %v3497_v33  ;;  %v3672_v40 = vpop.f32.mrb[11].mxu1  ;;  %v5102_v33 = vpack.c.bf16 %v4123_v6, %v4121_v1  ;;  %v5112_v46 = vpack.c.bf16 %v4130_v54, %v4128_v61  ;;  %v4138_v20 = vld [vmem:[#allocation10 + $0x550] sm:$0xff]  ;;  %v5130_v1 = vpack.c.bf16 %v4151_v37, %v4149_v60  ;;  %v4148_v6 = vld [vmem:[#allocation10 + $0x5a0] sm:$0xff] }
 0x30c   :  { %v3673_v25 = vadd.f32 %v3672_v40, %v7267_v45  ;;  %v4140_v40 = vld [vmem:[#allocation10 + $0x560] sm:$0xff] }
 0x30d   :  { %5089 = vmatpush1.bf16.msra.mxu0 %v5088_v15  ;;  %v7306_v55 = vsel %vm3852_vm0, %v3671_v51, 0.0  ;;  %v5114_v15 = vpack.c.bf16 %v4135_v42, %v4133_v58  ;;  %v4746_v54 = vld [vmem:[%s7422_s11 + $0x5] ss:$8 sm:$0x3] }
 0x30e   :  { %5091 = vmatprep.subr.bf16.mxu0 %v5090_v48  ;;  %v3905_v62 = vmul.f32 %v7303_v9, %v7306_v55  ;;  %v7313_v11 = vsel %vm3852_vm0, %v3673_v25, 0.0  ;;  %4757 = vmatprep.mubr.msk.f32.mxu0 %vm3852_vm0, %v3673_v25  ;;  %v4132_v48 = vld [vmem:[#allocation10 + $0x520] sm:$0xff]  ;;  %v5124_v25 = vpack.c.bf16 %v4142_v5, %v4140_v40  ;;  %v7493_v5 = vld [vmem:[#allocation23_spill] sm:$0xff] }
 0x30f   :  { %v3906_v45 = vmul.f32 %v7309_v52, %v7313_v11  ;;  %4758 = vmatmul.mubr.msk.f32.gmra.mrb[6].mxu0 %vm3852_vm0, %v3671_v51  ;;  %v5116_v36 = vpack.c.bf16 %v4134_v24, %v4132_v48  ;;  %v3921_v24 = vrot.slane %v4746_v54, %v5738_v2 }
 0x311   :  { %5093 = vmatpush1.bf16.msra.mxu0 %v5092_v22  ;;  %v3910_v56 = vadd.f32 %v3906_v45, %v3905_v62  ;;  %v4136_v22 = vld [vmem:[#allocation10 + $0x540] sm:$0xff] }
 0x312   :  { %5095 = vmatprep.subr.bf16.mxu0 %v5094_v44  ;;  %v4141_v44 = vld [vmem:[#allocation10 + $0x568] sm:$0xff]  ;;  %v5120_v21 = vpack.c.bf16 %v4138_v20, %v4136_v22  ;;  %v4144_v62 = vld [vmem:[#allocation10 + $0x580] sm:$0xff]  ;;  %v7338_v22 = vsel %vm3851_vm15, %v7281_v3, 0.0  ;;  %v3849_v3 = vsel %vm3842_vm14, %v7278_v57, 0.0 }
 0x313   :  { %3911 = vadd.xlane.f32.xlu1 %v3910_v56  ;;  %v5122_v51 = vpack.c.bf16 %v4143_v38, %v4141_v44  ;;  %v4150_v56 = vld [vmem:[#allocation10 + $0x5b0] sm:$0xff] }
 0x314   :  { %v5132_v18 = vpack.c.bf16 %v4150_v56, %v4148_v6  ;;  %v4453_v6 = vld [vmem:[#allocation11 + $0x20] sm:$0xff] }
 0x315   :  { %5097 = vmatpush1.bf16.msra.mxu0 %v5096_v53  ;;  %v5126_v53 = vpack.c.bf16 %v4147_v4, %v4145_v39  ;;  %v3884_v39 = vmul.f32 %v7493_v5, %v3849_v3  ;;  %v7494_v4 = vld [vmem:[#allocation27_spill] sm:$0xff]  ;;  %v4450_v56 = vld [vmem:[#allocation11] sm:$0xff]  ;;  %v4475_v5 = vld [vmem:[#allocation11 + $0x128] sm:$0xff] }
 0x316   :  { %5099 = vmatprep.subr.bf16.mxu0 %v5098_v35  ;;  %v4146_v35 = vld [vmem:[#allocation10 + $0x590] sm:$0xff] }
 0x317   :  { %v5128_v45 = vpack.c.bf16 %v4146_v35, %v4144_v62  ;;  %v7495_v35 = vld [vmem:[#allocation22_spill] sm:$0xff] }
 0x318   :  { %vm3862_vm2 = vcmp.gt.f32.partialorder %v7495_v35, 0.0 }
 0x319   :  { %5101 = vmatpush1.bf16.msra.mxu0 %v5100_v14  ;;  %v4153_v14 = vld [vmem:[#allocation10 + $0x5c8] sm:$0xff] }
 0x31a   :  { %5103 = vmatprep.subr.bf16.mxu0 %v5102_v33  ;;  %v4155_v33 = vld [vmem:[#allocation10 + $0x5d8] sm:$0xff] }
 0x31b   :  { %v5134_v29 = vpack.c.bf16 %v4155_v33, %v4153_v14  ;;  %v4452_v33 = vld [vmem:[#allocation11 + $0x18] sm:$0xff] }
 0x31c   :  { %v5144_v50 = vpack.c.bf16 %v4452_v33, %v4450_v56  ;;  %v4482_v56 = vld [vmem:[#allocation11 + $0x180] sm:$0xff]  ;;  %v4484_v33 = vld [vmem:[#allocation11 + $0x198] sm:$0xff] }
 0x31d   :  { %5105 = vmatpush1.bf16.msra.mxu0 %v5104_v17  ;;  %v4157_v17 = vld [vmem:[#allocation10 + $0x5e8] sm:$0xff] }
 0x31e   :  { %5107 = vmatprep.subr.bf16.mxu0 %v5106_v13  ;;  %v4159_v13 = vld [vmem:[#allocation10 + $0x5f8] sm:$0xff] }
 0x31f   :  { %v5138_v8 = vpack.c.bf16 %v4159_v13, %v4157_v17  ;;  %v4454_v17 = vld [vmem:[#allocation11 + $0x30] sm:$0xff]  ;;  %v4456_v13 = vld [vmem:[#allocation11 + $0x48] sm:$0xff] }
 0x321   :  { %5109 = vmatpush1.bf16.msra.mxu0 %v5108_v10  ;;  %v5140_v10 = vpack.c.bf16 %v4158_v63, %v4156_v43  ;;  %v5148_v43 = vpack.c.bf16 %v4456_v13, %v4454_v17  ;;  %v4486_v17 = vld [vmem:[#allocation11 + $0x1b0] sm:$0xff]  ;;  %v4488_v13 = vld [vmem:[#allocation11 + $0x1c8] sm:$0xff] }
 0x322   :  { %5111 = vmatprep.subr.bf16.mxu0 %v5110_v41  ;;  %v4743_v41 = vld [vmem:[%s7422_s11 + $0x2] ss:$8 sm:$0x3] }
 0x323   :  { %v3711_v61 = vrot.slane %v4743_v41, %v7490_v19  ;;  %v3715_v58 = vrot.slane %v4743_v41, %v5738_v2  ;;  %v4460_v41 = vld [vmem:[#allocation11 + $0x78] sm:$0xff] }
 0x325   :  { %5113 = vmatpush1.bf16.msra.mxu0 %v5112_v46  ;;  %v3917_v46 = vrot.slane %v4746_v54, %v7490_v19  ;;  %v4465_v54 = vld [vmem:[#allocation11 + $0xb0] sm:$0xff] }
 0x326   :  { %5115 = vmatprep.subr.bf16.mxu0 %v5114_v15 }
 0x329   :  { %5117 = vmatpush1.bf16.msra.mxu0 %v5116_v36 }
 0x32a   :  { %5119 = vmatprep.subr.bf16.mxu0 %v5118_v34  ;;  %v7333_v34 = vsel %vm3851_vm15, %v7293_v7, 0.0  ;;  %v3904_v7 = vmul.f32 %v7309_v52, %v7338_v22 }
 0x32d   :  { %5121 = vmatpush1.bf16.msra.mxu0 %v5120_v21 }
 0x32e   :  { %5123 = vmatprep.subr.bf16.mxu0 %v5122_v51  ;;  %v3903_v51 = vmul.f32 %v7303_v9, %v7333_v34 }
 0x330   :  { %v3907_v40 = vadd.f32 %v3904_v7, %v3903_v51  ;;  %v4473_v51 = vld [vmem:[#allocation11 + $0x110] sm:$0xff] }
 0x331   :  { %5125 = vmatpush1.bf16.msra.mxu0 %v5124_v25  ;;  %v3885_v25 = vmul.f32 %v7494_v4, %v3850_v47  ;;  %v4470_v47 = vld [vmem:[#allocation11 + $0xf0] sm:$0xff] }
 0x332   :  { %5127 = vmatprep.subr.bf16.mxu0 %v5126_v53 }
 0x333   :  { %v3889_v53 = vadd.f32 %v3885_v25, %v3884_v39  ;;  %v4477_v39 = vld [vmem:[#allocation11 + $0x140] sm:$0xff] }
 0x334   :  { %v5166_v25 = vpack.c.bf16 %v4477_v39, %v4475_v5  ;;  %v4507_v5 = vld [vmem:[#allocation11 + $0x2a8] sm:$0xff]  ;;  %v4509_v39 = vld [vmem:[#allocation11 + $0x2c0] sm:$0xff] }
 0x335   :  { %5129 = vmatpush1.bf16.msra.mxu0 %v5128_v45 }
 0x336   :  { %5131 = vmatprep.subr.bf16.mxu0 %v5130_v1  ;;  %v4451_v1 = vld [vmem:[#allocation11 + $0x8] sm:$0xff] }
 0x337   :  { %v5142_v14 = vpack.c.bf16 %v4453_v6, %v4451_v1  ;;  %v4483_v1 = vld [vmem:[#allocation11 + $0x188] sm:$0xff]  ;;  %v4485_v6 = vld [vmem:[#allocation11 + $0x1a0] sm:$0xff] }
 0x339   :  { %5133 = vmatpush1.bf16.msra.mxu0 %v5132_v18  ;;  %v4455_v18 = vld [vmem:[#allocation11 + $0x38] sm:$0xff]  ;;  %5143 = vmatprep.subr.bf16.mxu1 %v5142_v14  ;;  %v5174_v14 = vpack.c.bf16 %v4485_v6, %v4483_v1  ;;  %v4622_v1 = vld [vmem:[#allocation11 + $0x190] sm:$0xff]  ;;  %v4623_v6 = vld [vmem:[#allocation11 + $0x1a8] sm:$0xff] }
 0x33a   :  { %5135 = vmatprep.subr.bf16.mxu0 %v5134_v29  ;;  %v4457_v29 = vld [vmem:[#allocation11 + $0x50] sm:$0xff]  ;;  %5145 = vmatpush1.bf16.msra.mxu1 %v5144_v50  ;;  %v5176_v50 = vpack.c.bf16 %v4484_v33, %v4482_v56  ;;  %v5206_v56 = vpack.c.bf16 %v4623_v6, %v4622_v1  ;;  %v3435_v1 = vadd.f32 %v7240_v59, %v6993_v32 }
 0x33b   :  { %v5146_v28 = vpack.c.bf16 %v4457_v29, %v4455_v18  ;;  %v4487_v18 = vld [vmem:[#allocation11 + $0x1b8] sm:$0xff]  ;;  %v4489_v29 = vld [vmem:[#allocation11 + $0x1d0] sm:$0xff] }
 0x33d   :  { %5137 = vmatpush1.bf16.msra.mxu0 %v5136_v27  ;;  %v4459_v27 = vld [vmem:[#allocation11 + $0x68] sm:$0xff]  ;;  %5147 = vmatprep.subr.bf16.mxu1 %v5146_v28  ;;  %v5178_v28 = vpack.c.bf16 %v4489_v29, %v4487_v18  ;;  %v3888_v18 = vpop.xlane.xlu1 %3887 }
 0x33e   :  { %5139 = vmatprep.subr.bf16.mxu0 %v5138_v8  ;;  %v4461_v8 = vld [vmem:[#allocation11 + $0x80] sm:$0xff]  ;;  %5149 = vmatpush1.bf16.msra.mxu1 %v5148_v43  ;;  %v5180_v43 = vpack.c.bf16 %v4488_v13, %v4486_v17 }
 0x33f   :  { %v5150_v63 = vpack.c.bf16 %v4461_v8, %v4459_v27  ;;  %v4491_v27 = vld [vmem:[#allocation11 + $0x1e8] sm:$0xff]  ;;  %v4493_v8 = vld [vmem:[#allocation11 + $0x200] sm:$0xff] }
 0x341   :  { %5141 = vmatpush1.bf16.msra.mxu0 %v5140_v10  ;;  %v4458_v10 = vld [vmem:[#allocation11 + $0x60] sm:$0xff]  ;;  %5151 = vmatprep.subr.bf16.mxu1 %v5150_v63  ;;  %v5182_v63 = vpack.c.bf16 %v4493_v8, %v4491_v27 }
 0x353   :  { %v3830_v42 = vpop.f32.mrb[0].mxu0 }
 0x354   :  { %v3831_v15 = vadd.f32 %v3830_v42, %v3711_v61  ;;  %v3832_v48 = vpop.f32.mrb[1].mxu0 }
 0x355   :  { %v3833_v0 = vadd.f32 %v3832_v48, %v3715_v58  ;;  %v4467_v48 = vld [vmem:[#allocation11 + $0xc8] sm:$0xff] }
 0x356   :  { %v7328_v36 = vsel %vm3861_vm1, %v3831_v15, 0.0 }
 0x357   :  { %v7340_v20 = vsel %vm3861_vm1, %v3833_v0, 0.0  ;;  %4759 = vmatprep.mubr.msk.f32.mxu0 %vm3861_vm1, %v3833_v0  ;;  %v3924_v44 = vmul.f32 %v3917_v46, %v7328_v36 }
 0x358   :  { %4760 = vmatmul.mubr.msk.f32.vlgmr.msra.gmra.mrb[4].mxu0 %vm3861_vm1, %v3831_v15  ;;  %v3925_v38 = vmul.f32 %v3921_v24, %v7340_v20  ;;  %v4464_v15 = vld [vmem:[#allocation11 + $0xa8] sm:$0xff] }
 0x35a   :  { %v3928_v21 = vadd.f32 %v3925_v38, %v3924_v44  ;;  %v4466_v44 = vld [vmem:[#allocation11 + $0xc0] sm:$0xff]  ;;  %v4468_v38 = vld [vmem:[#allocation11 + $0xd8] sm:$0xff] }
 0x35b   :  { %v5160_v7 = vpack.c.bf16 %v4468_v38, %v4466_v44  ;;  %v4498_v44 = vld [vmem:[#allocation11 + $0x240] sm:$0xff]  ;;  %v4500_v38 = vld [vmem:[#allocation11 + $0x258] sm:$0xff] }
 0x35c   :  { %3929 = vadd.xlane.f32.xlu0 %v3928_v21  ;;  %v4471_v21 = vld [vmem:[#allocation11 + $0xf8] sm:$0xff] }
 0x35d   :  { %v5162_v3 = vpack.c.bf16 %v4473_v51, %v4471_v21  ;;  %v4503_v21 = vld [vmem:[#allocation11 + $0x278] sm:$0xff]  ;;  %v4505_v51 = vld [vmem:[#allocation11 + $0x290] sm:$0xff] }
 0x360   :  { %3908 = vadd.xlane.f32.xlu0 %v3907_v40  ;;  %v4472_v40 = vld [vmem:[#allocation11 + $0x108] sm:$0xff] }
 0x361   :  { %v5164_v4 = vpack.c.bf16 %v4472_v40, %v4470_v47  ;;  %v4502_v47 = vld [vmem:[#allocation11 + $0x270] sm:$0xff]  ;;  %v4504_v40 = vld [vmem:[#allocation11 + $0x288] sm:$0xff] }
 0x364   :  { %3890 = vadd.xlane.f32.xlu0 %v3889_v53  ;;  %v4474_v53 = vld [vmem:[#allocation11 + $0x120] sm:$0xff] }
 0x36a   :  { %v3836_v9 = vpop.f32.mrb[2].mxu0 }
 0x36b   :  { %v3837_v62 = vadd.f32 %v3836_v9, %v3711_v61  ;;  %v3838_v52 = vpop.f32.mrb[3].mxu0  ;;  %v4463_v61 = vld [vmem:[#allocation11 + $0x98] sm:$0xff] }
 0x36c   :  { %v3839_v60 = vadd.f32 %v3838_v52, %v3715_v58  ;;  %v5152_v58 = vpack.c.bf16 %v4460_v41, %v4458_v10  ;;  %v5154_v42 = vpack.c.bf16 %v4465_v54, %v4463_v61  ;;  %v4476_v9 = vld [vmem:[#allocation11 + $0x138] sm:$0xff]  ;;  %v4481_v52 = vld [vmem:[#allocation11 + $0x170] sm:$0xff]  ;;  %v4490_v10 = vld [vmem:[#allocation11 + $0x1e0] sm:$0xff] }
 0x36d   :  { %v7357_v57 = vsel %vm3862_vm2, %v3837_v62, 0.0  ;;  %v5168_v35 = vpack.c.bf16 %v4476_v9, %v4474_v53  ;;  %v4492_v41 = vld [vmem:[#allocation11 + $0x1f8] sm:$0xff]  ;;  %v4497_v54 = vld [vmem:[#allocation11 + $0x230] sm:$0xff]  ;;  %v4506_v53 = vld [vmem:[#allocation11 + $0x2a0] sm:$0xff] }
 0x36e   :  { %v7359_v37 = vsel %vm3862_vm2, %v3839_v60, 0.0  ;;  %4761 = vmatprep.mubr.msk.f32.mxu0 %vm3862_vm2, %v3839_v60  ;;  %v3926_v26 = vmul.f32 %v3917_v46, %v7357_v57  ;;  %v4462_v46 = vld [vmem:[#allocation11 + $0x90] sm:$0xff]  ;;  %5153 = vmatpush1.bf16.msra.mxu1 %v5152_v58  ;;  %v4495_v61 = vld [vmem:[#allocation11 + $0x218] sm:$0xff]  ;;  %v5184_v58 = vpack.c.bf16 %v4492_v41, %v4490_v10 }
 0x36f   :  { %4762 = vmatmul.mubr.msk.f32.gmra.mrb[6].mxu0 %vm3862_vm2, %v3837_v62  ;;  %v3927_v49 = vmul.f32 %v3921_v24, %v7359_v37  ;;  %v4469_v24 = vld [vmem:[#allocation11 + $0xe0] sm:$0xff]  ;;  %v5156_v16 = vpack.c.bf16 %v4464_v15, %v4462_v46  ;;  %5155 = vmatprep.subr.bf16.mxu1 %v5154_v42  ;;  %v4479_v62 = vld [vmem:[#allocation11 + $0x158] sm:$0xff]  ;;  %v5186_v42 = vpack.c.bf16 %v4497_v54, %v4495_v61  ;;  %v4494_v46 = vld [vmem:[#allocation11 + $0x210] sm:$0xff] }
 0x370   :  { %v5158_v0 = vpack.c.bf16 %v4469_v24, %v4467_v48  ;;  %v5170_v60 = vpack.c.bf16 %v4481_v52, %v4479_v62  ;;  %v4496_v15 = vld [vmem:[#allocation11 + $0x228] sm:$0xff]  ;;  %v4501_v24 = vld [vmem:[#allocation11 + $0x260] sm:$0xff]  ;;  %v4508_v9 = vld [vmem:[#allocation11 + $0x2b8] sm:$0xff] }
 0x371   :  { %v3931_v45 = vadd.f32 %v3927_v49, %v3926_v26  ;;  %v4478_v26 = vld [vmem:[#allocation11 + $0x150] sm:$0xff]  ;;  %v4480_v49 = vld [vmem:[#allocation11 + $0x168] sm:$0xff]  ;;  %v4511_v62 = vld [vmem:[#allocation11 + $0x2d8] sm:$0xff] }
 0x372   :  { %5157 = vmatpush1.bf16.msra.mxu1 %v5156_v16  ;;  %v4499_v48 = vld [vmem:[#allocation11 + $0x248] sm:$0xff]  ;;  %v5188_v16 = vpack.c.bf16 %v4496_v15, %v4494_v46  ;;  %v4513_v52 = vld [vmem:[#allocation11 + $0x2f0] sm:$0xff] }
 0x373   :  { %3932 = vadd.xlane.f32.xlu0 %v3931_v45  ;;  %5159 = vmatprep.subr.bf16.mxu1 %v5158_v0  ;;  %v5172_v45 = vpack.c.bf16 %v4480_v49, %v4478_v26  ;;  %v5190_v0 = vpack.c.bf16 %v4501_v24, %v4499_v48  ;;  %v4510_v26 = vld [vmem:[#allocation11 + $0x2d0] sm:$0xff]  ;;  %v4512_v49 = vld [vmem:[#allocation11 + $0x2e8] sm:$0xff] }
 0x374   :  { %v4747_v48 = vld [vmem:[%s7422_s11 + $0x6] ss:$8 sm:$0x3] }
 0x376   :  { %5161 = vmatpush1.bf16.msra.mxu1 %v5160_v7  ;;  %v5192_v7 = vpack.c.bf16 %v4500_v38, %v4498_v44  ;;  %v4164_v44 = vrot.slane %v4747_v48, %v7490_v19 }
 0x377   :  { %5163 = vmatprep.subr.bf16.mxu1 %v5162_v3  ;;  %v5194_v3 = vpack.c.bf16 %v4505_v51, %v4503_v21  ;;  %v4168_v21 = vrot.slane %v4747_v48, %v5738_v2 }
 0x37a   :  { %5165 = vmatpush1.bf16.msra.mxu1 %v5164_v4  ;;  %v5196_v4 = vpack.c.bf16 %v4504_v40, %v4502_v47 }
 0x37b   :  { %5167 = vmatprep.subr.bf16.mxu1 %v5166_v25  ;;  %v5198_v25 = vpack.c.bf16 %v4509_v39, %v4507_v5 }
 0x37e   :  { %5169 = vmatpush1.bf16.msra.mxu1 %v5168_v35  ;;  %v5200_v35 = vpack.c.bf16 %v4508_v9, %v4506_v53 }
 0x37f   :  { %5171 = vmatprep.subr.bf16.mxu1 %v5170_v60  ;;  %v5202_v60 = vpack.c.bf16 %v4513_v52, %v4511_v62 }
 0x382   :  { %5173 = vmatpush1.bf16.msra.mxu1 %v5172_v45  ;;  %v5204_v45 = vpack.c.bf16 %v4512_v49, %v4510_v26 }
 0x383   :  { %5175 = vmatprep.subr.bf16.mxu1 %v5174_v14 }
 0x386   :  { %5177 = vmatpush1.bf16.msra.mxu1 %v5176_v50 }
 0x387   :  { %5179 = vmatprep.subr.bf16.mxu1 %v5178_v28 }
 0x38a   :  { %5181 = vmatpush1.bf16.msra.mxu1 %v5180_v43 }
 0x38b   :  { %5183 = vmatprep.subr.bf16.mxu1 %v5182_v63 }
 0x38e   :  { %5185 = vmatpush1.bf16.msra.mxu1 %v5184_v58 }
 0x38f   :  { %5187 = vmatprep.subr.bf16.mxu1 %v5186_v42 }
 0x392   :  { %5189 = vmatpush1.bf16.msra.mxu1 %v5188_v16 }
 0x393   :  { %5191 = vmatprep.subr.bf16.mxu1 %v5190_v0 }
 0x396   :  { %5193 = vmatpush1.bf16.msra.mxu1 %v5192_v7 }
 0x397   :  { %5195 = vmatprep.subr.bf16.mxu1 %v5194_v3 }
 0x39a   :  { %5197 = vmatpush1.bf16.msra.mxu1 %v5196_v4 }
 0x39b   :  { %5199 = vmatprep.subr.bf16.mxu1 %v5198_v25 }
 0x39e   :  { %5201 = vmatpush1.bf16.msra.mxu1 %v5200_v35 }
 0x39f   :  { %5203 = vmatprep.subr.bf16.mxu1 %v5202_v60 }
 0x3a0   :  { %v3912_v10 = vpop.xlane.xlu1 %3911 }
 0x3a2   :  { %5205 = vmatpush1.bf16.msra.mxu1 %v5204_v45 }
 0x3a3   :  { %5207 = vmatprep.subr.bf16.mxu1 %v5206_v56  ;;  %v3437_v56 = vadd.f32 %v7242_v30, %v7000_v23 }
 0x3e9   :  { %v3930_v14 = vpop.xlane.xlu0 %3929 }
 0x3ed   :  { %v3909_v33 = vpop.xlane.xlu0 %3908 }
 0x3ee   :  { %v3934_v29 = vmax.f32 %v3888_v18, %v3909_v33 }
 0x3f0   :  { %v3936_v50 = vmax.f32 %v3934_v29, %v3930_v14 }
 0x3f1   :  { %v3891_v63 = vpop.xlane.xlu0 %3890 }
 0x3f2   :  { %v3938_v28 = vsub.f32 %v3888_v18, %v3936_v50  ;;  %v3944_v17 = vsub.f32 %v3909_v33, %v3936_v50  ;;  %v3950_v8 = vsub.f32 %v3930_v14, %v3936_v50  ;;  %v3935_v61 = vmax.f32 %v3891_v63, %v3912_v10 }
 0x3f4   :  { %v3940_v13 = vmul.f32 1.442695, %v3938_v28  ;;  %v3946_v27 = vmul.f32 1.442695, %v3944_v17  ;;  %v3952_v43 = vmul.f32 1.442695, %v3950_v8 }
 0x3f6   :  { %5364 = vpow2.f32 %v3940_v13 }
 0x3f7   :  { %5366 = vpow2.f32 %v3946_v27 }
 0x3f8   :  { %5368 = vpow2.f32 %v3952_v43 }
 0x400   :  { %v3933_v41 = vpop.xlane.xlu0 %3932  ;;  %v5365_v54 = vpop.eup %5364 }
 0x401   :  { %v5367_v58 = vpop.eup %5366  ;;  %v3937_v42 = vmax.f32 %v3935_v61, %v3933_v41 }
 0x402   :  { %v3956_v46 = vadd.f32 %v5367_v58, %v5365_v54  ;;  %v5369_v16 = vpop.eup %5368 }
 0x403   :  { %v3939_v15 = vsub.f32 %v3891_v63, %v3937_v42  ;;  %v3945_v24 = vsub.f32 %v3912_v10, %v3937_v42  ;;  %v3951_v3 = vsub.f32 %v3933_v41, %v3937_v42 }
 0x404   :  { %v3958_v0 = vadd.f32 %v5369_v16, %v3956_v46  ;;  %v4624_v46 = vld [vmem:[#allocation11 + $0x1c0] sm:$0xff] }
 0x405   :  { %v3942_v38 = vmul.f32 1.442695, %v3939_v15  ;;  %v3948_v51 = vmul.f32 1.442695, %v3945_v24  ;;  %v3954_v25 = vmul.f32 1.442695, %v3951_v3 }
 0x406   :  { %5370 = vrcp.f32 %v3958_v0  ;;  %v4625_v15 = vld [vmem:[#allocation11 + $0x1d8] sm:$0xff] }
 0x407   :  { %5372 = vpow2.f32 %v3942_v38  ;;  %v4608_v38 = vld [vmem:[#allocation11 + $0x40] sm:$0xff] }
 0x408   :  { %5374 = vpow2.f32 %v3948_v51  ;;  %v4627_v51 = vld [vmem:[#allocation11 + $0x208] sm:$0xff] }
 0x410   :  { %v5371_v53 = vpop.eup %5370 }
 0x411   :  { %v5373_v9 = vpop.eup %5372  ;;  %v3962_v35 = vmul.f32 %v5371_v53, %v5365_v54  ;;  %v3964_v60 = vmul.f32 %v5371_v53, %v5367_v58  ;;  %v3966_v17 = vmul.f32 %v5371_v53, %v5369_v16  ;;  %v4606_v54 = vld [vmem:[#allocation11 + $0x10] sm:$0xff]  ;;  %v4607_v58 = vld [vmem:[#allocation11 + $0x28] sm:$0xff] }
 0x412   :  { %v5375_v62 = vpop.eup %5374  ;;  %v5208_v0 = vpack.c.bf16 %v4607_v58, %v4606_v54 }
 0x413   :  { %v3957_v49 = vadd.f32 %v5375_v62, %v5373_v9  ;;  %v4426_v33 = vmul.f32 %v3962_v35, %v3435_v1  ;;  %v4430_v18 = vmul.f32 %v3964_v60, %v7333_v34  ;;  %v4427_v50 = vmul.f32 %v3962_v35, %v3437_v56  ;;  %v4612_v1 = vld [vmem:[#allocation11 + $0xa0] sm:$0xff] }
 0x414   :  { %v4431_v28 = vmul.f32 %v3964_v60, %v7338_v22  ;;  %v4438_v10 = vmul.f32 %v3966_v17, %v7328_v36  ;;  %v4439_v61 = vmul.f32 %v3966_v17, %v7340_v20  ;;  %v4626_v36 = vld [vmem:[#allocation11 + $0x1f0] sm:$0xff]  ;;  %v3443_v56 = vadd.f32 %v7252_v31, %v7000_v23  ;;  %v4633_v23 = vld [vmem:[#allocation11 + $0x298] sm:$0xff] }
 0x415   :  { %v4434_v8 = vadd.f32 %v4430_v18, %v4426_v33  ;;  %v5214_v3 = vpack.c.bf16 %v4627_v51, %v4626_v36  ;;  %v4630_v33 = vld [vmem:[#allocation11 + $0x250] sm:$0xff]  ;;  %v4631_v18 = vld [vmem:[#allocation11 + $0x268] sm:$0xff] }
 0x416   :  { %v4435_v30 = vadd.f32 %v4431_v28, %v4427_v50  ;;  %v5222_v28 = vpack.c.bf16 %v4631_v18, %v4630_v33  ;;  %v4614_v17 = vld [vmem:[#allocation11 + $0xd0] sm:$0xff] }
 0x417   :  { %v4442_v34 = vadd.f32 %v4438_v10, %v4434_v8  ;;  %v4634_v10 = vld [vmem:[#allocation11 + $0x2b0] sm:$0xff] }
 0x418   :  { %v4443_v22 = vadd.f32 %v4439_v61, %v4435_v30  ;;  %v4616_v30 = vld [vmem:[#allocation11 + $0x100] sm:$0xff] }
 0x42b   :  { %v4391_v7 = vpop.f32.mrb[4].mxu0 }
 0x42c   :  { %v5238_v47 = vadd.f32 %v4391_v7, %v4164_v44  ;;  %v4393_v40 = vpop.f32.mrb[5].mxu0 }
 0x42d   :  { %v5239_v5 = vadd.f32 %v4393_v40, %v4168_v21  ;;  %v4611_v40 = vld [vmem:[#allocation11 + $0x88] sm:$0xff] }
 0x42e   :  { %v4763_v39 = vmul.f32 -1.442695, %v5238_v47  ;;  %v4610_v47 = vld [vmem:[#allocation11 + $0x70] sm:$0xff] }
 0x42f   :  { %v4764_v4 = vmul.f32 -1.442695, %v5239_v5  ;;  %v4628_v5 = vld [vmem:[#allocation11 + $0x220] sm:$0xff]  ;;  %v5216_v60 = vpack.c.bf16 %v4611_v40, %v4610_v47 }
 0x430   :  { %5376 = vpow2.f32 %v4763_v39  ;;  %v4629_v39 = vld [vmem:[#allocation11 + $0x238] sm:$0xff] }
 0x431   :  { %5378 = vpow2.f32 %v4764_v4 }
 0x432   :  { %5380 = vpow2.f32 %v3954_v25 }
 0x43a   :  { %v5377_v52 = vpop.eup %5376 }
 0x43b   :  { %v5379_v26 = vpop.eup %5378  ;;  %v4414_v45 = vadd.f32 1.0, %v5377_v52 }
 0x43c   :  { %v4415_v6 = vadd.f32 1.0, %v5379_v26  ;;  %v7372_v14 = vpop.eup %5380  ;;  %v3441_v26 = vadd.f32 %v7250_v12, %v6993_v32 }
 0x43d   :  { %5382 = vrcp.f32 %v4414_v45  ;;  %v3959_v29 = vadd.f32 %v7372_v14, %v3957_v49  ;;  %v5218_v45 = vpack.c.bf16 %v4629_v39, %v4628_v5 }
 0x43e   :  { %5384 = vrcp.f32 %v4415_v6  ;;  %v4613_v6 = vld [vmem:[#allocation11 + $0xb8] sm:$0xff] }
 0x43f   :  { %5386 = vrcp.f32 %v3959_v29  ;;  %v5220_v32 = vpack.c.bf16 %v4613_v6, %v4612_v1 }
 0x442   :  { %v4397_v13 = vpop.f32.mrb[6].mxu0 }
 0x443   :  { %v5240_v27 = vadd.f32 %v4397_v13, %v4164_v44  ;;  %v4399_v59 = vpop.f32.mrb[7].mxu0  ;;  %v5210_v44 = vpack.c.bf16 %v4625_v15, %v4624_v46  ;;  %v4615_v13 = vld [vmem:[#allocation11 + $0xe8] sm:$0xff] }
 0x444   :  { %v5241_v43 = vadd.f32 %v4399_v59, %v4168_v21  ;;  %v4609_v21 = vld [vmem:[#allocation11 + $0x58] sm:$0xff]  ;;  %v5224_v8 = vpack.c.bf16 %v4615_v13, %v4614_v17  ;;  %v4619_v15 = vld [vmem:[#allocation11 + $0x148] sm:$0xff] }
 0x445   :  { %v4765_v63 = vmul.f32 -1.442695, %v5240_v27  ;;  %v5212_v7 = vpack.c.bf16 %v4609_v21, %v4608_v38  ;;  %v4632_v27 = vld [vmem:[#allocation11 + $0x280] sm:$0xff] }
 0x446   :  { %v4766_v41 = vmul.f32 -1.442695, %v5241_v43  ;;  %v4748_v21 = vld [vmem:[%s7422_s11 + $0x7] ss:$8 sm:$0x3] }
 0x447   :  { %5388 = vpow2.f32 %v4765_v63  ;;  %v5383_v42 = vpop.eup %5382  ;;  %v4518_v36 = vrot.slane %v4748_v21, %v7490_v19  ;;  %v4522_v51 = vrot.slane %v4748_v21, %v5738_v2  ;;  %v4767_v2 = vld [vmem:[%s7423_s12] ss:$0 sm:$0xff] }
 0x448   :  { %5390 = vpow2.f32 %v4766_v41  ;;  %v5385_v48 = vpop.eup %5384  ;;  %v4446_v24 = vmul.f32 %v5383_v42, %v4442_v34 }
 0x449   :  { %v4447_v16 = vmul.f32 %v5385_v48, %v4443_v22  ;;  %v5387_v20 = vpop.eup %5386 }
 0x44a   :  { %v3963_v25 = vmul.f32 %v5387_v20, %v5373_v9  ;;  %v3965_v53 = vmul.f32 %v5387_v20, %v5375_v62  ;;  %v3967_v12 = vmul.f32 %v5387_v20, %v7372_v14  ;;  %v4635_v14 = vld [vmem:[#allocation11 + $0x2c8] sm:$0xff] }
 0x44b   :  { %4589 = vmatprep.mubr.f32.mxu1 %v4447_v16  ;;  %v5230_v22 = vpack.c.bf16 %v4635_v14, %v4634_v10  ;;  %v4620_v16 = vld [vmem:[#allocation11 + $0x160] sm:$0xff] }
 0x44c   :  { %4590 = vmatmul.mubr.f32.vlgmr.msra.gmra.mrb[12].mxu1 %v4446_v24  ;;  %v4428_v9 = vmul.f32 %v3963_v25, %v3441_v26  ;;  %v4432_v62 = vmul.f32 %v3965_v53, %v7306_v55  ;;  %v4429_v29 = vmul.f32 %v3963_v25, %v3443_v56  ;;  %v4433_v50 = vmul.f32 %v3965_v53, %v7313_v11  ;;  %v4617_v11 = vld [vmem:[#allocation11 + $0x118] sm:$0xff] }
 0x44d   :  { %5209 = vmatpush3.bf16.msra.mxu1 %v5208_v0  ;;  %v4440_v43 = vmul.f32 %v3967_v12, %v7357_v57  ;;  %v5226_v55 = vpack.c.bf16 %v4633_v23, %v4632_v27  ;;  %v4441_v63 = vmul.f32 %v3967_v12, %v7359_v37  ;;  %v5228_v54 = vpack.c.bf16 %v4617_v11, %v4616_v30  ;;  %v4618_v57 = vld [vmem:[#allocation11 + $0x130] sm:$0xff]  ;;  %v4636_v37 = vld [vmem:[#allocation11 + $0x2e0] sm:$0xff]  ;;  %v4637_v24 = vld [vmem:[#allocation11 + $0x2f8] sm:$0xff] }
 0x44e   :  { %5211 = vmatprep.subr.bf16.mxu1 %v5210_v44  ;;  %v4436_v31 = vadd.f32 %v4432_v62, %v4428_v9  ;;  %v4437_v59 = vadd.f32 %v4433_v50, %v4429_v29  ;;  %v5232_v48 = vpack.c.bf16 %v4619_v15, %v4618_v57  ;;  %v5234_v0 = vpack.c.bf16 %v4637_v24, %v4636_v37  ;;  %v4621_v44 = vld [vmem:[#allocation11 + $0x178] sm:$0xff] }
 0x44f   :  { %v5236_v38 = vpack.c.bf16 %v4621_v44, %v4620_v16 }
 0x450   :  { %v4444_v41 = vadd.f32 %v4440_v43, %v4436_v31  ;;  %v4445_v34 = vadd.f32 %v4441_v63, %v4437_v59 }
 0x451   :  { %v5389_v4 = vpop.eup %5388  ;;  %5213 = vmatpush3.bf16.msra.mxu1 %v5212_v7 }
 0x452   :  { %v5391_v52 = vpop.eup %5390  ;;  %v4416_v35 = vadd.f32 1.0, %v5389_v4  ;;  %5215 = vmatprep.subr.bf16.mxu1 %v5214_v3 }
 0x453   :  { %v4417_v49 = vadd.f32 1.0, %v5391_v52 }
 0x454   :  { %5392 = vrcp.f32 %v4416_v35 }
 0x455   :  { %5394 = vrcp.f32 %v4417_v49  ;;  %5217 = vmatpush3.bf16.msra.mxu1 %v5216_v60 }
 0x456   :  { %5219 = vmatprep.subr.bf16.mxu1 %v5218_v45 }
 0x459   :  { %5221 = vmatpush3.bf16.msra.mxu1 %v5220_v32 }
 0x45a   :  { %5223 = vmatprep.subr.bf16.mxu1 %v5222_v28 }
 0x45d   :  { %5225 = vmatpush3.bf16.msra.mxu1 %v5224_v8 }
 0x45e   :  { %v5393_v61 = vpop.eup %5392  ;;  %5227 = vmatprep.subr.bf16.mxu1 %v5226_v55 }
 0x45f   :  { %v5395_v58 = vpop.eup %5394  ;;  %v4448_v42 = vmul.f32 %v5393_v61, %v4444_v41 }
 0x460   :  { %v4449_v46 = vmul.f32 %v5395_v58, %v4445_v34 }
 0x461   :  { %5229 = vmatpush3.bf16.msra.mxu1 %v5228_v54 }
 0x462   :  { %4595 = vmatprep.mubr.f32.mxu1 %v4449_v46  ;;  %5231 = vmatprep.subr.bf16.mxu1 %v5230_v22 }
 0x463   :  { %4596 = vmatmul.mubr.f32.gmra.mrb[14].mxu1 %v4448_v42 }
 0x465   :  { %5233 = vmatpush3.bf16.msra.mxu1 %v5232_v48 }
 0x466   :  { %5235 = vmatprep.subr.bf16.mxu1 %v5234_v0 }
 0x469   :  { %5237 = vmatpush3.bf16.msra.mxu1 %v5236_v38 }
 0x51f   :  { %v4591_v20 = vpop.f32.mrb[12].mxu1 }
 0x520   :  { %v4592_v7 = vadd.f32 %v4591_v20, %v4518_v36  ;;  %v4593_v3 = vpop.f32.mrb[13].mxu1 }
 0x521   :  { %v4594_v47 = vadd.f32 %v4593_v3, %v4522_v51 }
 0x522   :  { %v4602_v5 = vmax.f32 %v4592_v7, 0.0 }
 0x523   :  { %v4603_v40 = vmax.f32 %v4594_v47, 0.0 }
 0x525   :  { %4709 = vmatprep.mubr.f32.mxu1 %v4603_v40 }
 0x526   :  { %4710 = vmatmul.mubr.f32.vlgmr.msra.gmra.mrb[16].mxu1 %v4602_v5 }
 0x536   :  { %v4597_v39 = vpop.f32.mrb[14].mxu1 }
 0x537   :  { %v4598_v4 = vadd.f32 %v4597_v39, %v4518_v36  ;;  %v4599_v25 = vpop.f32.mrb[15].mxu1 }
 0x538   :  { %v4600_v53 = vadd.f32 %v4599_v25, %v4522_v51 }
 0x539   :  { %v4604_v35 = vmax.f32 %v4598_v4, 0.0 }
 0x53a   :  { %v4605_v52 = vmax.f32 %v4600_v53, 0.0 }
 0x53c   :  { %4714 = vmatprep.mubr.f32.mxu1 %v4605_v52 }
 0x53d   :  { %4715 = vmatmul.mubr.f32.gmra.mrb[18].mxu1 %v4604_v35 }
 0x5f9   :  { %v4800_v60 = vpop.f32.mrb[16].mxu1 }
 0x5fa   :  { %v4801_v19 = vpop.f32.mrb[17].mxu1 }
 0x5fb   :  { %v4802_v26 = vadd.f32 %v4801_v19, %v4800_v60 }
 0x5fd   :  { %v4712_v49 = vadd.f32 %v4802_v26, %v4767_v2 }
 0x5ff   :  { %4720 = vst [vmem:[#allocation13] sm:$0xff] %v4712_v49 }
 0x610   :  { %v4803_v45 = vpop.f32.mrb[18].mxu1 }
 0x611   :  { %v4804_v1 = vpop.f32.mrb[19].mxu1 }
 0x612   :  { %v4805_v6 = vadd.f32 %v4804_v1, %v4803_v45 }
 0x614   :  { %v4717_v56 = vadd.f32 %v4805_v6, %v4767_v2 }
 0x616   :  { %4721 = vst [vmem:[#allocation13 + $0x8] sm:$0xff] %v4717_v56 }
 0x617   :  { %5542 = shalt.err (!%p5539_p10)
}
 0x618   :  { %s5543_s29 = scalar_lea.hbm %s7424_s13, 256 }
 0x619   :  { %p5544_p11 = scmp.ne.s32.totalorder %s7424_s13, %s5543_s29  ;;  %p5547_p12 = scmp.lt.u32.totalorder %s5543_s29, %s7424_s13 }
 0x61b   :  { %p5549_p13 = pnand %p5547_p12, %p5544_p11 }
 0x61d   :  { %5552 = shalt.err (!%p5549_p13)
}
 0x61e   :  { %4733 = dma.vmem_to_hbm [thread:$0]  %s4728_s28, 256, %s7424_s13, [#allocation4], %s5570_s8, %s5570_s8, %s5571_s23  }
 0x61f   :  { %5561 = dma.done.wait [#allocation4], 256  }
 0x620   :  { %5562 = vsyncadd [#allocation4], 4294967040 }
 0x621   :  { %4737 = vsyncpa [#allocation3], 1 }
 0x622   :  { %4738 = vsyncpa [#allocation6], 1 }
 0x623   :  { %4739 = vsyncpa [#allocation9], 1 }
 0x624   :  { %4740 = vsyncpa [#allocation12], 1 }
 0x625   :  { %4741 = vsyncpa [#allocation4], 1 }

</bundles_post_ra>
